<compile_context>
chip_gen: v7x
topology: tpu7x:2x2x1
jax: 0.10.0
libtpu: 0.0.40
codegen_flags: <defaults>
</compile_context>

<pallas_src>
import functools

import jax
import jax.numpy as jnp
from jax.experimental import pallas as pl
from jax.experimental.pallas import tpu as pltpu


_LANE = 1024                      # lane-dense last dim (multiple of 128)
_MIN_GRID_STEPS = 4               # >= 2 TensorCores (v7x) x 2-deep pipeline
_SMALL_INPUT_BYTES = 128 * 1024   # below this, plain func(x) beats kernel overhead


def _round_up(a, b):
    return (a + b - 1) // b * b


def _lambda_kernel(func, x_ref, o_ref):
    # The whole Lambda "compute": load the block, apply func, store the result.
    o_ref[...] = func(x_ref[...])


def _vmem_budget():
    """Returns (bytes_per_io_buffer, vmem_limit_bytes), generation-aware."""
    try:
        vmem = int(pltpu.get_tpu_info().vmem_capacity_bytes)
    except Exception:
        vmem = 64 * 1024 * 1024                      # conservative (v7x-sized)
    if vmem >= 128 * 1024 * 1024:                    # v5e / v6e
        return 4 * 1024 * 1024, 32 * 1024 * 1024
    # v7x (64 MiB physical): 2 MiB blocks (~8 MiB double-buffered IO), leave
    # headroom for func's intermediate temporaries.
    return 2 * 1024 * 1024, min(48 * 1024 * 1024, (vmem * 3) // 4)


def make_lambda(func, elementwise=True, batch_dims=0, small_input_bypass=True):
    """Pallas equivalent of `Lambda(func)`: returns a callable y = func(x).

    `func` must be JAX-traceable and shape/dtype-preserving.
      * elementwise=True (default): func must be pointwise; the input is
        flattened to a lane-dense (M, 1024) slab and row-tiled.
      * elementwise=False: axis-dependent funcs (softmax, norms, ...).  Set
        `batch_dims=k` if func is independent across the first k axes — the
        kernel then tiles over those axes (required for large arrays, and the
        VMEM ceiling is half as big on v7x as on v5e/v6e).
    """
    kernel = functools.partial(_lambda_kernel, func)

    # ---------------- elementwise (pointwise) path ----------------
    def _apply_elementwise(x):
        orig_shape = x.shape
        n = x.size
        itemsize = jnp.dtype(x.dtype).itemsize
        sub_mult = 8 * max(1, 4 // itemsize)   # 8 f32 / 16 bf16 / 32 int8 rows

        buf_bytes, vmem_limit = _vmem_budget()

        rows_needed = pl.cdiv(n, _LANE)
        if n % _LANE == 0:
            # Fast path (common NN case): no pad, no tail slice.
            m, pad = rows_needed, 0
        else:
            # Pad only to the sublane multiple (< sub_mult*1024 extra elements).
            m = _round_up(rows_needed, sub_mult)
            pad = m * _LANE - n

        flat = x.reshape(-1)
        if pad:
            flat = jnp.pad(flat, (0, pad))
        x2d = flat.reshape(m, _LANE)

        # Block rows: big enough to sit at the HBM roofline, small enough that
        # large inputs always get >= _MIN_GRID_STEPS pipelined grid steps.
        target_rows = max(sub_mult,
                          (buf_bytes // (_LANE * itemsize)) // sub_mult * sub_mult)
        rows_for_steps = _round_up(pl.cdiv(m, _MIN_GRID_STEPS), sub_mult)
        block_rows = max(sub_mult, min(target_rows, rows_for_steps))
        block_rows = min(block_rows, _round_up(m, sub_mult))
        grid = pl.cdiv(m, block_rows)          # partial last block is masked

        try:
            cost = pl.estimate_cost(func, jax.ShapeDtypeStruct((m, _LANE), x.dtype))
        except Exception:
            cost = pl.CostEstimate(flops=2 * m * _LANE, transcendentals=0,
                                   bytes_accessed=2 * m * _LANE * itemsize)

        out2d = pl.pallas_call(
            kernel,
            out_shape=jax.ShapeDtypeStruct((m, _LANE), x.dtype),
            grid_spec=pl.GridSpec(
                grid=(grid,),
                in_specs=[pl.BlockSpec((block_rows, _LANE), lambda i: (i, 0))],
                out_specs=pl.BlockSpec((block_rows, _LANE), lambda i: (i, 0)),
            ),
            compiler_params=pltpu.CompilerParams(
                dimension_semantics=("parallel",),
                vmem_limit_bytes=vmem_limit,
            ),
            cost_estimate=cost,
        )(x2d)

        out_flat = out2d.reshape(-1)
        if pad:
            out_flat = out_flat[:n]
        return out_flat.reshape(orig_shape)

    # ---------------- axis-dependent fallback path ----------------
    def _apply_fallback(x):
        _, vmem_limit = _vmem_budget()
        # Keep the last two dims whole inside every block ((8,128) rule) and
        # only tile over declared-independent leading axes.
        nd = max(0, min(batch_dims, x.ndim - 2))
        if nd == 0:
            # Fully general whole-array block (valid while it fits VMEM).
            return pl.pallas_call(
                kernel,
                out_shape=jax.ShapeDtypeStruct(x.shape, x.dtype),
                compiler_params=pltpu.CompilerParams(vmem_limit_bytes=vmem_limit),
            )(x)

        grid = x.shape[:nd]
        block_shape = (1,) * nd + x.shape[nd:]

        def idx(*g):
            return tuple(g) + (0,) * (x.ndim - nd)

        return pl.pallas_call(
            kernel,
            out_shape=jax.ShapeDtypeStruct(x.shape, x.dtype),
            grid_spec=pl.GridSpec(
                grid=grid,
                in_specs=[pl.BlockSpec(block_shape, idx)],
                out_specs=pl.BlockSpec(block_shape, idx),
            ),
            compiler_params=pltpu.CompilerParams(
                dimension_semantics=("parallel",) * nd,
                vmem_limit_bytes=vmem_limit,
            ),
        )(x)

    def apply(x):
        if elementwise:
            nbytes = x.size * jnp.dtype(x.dtype).itemsize
            if small_input_bypass and nbytes < _SMALL_INPUT_BYTES:
                # Tiny input: kernel launch + reshape overhead dominates;
                # let XLA fuse func(x) directly.
                return func(x)
            return _apply_elementwise(x)
        return _apply_fallback(x)

    return apply


if __name__ == "__main__":
    key = jax.random.PRNGKey(0)
    k1, k2, k3 = jax.random.split(key, 3)

    # Concrete func handed to Lambda (elementwise SiLU); no parameters to init.
    func = lambda t: t * jax.nn.sigmoid(t)
    lambda_mod = make_lambda(func)                 # == Lambda(func)

    # 1) Small NCHW input consistent with the module (bypass path: func(x)).
    x = jax.random.normal(key, (2, 4, 16, 16), dtype=jnp.float32)
    y = lambda_mod(x)                              # == Lambda(func)(x)
    jax.block_until_ready(y)
    assert y.shape == x.shape and y.dtype == x.dtype
    assert jnp.allclose(y, func(x), atol=1e-6, rtol=1e-6)

    # 2) Larger activation -> Pallas elementwise kernel, fast path (no padding).
    x_big = jax.random.normal(k1, (8, 32, 64, 64), dtype=jnp.float32)   # 8 MiB
    y_big = lambda_mod(x_big)
    jax.block_until_ready(y_big)
    assert jnp.allclose(y_big, func(x_big), atol=1e-6, rtol=1e-6)

    # 3) Odd-sized input -> minimal (sublane-only) padding + partial last block.
    x_odd = jax.random.normal(k2, (1000, 300), dtype=jnp.float32)
    y_odd = lambda_mod(x_odd)
    jax.block_until_ready(y_odd)
    assert jnp.allclose(y_odd, func(x_odd), atol=1e-6, rtol=1e-6)

    # 4) Non-elementwise fallback: axis-dependent func, tiled over the batch axis.
    sm = make_lambda(lambda t: jax.nn.softmax(t, axis=1),
                     elementwise=False, batch_dims=1)
    x_sm = jax.random.normal(k3, (2, 4, 16, 16), dtype=jnp.float32)
    y_sm = sm(x_sm)
    jax.block_until_ready(y_sm)
    assert jnp.allclose(y_sm, jax.nn.softmax(x_sm, axis=1), atol=1e-6, rtol=1e-6)

    print("KERNEL_OK")
</pallas_src>

<mosaic_0001>
module attributes {stable_mosaic.version = 11 : i64} {
  func.func @_lambda_kernel(%arg0: i32, %arg1: memref<256x1024xf32, #tpu.memory_space<vmem>>, %arg2: memref<256x1024xf32, #tpu.memory_space<vmem>>) attributes {dimension_semantics = [#tpu.dimension_semantics<parallel>], iteration_bounds = array<i64: 4>, scalar_prefetch = 0 : i64, scratch_operands = 0 : i64, tpu.core_type = #tpu.core_type<tc>, window_params = [{transform_indices = @transform_0, window_bounds = array<i64: 256, 1024>}, {transform_indices = @transform_1, window_bounds = array<i64: 256, 1024>}]} {
    %c0 = arith.constant 0 : index
    %c0_0 = arith.constant 0 : index
    %0 = vector.load %arg1[%c0, %c0_0] : memref<256x1024xf32, #tpu.memory_space<vmem>>, vector<256x1024xf32>
    %1 = arith.negf %0 : vector<256x1024xf32>
    %2 = math.exp %1 : vector<256x1024xf32>
    %cst = arith.constant 1.000000e+00 : f32
    %3 = vector.broadcast %cst : f32 to vector<256x1024xf32>
    %4 = arith.addf %3, %2 : vector<256x1024xf32>
    %5 = arith.divf %3, %4 : vector<256x1024xf32>
    %6 = arith.mulf %0, %5 : vector<256x1024xf32>
    %c0_1 = arith.constant 0 : index
    %c0_2 = arith.constant 0 : index
    %7 = vector.load %arg2[%c0_1, %c0_2] : memref<256x1024xf32, #tpu.memory_space<vmem>>, vector<256x1024xf32>
    tpu.vector_store %arg2[%c0_1, %c0_2], %6 {strides = array<i32>} : memref<256x1024xf32, #tpu.memory_space<vmem>>, vector<256x1024xf32>,
    return
  }
  func.func @transform_0(%arg0: i32) -> (i32, i32) {
    %c0_i32 = arith.constant 0 : i32
    %c0_i32_0 = arith.constant 0 : i32
    return %arg0, %c0_i32 : i32, i32
  }
  func.func @transform_1(%arg0: i32) -> (i32, i32) {
    %c0_i32 = arith.constant 0 : i32
    %c0_i32_0 = arith.constant 0 : i32
    return %arg0, %c0_i32 : i32, i32
  }
}

</mosaic_0001>

<bundles_post_ra>
// kernel: tpu_custom_call.1
= control target key start
LH: loop header
LB: loop body
LE: loop exit
PB: predicated region body
PF: predicated region fallthrough
CT: control target
= control target key end

     0   :  { %6 = vsyncpa [#allocation3], 0  ;;  %s5699_s0 = inlined_call_operand.hbm [shape: f32[1024,1024], index: 0, kind: input, shape index: {}]   ;;  %s5700_s1 = inlined_call_operand.hbm [shape: f32[1024,1024], index: 1, kind: output, shape index: {}]  }
   0x1   :  { %8 = vsyncpa [#allocation3 + $0x1], 0 }
   0x2   :  { %9 = vsyncpa [#allocation4], 0 }
   0x3   :  { %11 = vsyncpa [#allocation4 + $0x1], 0  ;;  %s3994_s6 = smov 0   ;;  %s3996_s7 = smov 0  }
   0x4   :  { %s3998_s8 = smov 0   ;;  %s4000_s9 = smov 0  }
   0x5 LB: > { %s4015_s10 = sadd.s32 4294967295, %s3976_s9   ;;  %s2530_s11 = sadd.s32 4294967294, %s3976_s9   ;;  %s3976_s9 = sphi %s4000_s9, %s5712_s9   ;;  %s3972_s8 = sphi %s3998_s8, %s5711_s8   ;;  %s3968_s7 = sphi %s3996_s7, %s5710_s7   ;;  %s3964_s6 = sphi %s3994_s6, %s5709_s6  }
   0x6   : > { %s4019_s12 = sadd.s32 1, %s3976_s9   ;;  %s24_s13 = sadd.s32 1, %s3972_s8 }
   0x7   : > { %s21_s14 = ssub.s32 %s3976_s9, %s4019_s12  ;;  %p31_p0 = scmp.ne.s32.totalorder %s3972_s8, %s3968_s7 }
   0x8   : > { %p22_p1 = scmp.eq.s32.totalorder %s21_s14, 0  ;;  %p32_p2 = scmp.eq.s32.totalorder %s3976_s9, 0 }
   0x9   : > { %p37_p3 = scmp.ne.s32.totalorder %s3968_s7, %s3964_s6  ;;  %p38_p4 = scmp.eq.s32.totalorder %s4015_s10, 0 }
   0xa   : > { %s4031_s15 = scalar_select %p22_p1, %s3972_s8, %s24_s13  }
   0xb   : > { %p4033_p5 = por %p32_p2, %p31_p0  ;;  %p4037_p6 = por %p38_p4, %p37_p3 }
   0xc   : > { %p61_p7 = scmp.eq.s32.totalorder %s4015_s10, 3  ;;  %p67_p8 = scmp.eq.s32.totalorder %s2530_s11, 3 }
   0xd   : > { %p2818_p9 = scmp.lt.s32.totalorder %s3976_s9, 4  ;;  %s87_s20 = sand.u32 1, %s3972_s8  }
   0xe   : > { %p4043_p10 = por %p61_p7, %p31_p0  ;;  %p4047_p11 = por %p67_p8, %p37_p3 }
   0xf   : > { %s2803_s21 = sshll.u32 %s3976_s9, 15  ;;  %s2533_s22 = sshll.u32 %s87_s20, 11 }
  0x10   : > { %s5704_s18 = scalar_select %p4043_p10, 1, 0 }
  0x11   : > { %s5705_s19 = scalar_select %p4047_p11, 1, 0 }
  0x12   : > { %s4056_s25 = scalar_lea.hbm %s5699_s0, %s2803_s21  ;;  %s91_s26 = scalar_lea.vmem [#allocation2], %s2533_s22 }
  0x13   : > { %s99_s27 = sshll.u32 %s91_s26, 4  ;;  %p4060_p12 = pnand %p2818_p9, %p4033_p5  ;;  %s4064_s27 = int_to_ptr.vmem [resolvable:$true] %s99_s27 }
  0x14   : > { %s4066_s29 = scalar_lea.sflag [#allocation3], %s87_s20  ;;  %s3880_s30 = scalar_lea.hbm %s4056_s25, 32768 }
  0x15   : > { %p3881_p13 = scmp.ne.s32.totalorder %s4056_s25, %s3880_s30  ;;  %p3882_p0 = pneg %p4060_p12 }
  0x16   : > { %s3885_s4 = scalar_lea.hbm %s5699_s0, 131072  ;;  %p3886_p3 = scmp.lt.u32.totalorder %s4056_s25, %s5699_s0 }
  0x17   : > { %p3883_p1 = pnand %p3882_p0, %p3881_p13  ;;  %p3887_p4 = scmp.lt.u32.totalorder %s3885_s4, %s3880_s30 }
  0x18   : > { %p3889_p7 = scmp.lt.u32.totalorder %s3880_s30, %s4056_s25 }
  0x19   : > { %p3884_p2 = pneg %p3883_p1  ;;  %p3888_p5 = por %p3887_p4, %p3886_p3 }
  0x1b   : > { %p3890_p8 = por %p3889_p7, %p3888_p5 }
  0x1d   : > { %p3891_p9 = pnand %p3890_p8, %p3884_p2 }
  0x1f   : > { %3894 = shalt.err (!%p3891_p9)
}
  0x20   : > { %s3895_s13 = scalar_lea.vmem %s4064_s27, 32768  ;;  %s3978_s14 = smov [#allocation2]  }
  0x21   : > { %p3896_p13 = scmp.ne.s32.totalorder %s4064_s27, %s3895_s13  ;;  %s3900_s16 = sshll.u32 %s3978_s14, 4  ;;  %s3901_s16 = int_to_ptr.vmem [resolvable:$false] %s3900_s16 }
  0x22   : > { %s3902_s20 = scalar_lea.vmem %s3901_s16, 65536  ;;  %p3903_p10 = scmp.lt.s32.totalorder %s4064_s27, %s3901_s16 }
  0x23   : > { %p3898_p1 = pnand %p3896_p13, %p3882_p0  ;;  %p3904_p3 = scmp.lt.s32.totalorder %s3902_s20, %s3895_s13 }
  0x25   : > { %p3899_p11 = pneg %p3898_p1  ;;  %p3905_p4 = por %p3904_p3, %p3903_p10 }
  0x27   : > { %p3906_p5 = pnand %p3905_p4, %p3899_p11 }
  0x29   : > { %3909 = shalt.err (!%p3906_p5)
}
  0x2a   : > { %s3979_s21 = smov 1024   ;;  %s3980_s22 = smov 64  }
  0x2b   : > { %2813 = dma.hbm_to_vmem [thread:$0]  (!%p4060_p12), %s4056_s25, 32768, %s4064_s27, %s4066_s29, %s3979_s21, %s3979_s21, %s3980_s22  }
  0x2c   : > { %p2537_p0 = scmp.ge.s32.totalorder %s3976_s9, 1  ;;  %p107_p2 = scmp.lt.s32.totalorder %s3976_s9, 5 }
  0x2e   : > { %p108_p7 = pnand %p2537_p0, %p107_p2 }
  0x2f   : > { %s4097_s23 = sand.u32 (!%p108_p7), 1, %s3968_s7  }
  0x30   : > { %111 = sbr.rel (%p108_p7) target bundleno = 602 (0x25a), region = 24  ;;  %s2538_s24 = sshll.u32 (!%p108_p7), %s4097_s23, 11 }
  0x31   : > { %s114_s26 = scalar_lea.sflag (!%p108_p7), [#allocation3], %s4097_s23  ;;  %s4103_s30 = scalar_lea.vmem (!%p108_p7), [#allocation2], %s2538_s24 }
  0x37   : > { %3955 = dma.done.wait (%p4037_p6), %s114_s26, 32768  }
  0x38   : > { %3957 = vsyncadd (%p4037_p6), %s114_s26, 4294934528  ;;  %v4110_v0 = vld [vmem:[%s4103_s30] sm:$0xff]  ;;  %v4113_v1 = vld [vmem:[%s4103_s30 + $0x8] sm:$0xff]  ;;  %s4190_s17 = scalar_lea.vmem [#allocation5], %s2538_s24  ;;  %s2805_s25 = sshll.u32 %s4015_s10, 15 }
  0x39   : > { %v4116_v2 = vld [vmem:[%s4103_s30 + $0x10] sm:$0xff]  ;;  %v2540_v3 = vmul.f32 -1.442695, %v4110_v0  ;;  %v2541_v4 = vmul.f32 -1.442695, %v4113_v1  ;;  %v4122_v6 = vld [vmem:[%s4103_s30 + $0x18] sm:$0xff]  ;;  %s5650_s10 = scalar_lea.hbm %s5700_s1, %s2805_s25 }
  0x3a   : > { %v2542_v5 = vmul.f32 -1.442695, %v4116_v2  ;;  %v4125_v7 = vld [vmem:[%s4103_s30 + $0x20] sm:$0xff]  ;;  %v4128_v8 = vld [vmem:[%s4103_s30 + $0x28] sm:$0xff]  ;;  %v2543_v9 = vmul.f32 -1.442695, %v4122_v6 }
  0x3b   : > { %2856 = vpow2.f32 %v2540_v3  ;;  %v2544_v10 = vmul.f32 -1.442695, %v4125_v7  ;;  %v2545_v11 = vmul.f32 -1.442695, %v4128_v8  ;;  %v4134_v12 = vld [vmem:[%s4103_s30 + $0x30] sm:$0xff]  ;;  %v4137_v13 = vld [vmem:[%s4103_s30 + $0x38] sm:$0xff] }
  0x3c   : > { %2858 = vpow2.f32 %v2541_v4  ;;  %v4140_v14 = vld [vmem:[%s4103_s30 + $0x40] sm:$0xff]  ;;  %v2546_v15 = vmul.f32 -1.442695, %v4134_v12  ;;  %v2547_v16 = vmul.f32 -1.442695, %v4137_v13  ;;  %v4145_v17 = vld [vmem:[%s4103_s30 + $0x48] sm:$0xff] }
  0x3d   : > { %2860 = vpow2.f32 %v2542_v5  ;;  %v4148_v18 = vld [vmem:[%s4103_s30 + $0x50] sm:$0xff]  ;;  %v2548_v19 = vmul.f32 -1.442695, %v4140_v14  ;;  %v4152_v20 = vld [vmem:[%s4103_s30 + $0x58] sm:$0xff]  ;;  %v2549_v21 = vmul.f32 -1.442695, %v4145_v17 }
  0x3e   : > { %2862 = vpow2.f32 %v2543_v9  ;;  %v4156_v22 = vld [vmem:[%s4103_s30 + $0x60] sm:$0xff]  ;;  %v2550_v23 = vmul.f32 -1.442695, %v4148_v18  ;;  %v2551_v24 = vmul.f32 -1.442695, %v4152_v20  ;;  %v4162_v45 = vld [vmem:[%s4103_s30 + $0x68] sm:$0xff] }
  0x3f   : > { %2864 = vpow2.f32 %v2544_v10  ;;  %v2552_v25 = vmul.f32 -1.442695, %v4156_v22  ;;  %v4165_v48 = vld [vmem:[%s4103_s30 + $0x70] sm:$0xff]  ;;  %v4168_v51 = vld [vmem:[%s4103_s30 + $0x78] sm:$0xff]  ;;  %v2553_v54 = vmul.f32 -1.442695, %v4162_v45 }
  0x40   : > { %2866 = vpow2.f32 %v2545_v11  ;;  %v4172_v55 = vld [vmem:[%s4103_s30 + $0x80] sm:$0xff]  ;;  %v2554_v58 = vmul.f32 -1.442695, %v4165_v48  ;;  %v4176_v59 = vld [vmem:[%s4103_s30 + $0x88] sm:$0xff]  ;;  %v2555_v62 = vmul.f32 -1.442695, %v4168_v51 }
  0x41   : > { %2868 = vpow2.f32 %v2546_v15  ;;  %v4181_v63 = vld [vmem:[%s4103_s30 + $0x90] sm:$0xff]  ;;  %v2556_v5 = vmul.f32 -1.442695, %v4172_v55  ;;  %v4186_v9 = vld [vmem:[%s4103_s30 + $0x98] sm:$0xff]  ;;  %v4196_v11 = vld [vmem:[%s4103_s30 + $0xa0] sm:$0xff]  ;;  %s2457_s27 = sshll.u32 %s4190_s17, 4  ;;  %s5652_s27 = int_to_ptr.vmem [resolvable:$true] %s2457_s27 }
  0x42   : > { %2870 = vpow2.f32 %v2547_v16  ;;  %s2443_s2 = scalar_lea.sflag [#allocation4], %s4097_s23  ;;  %s3910_s3 = scalar_lea.vmem %s5652_s27, 32768 }
  0x43   : > { %2872 = vpow2.f32 %v2548_v19  ;;  %v2558_v19 = vmul.f32 -1.442695, %v4181_v63  ;;  %p3911_p6 = scmp.ne.s32.totalorder %s5652_s27, %s3910_s3  ;;  %p5707_p10 = scmp.ne.s32.totalorder %s5704_s18, 0 }
  0x44   : > { %2874 = vpow2.f32 %v2549_v21  ;;  %v4202_v21 = vld [vmem:[%s4103_s30 + $0xa8] sm:$0xff]  ;;  %s3981_s4 = smov [#allocation5]  }
  0x45   : > { %v2857_v26 = vpop.eup %2856  ;;  %2876 = vpow2.f32 %v2550_v23  ;;  %p3912_p11 = pnand %p3911_p6, %p5707_p10  ;;  %s3914_s5 = sshll.u32 %s3981_s4, 4  ;;  %s3915_s5 = int_to_ptr.vmem [resolvable:$false] %s3914_s5 }
  0x46   : > { %v2859_v27 = vpop.eup %2858  ;;  %v1162_v28 = vadd.f32 1.0, %v2857_v26  ;;  %2878 = vpow2.f32 %v2551_v24  ;;  %v2559_v24 = vmul.f32 -1.442695, %v4186_v9  ;;  %s3916_s11 = scalar_lea.vmem %s3915_s5, 65536  ;;  %p3917_p8 = scmp.lt.s32.totalorder %s5652_s27, %s3915_s5 }
  0x47   : > { %v2861_v29 = vpop.eup %2860  ;;  %v1163_v30 = vadd.f32 1.0, %v2859_v27  ;;  %2880 = vpow2.f32 %v2552_v25  ;;  %v4208_v25 = vld [vmem:[%s4103_s30 + $0xb0] sm:$0xff]  ;;  %v2560_v27 = vmul.f32 -1.442695, %v4196_v11  ;;  %p3913_p12 = pneg %p3912_p11  ;;  %p3918_p9 = scmp.lt.s32.totalorder %s3916_s11, %s3910_s3 }
  0x48   : > { %v2863_v31 = vpop.eup %2862  ;;  %2882 = vrcp.f32 %v1162_v28  ;;  %v1164_v32 = vadd.f32 1.0, %v2861_v29  ;;  %v4214_v28 = vld [vmem:[%s4103_s30 + $0xb8] sm:$0xff] }
  0x49   : > { %v2865_v33 = vpop.eup %2864  ;;  %2884 = vrcp.f32 %v1163_v30  ;;  %v1165_v34 = vadd.f32 1.0, %v2863_v31  ;;  %v2561_v30 = vmul.f32 -1.442695, %v4202_v21  ;;  %v4220_v31 = vld [vmem:[%s4103_s30 + $0xc0] sm:$0xff]  ;;  %p3919_p13 = por %p3918_p9, %p3917_p8 }
  0x4a   : > { %v2867_v35 = vpop.eup %2866  ;;  %2886 = vrcp.f32 %v1164_v32  ;;  %v1166_v36 = vadd.f32 1.0, %v2865_v33  ;;  %v2562_v33 = vmul.f32 -1.442695, %v4208_v25 }
  0x4b   : > { %v2869_v37 = vpop.eup %2868  ;;  %2888 = vrcp.f32 %v1165_v34  ;;  %v1167_v38 = vadd.f32 1.0, %v2867_v35  ;;  %v4226_v34 = vld [vmem:[%s4103_s30 + $0xc8] sm:$0xff]  ;;  %p3920_p1 = pnand %p3919_p13, %p3913_p12 }
  0x4c   : > { %v2871_v39 = vpop.eup %2870  ;;  %2890 = vrcp.f32 %v1166_v36  ;;  %v1168_v40 = vadd.f32 1.0, %v2869_v37  ;;  %v2563_v36 = vmul.f32 -1.442695, %v4214_v28 }
  0x4d   : > { %v2873_v41 = vpop.eup %2872  ;;  %2892 = vrcp.f32 %v1167_v38  ;;  %v1169_v42 = vadd.f32 1.0, %v2871_v39 }
  0x4e   : > { %v2875_v43 = vpop.eup %2874  ;;  %2894 = vrcp.f32 %v1168_v40  ;;  %v1170_v44 = vadd.f32 1.0, %v2873_v41 }
  0x4f   : > { %v2877_v46 = vpop.eup %2876  ;;  %2896 = vrcp.f32 %v1169_v42  ;;  %v1171_v47 = vadd.f32 1.0, %v2875_v43 }
  0x50   : > { %v2879_v49 = vpop.eup %2878  ;;  %2898 = vrcp.f32 %v1170_v44  ;;  %v1172_v50 = vadd.f32 1.0, %v2877_v46 }
  0x51   : > { %v2881_v52 = vpop.eup %2880  ;;  %2900 = vrcp.f32 %v1171_v47  ;;  %v1173_v53 = vadd.f32 1.0, %v2879_v49 }
  0x52   : > { %v2883_v56 = vpop.eup %2882  ;;  %2902 = vrcp.f32 %v1172_v50  ;;  %v1174_v57 = vadd.f32 1.0, %v2881_v52 }
  0x53   : > { %v2885_v60 = vpop.eup %2884  ;;  %v1930_v61 = vmul.f32 %v2883_v56, %v4110_v0  ;;  %2904 = vrcp.f32 %v1173_v53 }
  0x54   : > { %v2887_v3 = vpop.eup %2886  ;;  %v1931_v4 = vmul.f32 %v2885_v60, %v4113_v1  ;;  %2906 = vrcp.f32 %v1174_v57  ;;  %v2557_v1 = vmul.f32 -1.442695, %v4176_v59 }
  0x55   : > { %v2889_v10 = vpop.eup %2888  ;;  %2186 = vst [vmem:[%s4190_s17] sm:$0xff] %v1930_v61  ;;  %v1932_v0 = vmul.f32 %v2887_v3, %v4116_v2  ;;  %2908 = vpow2.f32 %v2553_v54 }
  0x56   : > { %v2891_v15 = vpop.eup %2890  ;;  %2187 = vst [vmem:[%s4190_s17 + $0x8] sm:$0xff] %v1931_v4  ;;  %v1933_v16 = vmul.f32 %v2889_v10, %v4122_v6  ;;  %2910 = vpow2.f32 %v2554_v58  ;;  %v4244_v4 = vld [vmem:[%s4103_s30 + $0xd0] sm:$0xff] }
  0x57   : > { %v2893_v23 = vpop.eup %2892  ;;  %2188 = vst [vmem:[%s4190_s17 + $0x10] sm:$0xff] %v1932_v0  ;;  %v1934_v2 = vmul.f32 %v2891_v15, %v4125_v7  ;;  %2912 = vpow2.f32 %v2555_v62  ;;  %v4247_v0 = vld [vmem:[%s4103_s30 + $0xd8] sm:$0xff] }
  0x58   : > { %v2895_v26 = vpop.eup %2894  ;;  %2189 = vst [vmem:[%s4190_s17 + $0x18] sm:$0xff] %v1933_v16  ;;  %v1935_v6 = vmul.f32 %v2893_v23, %v4128_v8  ;;  %2914 = vpow2.f32 %v2556_v5  ;;  %v4250_v16 = vld [vmem:[%s4103_s30 + $0xe0] sm:$0xff] }
  0x59   : > { %v2897_v29 = vpop.eup %2896  ;;  %2190 = vst [vmem:[%s4190_s17 + $0x20] sm:$0xff] %v1934_v2  ;;  %v1936_v7 = vmul.f32 %v2895_v26, %v4134_v12  ;;  %2916 = vpow2.f32 %v2557_v1  ;;  %v2566_v2 = vmul.f32 -1.442695, %v4244_v4 }
  0x5a   : > { %v2899_v32 = vpop.eup %2898  ;;  %2191 = vst [vmem:[%s4190_s17 + $0x28] sm:$0xff] %v1935_v6  ;;  %v1937_v8 = vmul.f32 %v2897_v29, %v4137_v13  ;;  %2918 = vpow2.f32 %v2558_v19  ;;  %v2564_v13 = vmul.f32 -1.442695, %v4220_v31  ;;  %v4258_v29 = vld [vmem:[%s4103_s30 + $0xf0] sm:$0xff] }
  0x5b   : > { %v2901_v35 = vpop.eup %2900  ;;  %2192 = vst [vmem:[%s4190_s17 + $0x30] sm:$0xff] %v1936_v7  ;;  %v1938_v12 = vmul.f32 %v2899_v32, %v4140_v14  ;;  %2920 = vpow2.f32 %v2559_v24  ;;  %v2565_v14 = vmul.f32 -1.442695, %v4226_v34  ;;  %v4254_v24 = vld [vmem:[%s4103_s30 + $0xe8] sm:$0xff]  ;;  %v2568_v32 = vmul.f32 -1.442695, %v4250_v16 }
  0x5c   : > { %v2903_v37 = vpop.eup %2902  ;;  %2193 = vst [vmem:[%s4190_s17 + $0x38] sm:$0xff] %v1937_v8  ;;  %v1939_v38 = vmul.f32 %v2901_v35, %v4145_v17  ;;  %2922 = vpow2.f32 %v2560_v27  ;;  %v2567_v27 = vmul.f32 -1.442695, %v4247_v0  ;;  %v4263_v8 = vld [vmem:[%s4103_s30 + $0xf8] sm:$0xff] }
  0x5d   : > { %v2905_v39 = vpop.eup %2904  ;;  %2194 = vst [vmem:[%s4190_s17 + $0x40] sm:$0xff] %v1938_v12  ;;  %v1940_v40 = vmul.f32 %v2903_v37, %v4148_v18  ;;  %2924 = vpow2.f32 %v2561_v30  ;;  %v2569_v12 = vmul.f32 -1.442695, %v4254_v24 }
  0x5e   : > { %v2907_v41 = vpop.eup %2906  ;;  %2195 = vst [vmem:[%s4190_s17 + $0x48] sm:$0xff] %v1939_v38  ;;  %v1941_v42 = vmul.f32 %v2905_v39, %v4152_v20  ;;  %2926 = vpow2.f32 %v2562_v33  ;;  %v2570_v38 = vmul.f32 -1.442695, %v4258_v29 }
  0x5f   : > { %v2909_v43 = vpop.eup %2908  ;;  %2196 = vst [vmem:[%s4190_s17 + $0x50] sm:$0xff] %v1940_v40  ;;  %v1942_v17 = vmul.f32 %v2907_v41, %v4156_v22  ;;  %2928 = vpow2.f32 %v2563_v36  ;;  %v4268_v36 = vld [vmem:[%s4103_s30 + $0x100] sm:$0xff]  ;;  %v2571_v40 = vmul.f32 -1.442695, %v4263_v8 }
  0x60   : > { %v2911_v44 = vpop.eup %2910  ;;  %2197 = vst [vmem:[%s4190_s17 + $0x58] sm:$0xff] %v1941_v42  ;;  %v1175_v46 = vadd.f32 1.0, %v2909_v43  ;;  %2930 = vpow2.f32 %v2564_v13  ;;  %v4274_v13 = vld [vmem:[%s4103_s30 + $0x108] sm:$0xff]  ;;  %v2572_v42 = vmul.f32 -1.442695, %v4268_v36  ;;  %v4286_v43 = vld [vmem:[%s4103_s30 + $0x118] sm:$0xff] }
  0x61   : > { %v2913_v47 = vpop.eup %2912  ;;  %2198 = vst [vmem:[%s4190_s17 + $0x60] sm:$0xff] %v1942_v17  ;;  %v1176_v18 = vadd.f32 1.0, %v2911_v44  ;;  %2932 = vpow2.f32 %v2565_v14  ;;  %v4280_v14 = vld [vmem:[%s4103_s30 + $0x110] sm:$0xff]  ;;  %v2573_v44 = vmul.f32 -1.442695, %v4274_v13 }
  0x62   : > { %v2915_v49 = vpop.eup %2914  ;;  %2934 = vrcp.f32 %v1175_v46  ;;  %v1177_v50 = vadd.f32 1.0, %v2913_v47  ;;  %v4292_v46 = vld [vmem:[%s4103_s30 + $0x120] sm:$0xff] }
  0x63   : > { %v2917_v52 = vpop.eup %2916  ;;  %2936 = vrcp.f32 %v1176_v18  ;;  %v1178_v20 = vadd.f32 1.0, %v2915_v49  ;;  %v2574_v18 = vmul.f32 -1.442695, %v4280_v14  ;;  %v4298_v49 = vld [vmem:[%s4103_s30 + $0x128] sm:$0xff] }
  0x64   : > { %v2919_v53 = vpop.eup %2918  ;;  %2938 = vrcp.f32 %v1177_v50  ;;  %v1179_v54 = vadd.f32 1.0, %v2917_v52  ;;  %v2575_v52 = vmul.f32 -1.442695, %v4286_v43 }
  0x65   : > { %v2921_v22 = vpop.eup %2920  ;;  %2940 = vrcp.f32 %v1178_v20  ;;  %v1180_v56 = vadd.f32 1.0, %v2919_v53  ;;  %v4304_v20 = vld [vmem:[%s4103_s30 + $0x130] sm:$0xff] }
  0x66   : > { %v2923_v57 = vpop.eup %2922  ;;  %2942 = vrcp.f32 %v1179_v54  ;;  %v1181_v58 = vadd.f32 1.0, %v2921_v22  ;;  %v2576_v54 = vmul.f32 -1.442695, %v4292_v46 }
  0x67   : > { %v2925_v60 = vpop.eup %2924  ;;  %2944 = vrcp.f32 %v1180_v56  ;;  %v1182_v61 = vadd.f32 1.0, %v2923_v57 }
  0x68   : > { %v2927_v62 = vpop.eup %2926  ;;  %2946 = vrcp.f32 %v1181_v58  ;;  %v1183_v3 = vadd.f32 1.0, %v2925_v60 }
  0x69   : > { %v2929_v5 = vpop.eup %2928  ;;  %2948 = vrcp.f32 %v1182_v61  ;;  %v1184_v10 = vadd.f32 1.0, %v2927_v62 }
  0x6a   : > { %v2931_v1 = vpop.eup %2930  ;;  %2950 = vrcp.f32 %v1183_v3  ;;  %v1185_v15 = vadd.f32 1.0, %v2929_v5 }
  0x6b   : > { %v2933_v19 = vpop.eup %2932  ;;  %2952 = vrcp.f32 %v1184_v10  ;;  %v1186_v23 = vadd.f32 1.0, %v2931_v1 }
  0x6c   : > { %v2935_v26 = vpop.eup %2934  ;;  %2954 = vrcp.f32 %v1185_v15  ;;  %v1187_v6 = vadd.f32 1.0, %v2933_v19 }
  0x6d   : > { %v2937_v7 = vpop.eup %2936  ;;  %v1943_v30 = vmul.f32 %v2935_v26, %v4162_v45  ;;  %2956 = vrcp.f32 %v1186_v23 }
  0x6e   : > { %v2939_v33 = vpop.eup %2938  ;;  %v1944_v35 = vmul.f32 %v2937_v7, %v4165_v48  ;;  %2958 = vrcp.f32 %v1187_v6 }
  0x6f   : > { %v2941_v37 = vpop.eup %2940  ;;  %2199 = vst [vmem:[%s4190_s17 + $0x68] sm:$0xff] %v1943_v30  ;;  %v1945_v45 = vmul.f32 %v2939_v33, %v4168_v51  ;;  %2960 = vpow2.f32 %v2566_v2 }
  0x70   : > { %v2943_v39 = vpop.eup %2942  ;;  %2200 = vst [vmem:[%s4190_s17 + $0x70] sm:$0xff] %v1944_v35  ;;  %v1946_v48 = vmul.f32 %v2941_v37, %v4172_v55  ;;  %2962 = vpow2.f32 %v2567_v27  ;;  %v4322_v35 = vld [vmem:[%s4103_s30 + $0x138] sm:$0xff] }
  0x71   : > { %v2945_v41 = vpop.eup %2944  ;;  %2201 = vst [vmem:[%s4190_s17 + $0x78] sm:$0xff] %v1945_v45  ;;  %v1947_v51 = vmul.f32 %v2943_v39, %v4176_v59  ;;  %2964 = vpow2.f32 %v2568_v32  ;;  %v4325_v45 = vld [vmem:[%s4103_s30 + $0x140] sm:$0xff] }
  0x72   : > { %v2947_v17 = vpop.eup %2946  ;;  %2202 = vst [vmem:[%s4190_s17 + $0x80] sm:$0xff] %v1946_v48  ;;  %v1948_v55 = vmul.f32 %v2945_v41, %v4181_v63  ;;  %2966 = vpow2.f32 %v2569_v12  ;;  %v4328_v48 = vld [vmem:[%s4103_s30 + $0x148] sm:$0xff] }
  0x73   : > { %v2949_v47 = vpop.eup %2948  ;;  %2203 = vst [vmem:[%s4190_s17 + $0x88] sm:$0xff] %v1947_v51  ;;  %v1949_v59 = vmul.f32 %v2947_v17, %v4186_v9  ;;  %2968 = vpow2.f32 %v2570_v38  ;;  %v2579_v51 = vmul.f32 -1.442695, %v4322_v35 }
  0x74   : > { %v2951_v50 = vpop.eup %2950  ;;  %2204 = vst [vmem:[%s4190_s17 + $0x90] sm:$0xff] %v1948_v55  ;;  %v1950_v63 = vmul.f32 %v2949_v47, %v4196_v11  ;;  %2970 = vpow2.f32 %v2571_v40  ;;  %v2577_v11 = vmul.f32 -1.442695, %v4298_v49  ;;  %v4336_v47 = vld [vmem:[%s4103_s30 + $0x158] sm:$0xff] }
  0x75   : > { %v2953_v53 = vpop.eup %2952  ;;  %2205 = vst [vmem:[%s4190_s17 + $0x98] sm:$0xff] %v1949_v59  ;;  %v1951_v9 = vmul.f32 %v2951_v50, %v4202_v21  ;;  %2972 = vpow2.f32 %v2572_v42  ;;  %v2578_v21 = vmul.f32 -1.442695, %v4304_v20  ;;  %v4332_v42 = vld [vmem:[%s4103_s30 + $0x150] sm:$0xff]  ;;  %v2581_v50 = vmul.f32 -1.442695, %v4328_v48 }
  0x76   : > { %v2955_v22 = vpop.eup %2954  ;;  %2206 = vst [vmem:[%s4190_s17 + $0xa0] sm:$0xff] %v1950_v63  ;;  %v1952_v56 = vmul.f32 %v2953_v53, %v4208_v25  ;;  %2974 = vpow2.f32 %v2573_v44  ;;  %v2580_v44 = vmul.f32 -1.442695, %v4325_v45  ;;  %v4341_v63 = vld [vmem:[%s4103_s30 + $0x160] sm:$0xff] }
  0x77   : > { %v2957_v57 = vpop.eup %2956  ;;  %2207 = vst [vmem:[%s4190_s17 + $0xa8] sm:$0xff] %v1951_v9  ;;  %v1953_v58 = vmul.f32 %v2955_v22, %v4214_v28  ;;  %2976 = vpow2.f32 %v2574_v18  ;;  %v2582_v9 = vmul.f32 -1.442695, %v4332_v42 }
  0x78   : > { %v2959_v60 = vpop.eup %2958  ;;  %2208 = vst [vmem:[%s4190_s17 + $0xb0] sm:$0xff] %v1952_v56  ;;  %v1954_v61 = vmul.f32 %v2957_v57, %v4220_v31  ;;  %2978 = vpow2.f32 %v2575_v52  ;;  %v2583_v56 = vmul.f32 -1.442695, %v4336_v47 }
  0x79   : > { %v2961_v62 = vpop.eup %2960  ;;  %2209 = vst [vmem:[%s4190_s17 + $0xb8] sm:$0xff] %v1953_v58  ;;  %v1955_v25 = vmul.f32 %v2959_v60, %v4226_v34  ;;  %2980 = vpow2.f32 %v2576_v54  ;;  %v4346_v54 = vld [vmem:[%s4103_s30 + $0x168] sm:$0xff]  ;;  %v2584_v58 = vmul.f32 -1.442695, %v4341_v63 }
  0x7a   : > { %v2963_v3 = vpop.eup %2962  ;;  %2210 = vst [vmem:[%s4190_s17 + $0xc0] sm:$0xff] %v1954_v61  ;;  %v1188_v5 = vadd.f32 1.0, %v2961_v62  ;;  %2982 = vpow2.f32 %v2577_v11  ;;  %v4352_v11 = vld [vmem:[%s4103_s30 + $0x170] sm:$0xff]  ;;  %v2585_v61 = vmul.f32 -1.442695, %v4346_v54  ;;  %v4364_v62 = vld [vmem:[%s4103_s30 + $0x180] sm:$0xff] }
  0x7b   : > { %v2965_v10 = vpop.eup %2964  ;;  %2211 = vst [vmem:[%s4190_s17 + $0xc8] sm:$0xff] %v1955_v25  ;;  %v1189_v28 = vadd.f32 1.0, %v2963_v3  ;;  %2984 = vpow2.f32 %v2578_v21  ;;  %v4358_v21 = vld [vmem:[%s4103_s30 + $0x178] sm:$0xff]  ;;  %v2586_v3 = vmul.f32 -1.442695, %v4352_v11 }
  0x7c   : > { %v2967_v1 = vpop.eup %2966  ;;  %2986 = vrcp.f32 %v1188_v5  ;;  %v1190_v15 = vadd.f32 1.0, %v2965_v10  ;;  %v4370_v5 = vld [vmem:[%s4103_s30 + $0x188] sm:$0xff] }
  0x7d   : > { %v2969_v19 = vpop.eup %2968  ;;  %2988 = vrcp.f32 %v1189_v28  ;;  %v1191_v31 = vadd.f32 1.0, %v2967_v1  ;;  %v2587_v28 = vmul.f32 -1.442695, %v4358_v21  ;;  %v4376_v1 = vld [vmem:[%s4103_s30 + $0x190] sm:$0xff] }
  0x7e   : > { %v2971_v23 = vpop.eup %2970  ;;  %2990 = vrcp.f32 %v1190_v15  ;;  %v1192_v2 = vadd.f32 1.0, %v2969_v19  ;;  %v2588_v19 = vmul.f32 -1.442695, %v4364_v62 }
  0x7f   : > { %v2973_v34 = vpop.eup %2972  ;;  %2992 = vrcp.f32 %v1191_v31  ;;  %v1193_v26 = vadd.f32 1.0, %v2971_v23  ;;  %v4382_v31 = vld [vmem:[%s4103_s30 + $0x198] sm:$0xff] }
  0x80   : > { %v2975_v6 = vpop.eup %2974  ;;  %2994 = vrcp.f32 %v1192_v2  ;;  %v1194_v27 = vadd.f32 1.0, %v2973_v34  ;;  %v2589_v2 = vmul.f32 -1.442695, %v4370_v5 }
  0x81   : > { %v2977_v7 = vpop.eup %2976  ;;  %2996 = vrcp.f32 %v1193_v26  ;;  %v1195_v30 = vadd.f32 1.0, %v2975_v6 }
  0x82   : > { %v2979_v32 = vpop.eup %2978  ;;  %2998 = vrcp.f32 %v1194_v27  ;;  %v1196_v33 = vadd.f32 1.0, %v2977_v7 }
  0x83   : > { %v2981_v12 = vpop.eup %2980  ;;  %3000 = vrcp.f32 %v1195_v30  ;;  %v1197_v37 = vadd.f32 1.0, %v2979_v32 }
  0x84   : > { %v2983_v38 = vpop.eup %2982  ;;  %3002 = vrcp.f32 %v1196_v33  ;;  %v1198_v39 = vadd.f32 1.0, %v2981_v12 }
  0x85   : > { %v2985_v40 = vpop.eup %2984  ;;  %3004 = vrcp.f32 %v1197_v37  ;;  %v1199_v41 = vadd.f32 1.0, %v2983_v38 }
  0x86   : > { %v2987_v17 = vpop.eup %2986  ;;  %3006 = vrcp.f32 %v1198_v39  ;;  %v1200_v55 = vadd.f32 1.0, %v2985_v40 }
  0x87   : > { %v2989_v59 = vpop.eup %2988  ;;  %v1956_v18 = vmul.f32 %v2987_v17, %v4244_v4  ;;  %3008 = vrcp.f32 %v1199_v41 }
  0x88   : > { %v2991_v52 = vpop.eup %2990  ;;  %v1957_v53 = vmul.f32 %v2989_v59, %v4247_v0  ;;  %3010 = vrcp.f32 %v1200_v55 }
  0x89   : > { %v2993_v22 = vpop.eup %2992  ;;  %2212 = vst [vmem:[%s4190_s17 + $0xd0] sm:$0xff] %v1956_v18  ;;  %v1958_v4 = vmul.f32 %v2991_v52, %v4250_v16  ;;  %3012 = vpow2.f32 %v2579_v51 }
  0x8a   : > { %v2995_v57 = vpop.eup %2994  ;;  %2213 = vst [vmem:[%s4190_s17 + $0xd8] sm:$0xff] %v1957_v53  ;;  %v1959_v0 = vmul.f32 %v2993_v22, %v4254_v24  ;;  %3014 = vpow2.f32 %v2580_v44  ;;  %v4400_v53 = vld [vmem:[%s4103_s30 + $0x1a0] sm:$0xff] }
  0x8b   : > { %v2997_v60 = vpop.eup %2996  ;;  %2214 = vst [vmem:[%s4190_s17 + $0xe0] sm:$0xff] %v1958_v4  ;;  %v1960_v16 = vmul.f32 %v2995_v57, %v4258_v29  ;;  %3016 = vpow2.f32 %v2581_v50  ;;  %v4403_v4 = vld [vmem:[%s4103_s30 + $0x1a8] sm:$0xff] }
  0x8c   : > { %v2999_v25 = vpop.eup %2998  ;;  %2215 = vst [vmem:[%s4190_s17 + $0xe8] sm:$0xff] %v1959_v0  ;;  %v1961_v24 = vmul.f32 %v2997_v60, %v4263_v8  ;;  %3018 = vpow2.f32 %v2582_v9  ;;  %v4406_v0 = vld [vmem:[%s4103_s30 + $0x1b0] sm:$0xff] }
  0x8d   : > { %v3001_v10 = vpop.eup %3000  ;;  %2216 = vst [vmem:[%s4190_s17 + $0xf0] sm:$0xff] %v1960_v16  ;;  %v1962_v29 = vmul.f32 %v2999_v25, %v4268_v36  ;;  %3020 = vpow2.f32 %v2583_v56  ;;  %v2592_v16 = vmul.f32 -1.442695, %v4400_v53 }
  0x8e   : > { %v3003_v15 = vpop.eup %3002  ;;  %2217 = vst [vmem:[%s4190_s17 + $0xf8] sm:$0xff] %v1961_v24  ;;  %v1963_v8 = vmul.f32 %v3001_v10, %v4274_v13  ;;  %3022 = vpow2.f32 %v2584_v58  ;;  %v2590_v13 = vmul.f32 -1.442695, %v4376_v1  ;;  %v4414_v10 = vld [vmem:[%s4103_s30 + $0x1c0] sm:$0xff] }
  0x8f   : > { %v3005_v23 = vpop.eup %3004  ;;  %2218 = vst [vmem:[%s4190_s17 + $0x100] sm:$0xff] %v1962_v29  ;;  %v1964_v36 = vmul.f32 %v3003_v15, %v4280_v14  ;;  %3024 = vpow2.f32 %v2585_v61  ;;  %v2591_v14 = vmul.f32 -1.442695, %v4382_v31  ;;  %v4410_v61 = vld [vmem:[%s4103_s30 + $0x1b8] sm:$0xff]  ;;  %v2594_v15 = vmul.f32 -1.442695, %v4406_v0 }
  0x90   : > { %v3007_v34 = vpop.eup %3006  ;;  %2219 = vst [vmem:[%s4190_s17 + $0x108] sm:$0xff] %v1963_v8  ;;  %v1965_v26 = vmul.f32 %v3005_v23, %v4286_v43  ;;  %3026 = vpow2.f32 %v2586_v3  ;;  %v2593_v3 = vmul.f32 -1.442695, %v4403_v4  ;;  %v4419_v8 = vld [vmem:[%s4103_s30 + $0x1c8] sm:$0xff] }
  0x91   : > { %v3009_v6 = vpop.eup %3008  ;;  %2220 = vst [vmem:[%s4190_s17 + $0x110] sm:$0xff] %v1964_v36  ;;  %v1966_v27 = vmul.f32 %v3007_v34, %v4292_v46  ;;  %3028 = vpow2.f32 %v2587_v28  ;;  %v2595_v36 = vmul.f32 -1.442695, %v4410_v61 }
  0x92   : > { %v3011_v7 = vpop.eup %3010  ;;  %2221 = vst [vmem:[%s4190_s17 + $0x118] sm:$0xff] %v1965_v26  ;;  %v1967_v30 = vmul.f32 %v3009_v6, %v4298_v49  ;;  %3030 = vpow2.f32 %v2588_v19  ;;  %v2596_v26 = vmul.f32 -1.442695, %v4414_v10 }
  0x93   : > { %v3013_v32 = vpop.eup %3012  ;;  %2222 = vst [vmem:[%s4190_s17 + $0x120] sm:$0xff] %v1966_v27  ;;  %v1968_v43 = vmul.f32 %v3011_v7, %v4304_v20  ;;  %3032 = vpow2.f32 %v2589_v2  ;;  %v4424_v2 = vld [vmem:[%s4103_s30 + $0x1d0] sm:$0xff]  ;;  %v2597_v27 = vmul.f32 -1.442695, %v4419_v8 }
  0x94   : > { %v3015_v33 = vpop.eup %3014  ;;  %2223 = vst [vmem:[%s4190_s17 + $0x128] sm:$0xff] %v1967_v30  ;;  %v1201_v12 = vadd.f32 1.0, %v3013_v32  ;;  %3034 = vpow2.f32 %v2590_v13  ;;  %v4430_v13 = vld [vmem:[%s4103_s30 + $0x1d8] sm:$0xff]  ;;  %v2598_v30 = vmul.f32 -1.442695, %v4424_v2  ;;  %v4442_v32 = vld [vmem:[%s4103_s30 + $0x1e8] sm:$0xff] }
  0x95   : > { %v3017_v37 = vpop.eup %3016  ;;  %2224 = vst [vmem:[%s4190_s17 + $0x130] sm:$0xff] %v1968_v43  ;;  %v1202_v46 = vadd.f32 1.0, %v3015_v33  ;;  %3036 = vpow2.f32 %v2591_v14  ;;  %v4436_v14 = vld [vmem:[%s4103_s30 + $0x1e0] sm:$0xff]  ;;  %v2599_v33 = vmul.f32 -1.442695, %v4430_v13 }
  0x96   : > { %v3019_v38 = vpop.eup %3018  ;;  %3038 = vrcp.f32 %v1201_v12  ;;  %v1203_v39 = vadd.f32 1.0, %v3017_v37  ;;  %v4448_v12 = vld [vmem:[%s4103_s30 + $0x1f0] sm:$0xff] }
  0x97   : > { %v3021_v40 = vpop.eup %3020  ;;  %3040 = vrcp.f32 %v1202_v46  ;;  %v1204_v49 = vadd.f32 1.0, %v3019_v38  ;;  %v2600_v46 = vmul.f32 -1.442695, %v4436_v14  ;;  %v4454_v38 = vld [vmem:[%s4103_s30 + $0x1f8] sm:$0xff] }
  0x98   : > { %v3023_v41 = vpop.eup %3022  ;;  %3042 = vrcp.f32 %v1203_v39  ;;  %v1205_v51 = vadd.f32 1.0, %v3021_v40  ;;  %v2601_v40 = vmul.f32 -1.442695, %v4442_v32 }
  0x99   : > { %v3025_v20 = vpop.eup %3024  ;;  %3044 = vrcp.f32 %v1204_v49  ;;  %v1206_v17 = vadd.f32 1.0, %v3023_v41  ;;  %v4460_v49 = vld [vmem:[%s4103_s30 + $0x200] sm:$0xff] }
  0x9a   : > { %v3027_v55 = vpop.eup %3026  ;;  %3046 = vrcp.f32 %v1205_v51  ;;  %v1207_v44 = vadd.f32 1.0, %v3025_v20  ;;  %v2602_v51 = vmul.f32 -1.442695, %v4448_v12 }
  0x9b   : > { %v3029_v59 = vpop.eup %3028  ;;  %3048 = vrcp.f32 %v1206_v17  ;;  %v1208_v18 = vadd.f32 1.0, %v3027_v55 }
  0x9c   : > { %v3031_v50 = vpop.eup %3030  ;;  %3050 = vrcp.f32 %v1207_v44  ;;  %v1209_v52 = vadd.f32 1.0, %v3029_v59 }
  0x9d   : > { %v3033_v9 = vpop.eup %3032  ;;  %3052 = vrcp.f32 %v1208_v18  ;;  %v1210_v22 = vadd.f32 1.0, %v3031_v50 }
  0x9e   : > { %v3035_v56 = vpop.eup %3034  ;;  %3054 = vrcp.f32 %v1209_v52  ;;  %v1211_v57 = vadd.f32 1.0, %v3033_v9 }
  0x9f   : > { %v3037_v58 = vpop.eup %3036  ;;  %3056 = vrcp.f32 %v1210_v22  ;;  %v1212_v60 = vadd.f32 1.0, %v3035_v56 }
  0xa0   : > { %v3039_v25 = vpop.eup %3038  ;;  %3058 = vrcp.f32 %v1211_v57  ;;  %v1213_v24 = vadd.f32 1.0, %v3037_v58 }
  0xa1   : > { %v3041_v29 = vpop.eup %3040  ;;  %v1969_v28 = vmul.f32 %v3039_v25, %v4322_v35  ;;  %3060 = vrcp.f32 %v1212_v60 }
  0xa2   : > { %v3043_v19 = vpop.eup %3042  ;;  %v1970_v23 = vmul.f32 %v3041_v29, %v4325_v45  ;;  %3062 = vrcp.f32 %v1213_v24 }
  0xa3   : > { %v3045_v34 = vpop.eup %3044  ;;  %2225 = vst [vmem:[%s4190_s17 + $0x138] sm:$0xff] %v1969_v28  ;;  %v1971_v35 = vmul.f32 %v3043_v19, %v4328_v48  ;;  %3064 = vpow2.f32 %v2592_v16 }
  0xa4   : > { %v3047_v6 = vpop.eup %3046  ;;  %2226 = vst [vmem:[%s4190_s17 + $0x140] sm:$0xff] %v1970_v23  ;;  %v1972_v45 = vmul.f32 %v3045_v34, %v4332_v42  ;;  %3066 = vpow2.f32 %v2593_v3  ;;  %v4478_v23 = vld [vmem:[%s4103_s30 + $0x208] sm:$0xff] }
  0xa5   : > { %v3049_v7 = vpop.eup %3048  ;;  %2227 = vst [vmem:[%s4190_s17 + $0x148] sm:$0xff] %v1971_v35  ;;  %v1973_v48 = vmul.f32 %v3047_v6, %v4336_v47  ;;  %3068 = vpow2.f32 %v2594_v15  ;;  %v4481_v35 = vld [vmem:[%s4103_s30 + $0x210] sm:$0xff] }
  0xa6   : > { %v3051_v43 = vpop.eup %3050  ;;  %2228 = vst [vmem:[%s4190_s17 + $0x150] sm:$0xff] %v1972_v45  ;;  %v1974_v42 = vmul.f32 %v3049_v7, %v4341_v63  ;;  %3070 = vpow2.f32 %v2595_v36  ;;  %v4484_v45 = vld [vmem:[%s4103_s30 + $0x218] sm:$0xff] }
  0xa7   : > { %v3053_v37 = vpop.eup %3052  ;;  %2229 = vst [vmem:[%s4190_s17 + $0x158] sm:$0xff] %v1973_v48  ;;  %v1975_v47 = vmul.f32 %v3051_v43, %v4346_v54  ;;  %3072 = vpow2.f32 %v2596_v26  ;;  %v2605_v48 = vmul.f32 -1.442695, %v4478_v23 }
  0xa8   : > { %v3055_v39 = vpop.eup %3054  ;;  %2230 = vst [vmem:[%s4190_s17 + $0x160] sm:$0xff] %v1974_v42  ;;  %v1976_v63 = vmul.f32 %v3053_v37, %v4352_v11  ;;  %3074 = vpow2.f32 %v2597_v27  ;;  %v2603_v11 = vmul.f32 -1.442695, %v4454_v38  ;;  %v4492_v37 = vld [vmem:[%s4103_s30 + $0x228] sm:$0xff] }
  0xa9   : > { %v3057_v41 = vpop.eup %3056  ;;  %2231 = vst [vmem:[%s4190_s17 + $0x168] sm:$0xff] %v1975_v47  ;;  %v1977_v54 = vmul.f32 %v3055_v39, %v4358_v21  ;;  %3076 = vpow2.f32 %v2598_v30  ;;  %v2604_v21 = vmul.f32 -1.442695, %v4460_v49  ;;  %v4488_v30 = vld [vmem:[%s4103_s30 + $0x220] sm:$0xff]  ;;  %v2607_v39 = vmul.f32 -1.442695, %v4484_v45 }
  0xaa   : > { %v3059_v20 = vpop.eup %3058  ;;  %2232 = vst [vmem:[%s4190_s17 + $0x170] sm:$0xff] %v1976_v63  ;;  %v1978_v17 = vmul.f32 %v3057_v41, %v4364_v62  ;;  %3078 = vpow2.f32 %v2599_v33  ;;  %v2606_v33 = vmul.f32 -1.442695, %v4481_v35  ;;  %v4497_v63 = vld [vmem:[%s4103_s30 + $0x230] sm:$0xff] }
  0xab   : > { %v3061_v55 = vpop.eup %3060  ;;  %2233 = vst [vmem:[%s4190_s17 + $0x178] sm:$0xff] %v1977_v54  ;;  %v1979_v44 = vmul.f32 %v3059_v20, %v4370_v5  ;;  %3080 = vpow2.f32 %v2600_v46  ;;  %v2608_v54 = vmul.f32 -1.442695, %v4488_v30 }
  0xac   : > { %v3063_v59 = vpop.eup %3062  ;;  %2234 = vst [vmem:[%s4190_s17 + $0x180] sm:$0xff] %v1978_v17  ;;  %v1980_v18 = vmul.f32 %v3061_v55, %v4376_v1  ;;  %3082 = vpow2.f32 %v2601_v40  ;;  %v2609_v17 = vmul.f32 -1.442695, %v4492_v37 }
  0xad   : > { %v3065_v50 = vpop.eup %3064  ;;  %2235 = vst [vmem:[%s4190_s17 + $0x188] sm:$0xff] %v1979_v44  ;;  %v1981_v62 = vmul.f32 %v3063_v59, %v4382_v31  ;;  %3084 = vpow2.f32 %v2602_v51  ;;  %v4502_v51 = vld [vmem:[%s4103_s30 + $0x238] sm:$0xff]  ;;  %v2610_v44 = vmul.f32 -1.442695, %v4497_v63 }
  0xae   : > { %v3067_v52 = vpop.eup %3066  ;;  %2236 = vst [vmem:[%s4190_s17 + $0x190] sm:$0xff] %v1980_v18  ;;  %v1214_v9 = vadd.f32 1.0, %v3065_v50  ;;  %3086 = vpow2.f32 %v2603_v11  ;;  %v4508_v11 = vld [vmem:[%s4103_s30 + $0x240] sm:$0xff]  ;;  %v2611_v18 = vmul.f32 -1.442695, %v4502_v51  ;;  %v4520_v50 = vld [vmem:[%s4103_s30 + $0x250] sm:$0xff] }
  0xaf   : > { %v3069_v22 = vpop.eup %3068  ;;  %2237 = vst [vmem:[%s4190_s17 + $0x198] sm:$0xff] %v1981_v62  ;;  %v1215_v5 = vadd.f32 1.0, %v3067_v52  ;;  %3088 = vpow2.f32 %v2604_v21  ;;  %v4514_v21 = vld [vmem:[%s4103_s30 + $0x248] sm:$0xff]  ;;  %v2612_v52 = vmul.f32 -1.442695, %v4508_v11 }
  0xb0   : > { %v3071_v56 = vpop.eup %3070  ;;  %3090 = vrcp.f32 %v1214_v9  ;;  %v1216_v57 = vadd.f32 1.0, %v3069_v22  ;;  %v4526_v9 = vld [vmem:[%s4103_s30 + $0x258] sm:$0xff] }
  0xb1   : > { %v3073_v58 = vpop.eup %3072  ;;  %3092 = vrcp.f32 %v1215_v5  ;;  %v1217_v1 = vadd.f32 1.0, %v3071_v56  ;;  %v2613_v5 = vmul.f32 -1.442695, %v4514_v21  ;;  %v4532_v56 = vld [vmem:[%s4103_s30 + $0x260] sm:$0xff] }
  0xb2   : > { %v3075_v60 = vpop.eup %3074  ;;  %3094 = vrcp.f32 %v1216_v57  ;;  %v1218_v16 = vadd.f32 1.0, %v3073_v58  ;;  %v2614_v58 = vmul.f32 -1.442695, %v4520_v50 }
  0xb3   : > { %v3077_v31 = vpop.eup %3076  ;;  %3096 = vrcp.f32 %v1217_v1  ;;  %v1219_v25 = vadd.f32 1.0, %v3075_v60  ;;  %v4538_v1 = vld [vmem:[%s4103_s30 + $0x268] sm:$0xff] }
  0xb4   : > { %v3079_v24 = vpop.eup %3078  ;;  %3098 = vrcp.f32 %v1218_v16  ;;  %v1220_v3 = vadd.f32 1.0, %v3077_v31  ;;  %v2615_v16 = vmul.f32 -1.442695, %v4526_v9 }
  0xb5   : > { %v3081_v29 = vpop.eup %3080  ;;  %3100 = vrcp.f32 %v1219_v25  ;;  %v1221_v28 = vadd.f32 1.0, %v3079_v24 }
  0xb6   : > { %v3083_v15 = vpop.eup %3082  ;;  %3102 = vrcp.f32 %v1220_v3  ;;  %v1222_v19 = vadd.f32 1.0, %v3081_v29 }
  0xb7   : > { %v3085_v36 = vpop.eup %3084  ;;  %3104 = vrcp.f32 %v1221_v28  ;;  %v1223_v34 = vadd.f32 1.0, %v3083_v15 }
  0xb8   : > { %v3087_v26 = vpop.eup %3086  ;;  %3106 = vrcp.f32 %v1222_v19  ;;  %v1224_v6 = vadd.f32 1.0, %v3085_v36 }
  0xb9   : > { %v3089_v27 = vpop.eup %3088  ;;  %3108 = vrcp.f32 %v1223_v34  ;;  %v1225_v7 = vadd.f32 1.0, %v3087_v26 }
  0xba   : > { %v3091_v43 = vpop.eup %3090  ;;  %3110 = vrcp.f32 %v1224_v6  ;;  %v1226_v42 = vadd.f32 1.0, %v3089_v27 }
  0xbb   : > { %v3093_v47 = vpop.eup %3092  ;;  %v1982_v46 = vmul.f32 %v3091_v43, %v4400_v53  ;;  %3112 = vrcp.f32 %v1225_v7 }
  0xbc   : > { %v3095_v40 = vpop.eup %3094  ;;  %v1983_v41 = vmul.f32 %v3093_v47, %v4403_v4  ;;  %3114 = vrcp.f32 %v1226_v42 }
  0xbd   : > { %v3097_v20 = vpop.eup %3096  ;;  %2238 = vst [vmem:[%s4190_s17 + $0x1a0] sm:$0xff] %v1982_v46  ;;  %v1984_v53 = vmul.f32 %v3095_v40, %v4406_v0  ;;  %3116 = vpow2.f32 %v2605_v48 }
  0xbe   : > { %v3099_v55 = vpop.eup %3098  ;;  %2239 = vst [vmem:[%s4190_s17 + $0x1a8] sm:$0xff] %v1983_v41  ;;  %v1985_v4 = vmul.f32 %v3097_v20, %v4410_v61  ;;  %3118 = vpow2.f32 %v2606_v33  ;;  %v4556_v41 = vld [vmem:[%s4103_s30 + $0x270] sm:$0xff] }
  0xbf   : > { %v3101_v59 = vpop.eup %3100  ;;  %2240 = vst [vmem:[%s4190_s17 + $0x1b0] sm:$0xff] %v1984_v53  ;;  %v1986_v0 = vmul.f32 %v3099_v55, %v4414_v10  ;;  %3120 = vpow2.f32 %v2607_v39  ;;  %v4559_v53 = vld [vmem:[%s4103_s30 + $0x278] sm:$0xff] }
  0xc0   : > { %v3103_v62 = vpop.eup %3102  ;;  %2241 = vst [vmem:[%s4190_s17 + $0x1b8] sm:$0xff] %v1985_v4  ;;  %v1987_v61 = vmul.f32 %v3101_v59, %v4419_v8  ;;  %3122 = vpow2.f32 %v2608_v54  ;;  %v4562_v4 = vld [vmem:[%s4103_s30 + $0x280] sm:$0xff] }
  0xc1   : > { %v3105_v22 = vpop.eup %3104  ;;  %2242 = vst [vmem:[%s4190_s17 + $0x1c0] sm:$0xff] %v1986_v0  ;;  %v1988_v10 = vmul.f32 %v3103_v62, %v4424_v2  ;;  %3124 = vpow2.f32 %v2609_v17  ;;  %v2618_v0 = vmul.f32 -1.442695, %v4556_v41 }
  0xc2   : > { %v3107_v57 = vpop.eup %3106  ;;  %2243 = vst [vmem:[%s4190_s17 + $0x1c8] sm:$0xff] %v1987_v61  ;;  %v1989_v8 = vmul.f32 %v3105_v22, %v4430_v13  ;;  %3126 = vpow2.f32 %v2610_v44  ;;  %v2616_v13 = vmul.f32 -1.442695, %v4532_v56  ;;  %v4570_v22 = vld [vmem:[%s4103_s30 + $0x290] sm:$0xff] }
  0xc3   : > { %v3109_v60 = vpop.eup %3108  ;;  %2244 = vst [vmem:[%s4190_s17 + $0x1d0] sm:$0xff] %v1988_v10  ;;  %v1990_v2 = vmul.f32 %v3107_v57, %v4436_v14  ;;  %3128 = vpow2.f32 %v2611_v18  ;;  %v2617_v14 = vmul.f32 -1.442695, %v4538_v1  ;;  %v4566_v18 = vld [vmem:[%s4103_s30 + $0x288] sm:$0xff]  ;;  %v2620_v57 = vmul.f32 -1.442695, %v4562_v4 }
  0xc4   : > { %v3111_v31 = vpop.eup %3110  ;;  %2245 = vst [vmem:[%s4190_s17 + $0x1d8] sm:$0xff] %v1989_v8  ;;  %v1991_v25 = vmul.f32 %v3109_v60, %v4442_v32  ;;  %3130 = vpow2.f32 %v2612_v52  ;;  %v2619_v52 = vmul.f32 -1.442695, %v4559_v53  ;;  %v4575_v8 = vld [vmem:[%s4103_s30 + $0x298] sm:$0xff] }
  0xc5   : > { %v3113_v24 = vpop.eup %3112  ;;  %2246 = vst [vmem:[%s4190_s17 + $0x1e0] sm:$0xff] %v1990_v2  ;;  %v1992_v3 = vmul.f32 %v3111_v31, %v4448_v12  ;;  %3132 = vpow2.f32 %v2613_v5  ;;  %v2621_v2 = vmul.f32 -1.442695, %v4566_v18 }
  0xc6   : > { %v3115_v29 = vpop.eup %3114  ;;  %2247 = vst [vmem:[%s4190_s17 + $0x1e8] sm:$0xff] %v1991_v25  ;;  %v1993_v28 = vmul.f32 %v3113_v24, %v4454_v38  ;;  %3134 = vpow2.f32 %v2614_v58  ;;  %v2622_v25 = vmul.f32 -1.442695, %v4570_v22 }
  0xc7   : > { %v3117_v15 = vpop.eup %3116  ;;  %2248 = vst [vmem:[%s4190_s17 + $0x1f0] sm:$0xff] %v1992_v3  ;;  %v1994_v32 = vmul.f32 %v3115_v29, %v4460_v49  ;;  %3136 = vpow2.f32 %v2615_v16  ;;  %v4580_v16 = vld [vmem:[%s4103_s30 + $0x2a0] sm:$0xff]  ;;  %v2623_v3 = vmul.f32 -1.442695, %v4575_v8 }
  0xc8   : > { %v3119_v19 = vpop.eup %3118  ;;  %2249 = vst [vmem:[%s4190_s17 + $0x1f8] sm:$0xff] %v1993_v28  ;;  %v1227_v36 = vadd.f32 1.0, %v3117_v15  ;;  %3138 = vpow2.f32 %v2616_v13  ;;  %v4586_v13 = vld [vmem:[%s4103_s30 + $0x2a8] sm:$0xff]  ;;  %v2624_v28 = vmul.f32 -1.442695, %v4580_v16  ;;  %v4598_v15 = vld [vmem:[%s4103_s30 + $0x2b8] sm:$0xff] }
  0xc9   : > { %v3121_v34 = vpop.eup %3120  ;;  %2250 = vst [vmem:[%s4190_s17 + $0x200] sm:$0xff] %v1994_v32  ;;  %v1228_v12 = vadd.f32 1.0, %v3119_v19  ;;  %3140 = vpow2.f32 %v2617_v14  ;;  %v4592_v14 = vld [vmem:[%s4103_s30 + $0x2b0] sm:$0xff]  ;;  %v2625_v19 = vmul.f32 -1.442695, %v4586_v13 }
  0xca   : > { %v3123_v26 = vpop.eup %3122  ;;  %3142 = vrcp.f32 %v1227_v36  ;;  %v1229_v6 = vadd.f32 1.0, %v3121_v34  ;;  %v4604_v36 = vld [vmem:[%s4103_s30 + $0x2c0] sm:$0xff] }
  0xcb   : > { %v3125_v27 = vpop.eup %3124  ;;  %3144 = vrcp.f32 %v1228_v12  ;;  %v1230_v38 = vadd.f32 1.0, %v3123_v26  ;;  %v2626_v12 = vmul.f32 -1.442695, %v4592_v14  ;;  %v4610_v26 = vld [vmem:[%s4103_s30 + $0x2c8] sm:$0xff] }
  0xcc   : > { %v3127_v7 = vpop.eup %3126  ;;  %3146 = vrcp.f32 %v1229_v6  ;;  %v1231_v48 = vadd.f32 1.0, %v3125_v27  ;;  %v2627_v27 = vmul.f32 -1.442695, %v4598_v15 }
  0xcd   : > { %v3129_v49 = vpop.eup %3128  ;;  %3148 = vrcp.f32 %v1230_v38  ;;  %v1232_v43 = vadd.f32 1.0, %v3127_v7  ;;  %v4616_v38 = vld [vmem:[%s4103_s30 + $0x2d0] sm:$0xff] }
  0xce   : > { %v3131_v42 = vpop.eup %3130  ;;  %3150 = vrcp.f32 %v1231_v48  ;;  %v1233_v33 = vadd.f32 1.0, %v3129_v49  ;;  %v2628_v48 = vmul.f32 -1.442695, %v4604_v36 }
  0xcf   : > { %v3133_v47 = vpop.eup %3132  ;;  %3152 = vrcp.f32 %v1232_v43  ;;  %v1234_v46 = vadd.f32 1.0, %v3131_v42 }
  0xd0   : > { %v3135_v39 = vpop.eup %3134  ;;  %3154 = vrcp.f32 %v1233_v33  ;;  %v1235_v40 = vadd.f32 1.0, %v3133_v47 }
  0xd1   : > { %v3137_v54 = vpop.eup %3136  ;;  %3156 = vrcp.f32 %v1234_v46  ;;  %v1236_v20 = vadd.f32 1.0, %v3135_v39 }
  0xd2   : > { %v3139_v17 = vpop.eup %3138  ;;  %3158 = vrcp.f32 %v1235_v40  ;;  %v1237_v55 = vadd.f32 1.0, %v3137_v54 }
  0xd3   : > { %v3141_v44 = vpop.eup %3140  ;;  %3160 = vrcp.f32 %v1236_v20  ;;  %v1238_v59 = vadd.f32 1.0, %v3139_v17 }
  0xd4   : > { %v3143_v62 = vpop.eup %3142  ;;  %3162 = vrcp.f32 %v1237_v55  ;;  %v1239_v61 = vadd.f32 1.0, %v3141_v44 }
  0xd5   : > { %v3145_v10 = vpop.eup %3144  ;;  %v1995_v5 = vmul.f32 %v3143_v62, %v4478_v23  ;;  %3164 = vrcp.f32 %v1238_v59 }
  0xd6   : > { %v3147_v58 = vpop.eup %3146  ;;  %v1996_v60 = vmul.f32 %v3145_v10, %v4481_v35  ;;  %3166 = vrcp.f32 %v1239_v61 }
  0xd7   : > { %v3149_v31 = vpop.eup %3148  ;;  %2251 = vst [vmem:[%s4190_s17 + $0x208] sm:$0xff] %v1995_v5  ;;  %v1997_v23 = vmul.f32 %v3147_v58, %v4484_v45  ;;  %3168 = vpow2.f32 %v2618_v0 }
  0xd8   : > { %v3151_v24 = vpop.eup %3150  ;;  %2252 = vst [vmem:[%s4190_s17 + $0x210] sm:$0xff] %v1996_v60  ;;  %v1998_v35 = vmul.f32 %v3149_v31, %v4488_v30  ;;  %3170 = vpow2.f32 %v2619_v52  ;;  %v4634_v60 = vld [vmem:[%s4103_s30 + $0x2d8] sm:$0xff] }
  0xd9   : > { %v3153_v29 = vpop.eup %3152  ;;  %2253 = vst [vmem:[%s4190_s17 + $0x218] sm:$0xff] %v1997_v23  ;;  %v1999_v45 = vmul.f32 %v3151_v24, %v4492_v37  ;;  %3172 = vpow2.f32 %v2620_v57  ;;  %v4637_v23 = vld [vmem:[%s4103_s30 + $0x2e0] sm:$0xff] }
  0xda   : > { %v3155_v32 = vpop.eup %3154  ;;  %2254 = vst [vmem:[%s4190_s17 + $0x220] sm:$0xff] %v1998_v35  ;;  %v2000_v30 = vmul.f32 %v3153_v29, %v4497_v63  ;;  %3174 = vpow2.f32 %v2621_v2  ;;  %v4640_v35 = vld [vmem:[%s4103_s30 + $0x2e8] sm:$0xff] }
  0xdb   : > { %v3157_v34 = vpop.eup %3156  ;;  %2255 = vst [vmem:[%s4190_s17 + $0x228] sm:$0xff] %v1999_v45  ;;  %v2001_v37 = vmul.f32 %v3155_v32, %v4502_v51  ;;  %3176 = vpow2.f32 %v2622_v25  ;;  %v2631_v45 = vmul.f32 -1.442695, %v4634_v60 }
  0xdc   : > { %v3159_v6 = vpop.eup %3158  ;;  %2256 = vst [vmem:[%s4190_s17 + $0x230] sm:$0xff] %v2000_v30  ;;  %v2002_v63 = vmul.f32 %v3157_v34, %v4508_v11  ;;  %3178 = vpow2.f32 %v2623_v3  ;;  %v2629_v11 = vmul.f32 -1.442695, %v4610_v26  ;;  %v4648_v34 = vld [vmem:[%s4103_s30 + $0x2f8] sm:$0xff] }
  0xdd   : > { %v3161_v7 = vpop.eup %3160  ;;  %2257 = vst [vmem:[%s4190_s17 + $0x238] sm:$0xff] %v2001_v37  ;;  %v2003_v51 = vmul.f32 %v3159_v6, %v4514_v21  ;;  %3180 = vpow2.f32 %v2624_v28  ;;  %v2630_v21 = vmul.f32 -1.442695, %v4616_v38  ;;  %v4644_v28 = vld [vmem:[%s4103_s30 + $0x2f0] sm:$0xff]  ;;  %v2633_v6 = vmul.f32 -1.442695, %v4640_v35 }
  0xde   : > { %v3163_v49 = vpop.eup %3162  ;;  %2258 = vst [vmem:[%s4190_s17 + $0x240] sm:$0xff] %v2002_v63  ;;  %v2004_v43 = vmul.f32 %v3161_v7, %v4520_v50  ;;  %3182 = vpow2.f32 %v2625_v19  ;;  %v2632_v19 = vmul.f32 -1.442695, %v4637_v23  ;;  %v4653_v63 = vld [vmem:[%s4103_s30 + $0x300] sm:$0xff] }
  0xdf   : > { %v3165_v42 = vpop.eup %3164  ;;  %2259 = vst [vmem:[%s4190_s17 + $0x248] sm:$0xff] %v2003_v51  ;;  %v2005_v33 = vmul.f32 %v3163_v49, %v4526_v9  ;;  %3184 = vpow2.f32 %v2626_v12  ;;  %v2634_v51 = vmul.f32 -1.442695, %v4644_v28 }
  0xe0   : > { %v3167_v47 = vpop.eup %3166  ;;  %2260 = vst [vmem:[%s4190_s17 + $0x250] sm:$0xff] %v2004_v43  ;;  %v2006_v46 = vmul.f32 %v3165_v42, %v4532_v56  ;;  %3186 = vpow2.f32 %v2627_v27  ;;  %v2635_v43 = vmul.f32 -1.442695, %v4648_v34 }
  0xe1   : > { %v3169_v39 = vpop.eup %3168  ;;  %2261 = vst [vmem:[%s4190_s17 + $0x258] sm:$0xff] %v2005_v33  ;;  %v2007_v50 = vmul.f32 %v3167_v47, %v4538_v1  ;;  %3188 = vpow2.f32 %v2628_v48  ;;  %v4658_v48 = vld [vmem:[%s4103_s30 + $0x308] sm:$0xff]  ;;  %v2636_v33 = vmul.f32 -1.442695, %v4653_v63 }
  0xe2   : > { %v3171_v40 = vpop.eup %3170  ;;  %2262 = vst [vmem:[%s4190_s17 + $0x260] sm:$0xff] %v2006_v46  ;;  %v1240_v54 = vadd.f32 1.0, %v3169_v39  ;;  %3190 = vpow2.f32 %v2629_v11  ;;  %v4664_v11 = vld [vmem:[%s4103_s30 + $0x310] sm:$0xff]  ;;  %v2637_v46 = vmul.f32 -1.442695, %v4658_v48  ;;  %v4676_v39 = vld [vmem:[%s4103_s30 + $0x320] sm:$0xff] }
  0xe3   : > { %v3173_v20 = vpop.eup %3172  ;;  %2263 = vst [vmem:[%s4190_s17 + $0x268] sm:$0xff] %v2007_v50  ;;  %v1241_v9 = vadd.f32 1.0, %v3171_v40  ;;  %3192 = vpow2.f32 %v2630_v21  ;;  %v4670_v21 = vld [vmem:[%s4103_s30 + $0x318] sm:$0xff]  ;;  %v2638_v40 = vmul.f32 -1.442695, %v4664_v11 }
  0xe4   : > { %v3175_v17 = vpop.eup %3174  ;;  %3194 = vrcp.f32 %v1240_v54  ;;  %v1242_v55 = vadd.f32 1.0, %v3173_v20  ;;  %v4682_v54 = vld [vmem:[%s4103_s30 + $0x328] sm:$0xff] }
  0xe5   : > { %v3177_v44 = vpop.eup %3176  ;;  %3196 = vrcp.f32 %v1241_v9  ;;  %v1243_v56 = vadd.f32 1.0, %v3175_v17  ;;  %v2639_v9 = vmul.f32 -1.442695, %v4670_v21  ;;  %v4688_v17 = vld [vmem:[%s4103_s30 + $0x330] sm:$0xff] }
  0xe6   : > { %v3179_v59 = vpop.eup %3178  ;;  %3198 = vrcp.f32 %v1242_v55  ;;  %v1244_v0 = vadd.f32 1.0, %v3177_v44  ;;  %v2640_v44 = vmul.f32 -1.442695, %v4676_v39 }
  0xe7   : > { %v3181_v1 = vpop.eup %3180  ;;  %3200 = vrcp.f32 %v1243_v56  ;;  %v1245_v62 = vadd.f32 1.0, %v3179_v59  ;;  %v4694_v56 = vld [vmem:[%s4103_s30 + $0x338] sm:$0xff] }
  0xe8   : > { %v3183_v61 = vpop.eup %3182  ;;  %3202 = vrcp.f32 %v1244_v0  ;;  %v1246_v52 = vadd.f32 1.0, %v3181_v1  ;;  %v2641_v0 = vmul.f32 -1.442695, %v4682_v54 }
  0xe9   : > { %v3185_v10 = vpop.eup %3184  ;;  %3204 = vrcp.f32 %v1245_v62  ;;  %v1247_v5 = vadd.f32 1.0, %v3183_v61 }
  0xea   : > { %v3187_v57 = vpop.eup %3186  ;;  %3206 = vrcp.f32 %v1246_v52  ;;  %v1248_v58 = vadd.f32 1.0, %v3185_v10 }
  0xeb   : > { %v3189_v2 = vpop.eup %3188  ;;  %3208 = vrcp.f32 %v1247_v5  ;;  %v1249_v31 = vadd.f32 1.0, %v3187_v57 }
  0xec   : > { %v3191_v25 = vpop.eup %3190  ;;  %3210 = vrcp.f32 %v1248_v58  ;;  %v1250_v24 = vadd.f32 1.0, %v3189_v2 }
  0xed   : > { %v3193_v3 = vpop.eup %3192  ;;  %3212 = vrcp.f32 %v1249_v31  ;;  %v1251_v29 = vadd.f32 1.0, %v3191_v25 }
  0xee   : > { %v3195_v32 = vpop.eup %3194  ;;  %3214 = vrcp.f32 %v1250_v24  ;;  %v1252_v30 = vadd.f32 1.0, %v3193_v3 }
  0xef   : > { %v3197_v37 = vpop.eup %3196  ;;  %v2008_v12 = vmul.f32 %v3195_v32, %v4556_v41  ;;  %3216 = vrcp.f32 %v1251_v29 }
  0xf0   : > { %v3199_v27 = vpop.eup %3198  ;;  %v2009_v7 = vmul.f32 %v3197_v37, %v4559_v53  ;;  %3218 = vrcp.f32 %v1252_v30 }
  0xf1   : > { %v3201_v49 = vpop.eup %3200  ;;  %2264 = vst [vmem:[%s4190_s17 + $0x270] sm:$0xff] %v2008_v12  ;;  %v2010_v41 = vmul.f32 %v3199_v27, %v4562_v4  ;;  %3220 = vpow2.f32 %v2631_v45 }
  0xf2   : > { %v3203_v42 = vpop.eup %3202  ;;  %2265 = vst [vmem:[%s4190_s17 + $0x278] sm:$0xff] %v2009_v7  ;;  %v2011_v53 = vmul.f32 %v3201_v49, %v4566_v18  ;;  %3222 = vpow2.f32 %v2632_v19  ;;  %v4712_v7 = vld [vmem:[%s4103_s30 + $0x340] sm:$0xff] }
  0xf3   : > { %v3205_v47 = vpop.eup %3204  ;;  %2266 = vst [vmem:[%s4190_s17 + $0x280] sm:$0xff] %v2010_v41  ;;  %v2012_v4 = vmul.f32 %v3203_v42, %v4570_v22  ;;  %3224 = vpow2.f32 %v2633_v6  ;;  %v4715_v41 = vld [vmem:[%s4103_s30 + $0x348] sm:$0xff] }
  0xf4   : > { %v3207_v50 = vpop.eup %3206  ;;  %2267 = vst [vmem:[%s4190_s17 + $0x288] sm:$0xff] %v2011_v53  ;;  %v2013_v18 = vmul.f32 %v3205_v47, %v4575_v8  ;;  %3226 = vpow2.f32 %v2634_v51  ;;  %v4718_v53 = vld [vmem:[%s4103_s30 + $0x350] sm:$0xff] }
  0xf5   : > { %v3209_v20 = vpop.eup %3208  ;;  %2268 = vst [vmem:[%s4190_s17 + $0x290] sm:$0xff] %v2012_v4  ;;  %v2014_v22 = vmul.f32 %v3207_v50, %v4580_v16  ;;  %3228 = vpow2.f32 %v2635_v43  ;;  %v2644_v4 = vmul.f32 -1.442695, %v4712_v7 }
  0xf6   : > { %v3211_v55 = vpop.eup %3210  ;;  %2269 = vst [vmem:[%s4190_s17 + $0x298] sm:$0xff] %v2013_v18  ;;  %v2015_v8 = vmul.f32 %v3209_v20, %v4586_v13  ;;  %3230 = vpow2.f32 %v2636_v33  ;;  %v2642_v13 = vmul.f32 -1.442695, %v4688_v17  ;;  %v4726_v20 = vld [vmem:[%s4103_s30 + $0x360] sm:$0xff] }
  0xf7   : > { %v3213_v59 = vpop.eup %3212  ;;  %2270 = vst [vmem:[%s4190_s17 + $0x2a0] sm:$0xff] %v2014_v22  ;;  %v2016_v16 = vmul.f32 %v3211_v55, %v4592_v14  ;;  %3232 = vpow2.f32 %v2637_v46  ;;  %v2643_v14 = vmul.f32 -1.442695, %v4694_v56  ;;  %v4722_v46 = vld [vmem:[%s4103_s30 + $0x358] sm:$0xff]  ;;  %v2646_v55 = vmul.f32 -1.442695, %v4718_v53 }
  0xf8   : > { %v3215_v1 = vpop.eup %3214  ;;  %2271 = vst [vmem:[%s4190_s17 + $0x2a8] sm:$0xff] %v2015_v8  ;;  %v2017_v62 = vmul.f32 %v3213_v59, %v4598_v15  ;;  %3234 = vpow2.f32 %v2638_v40  ;;  %v2645_v40 = vmul.f32 -1.442695, %v4715_v41  ;;  %v4731_v8 = vld [vmem:[%s4103_s30 + $0x368] sm:$0xff] }
  0xf9   : > { %v3217_v61 = vpop.eup %3216  ;;  %2272 = vst [vmem:[%s4190_s17 + $0x2b0] sm:$0xff] %v2016_v16  ;;  %v2018_v52 = vmul.f32 %v3215_v1, %v4604_v36  ;;  %3236 = vpow2.f32 %v2639_v9  ;;  %v2647_v16 = vmul.f32 -1.442695, %v4722_v46 }
  0xfa   : > { %v3219_v10 = vpop.eup %3218  ;;  %2273 = vst [vmem:[%s4190_s17 + $0x2b8] sm:$0xff] %v2017_v62  ;;  %v2019_v5 = vmul.f32 %v3217_v61, %v4610_v26  ;;  %3238 = vpow2.f32 %v2640_v44  ;;  %v2648_v62 = vmul.f32 -1.442695, %v4726_v20 }
  0xfb   : > { %v3221_v57 = vpop.eup %3220  ;;  %2274 = vst [vmem:[%s4190_s17 + $0x2c0] sm:$0xff] %v2018_v52  ;;  %v2020_v15 = vmul.f32 %v3219_v10, %v4616_v38  ;;  %3240 = vpow2.f32 %v2641_v0  ;;  %v4736_v0 = vld [vmem:[%s4103_s30 + $0x370] sm:$0xff]  ;;  %v2649_v52 = vmul.f32 -1.442695, %v4731_v8 }
  0xfc   : > { %v3223_v58 = vpop.eup %3222  ;;  %2275 = vst [vmem:[%s4190_s17 + $0x2c8] sm:$0xff] %v2019_v5  ;;  %v1253_v2 = vadd.f32 1.0, %v3221_v57  ;;  %3242 = vpow2.f32 %v2642_v13  ;;  %v4742_v13 = vld [vmem:[%s4103_s30 + $0x378] sm:$0xff]  ;;  %v2650_v5 = vmul.f32 -1.442695, %v4736_v0  ;;  %v4754_v57 = vld [vmem:[%s4103_s30 + $0x388] sm:$0xff] }
  0xfd   : > { %v3225_v31 = vpop.eup %3224  ;;  %2276 = vst [vmem:[%s4190_s17 + $0x2d0] sm:$0xff] %v2020_v15  ;;  %v1254_v36 = vadd.f32 1.0, %v3223_v58  ;;  %3244 = vpow2.f32 %v2643_v14  ;;  %v4748_v14 = vld [vmem:[%s4103_s30 + $0x380] sm:$0xff]  ;;  %v2651_v58 = vmul.f32 -1.442695, %v4742_v13 }
  0xfe   : > { %v3227_v25 = vpop.eup %3226  ;;  %3246 = vrcp.f32 %v1253_v2  ;;  %v1255_v24 = vadd.f32 1.0, %v3225_v31  ;;  %v4760_v2 = vld [vmem:[%s4103_s30 + $0x390] sm:$0xff] }
  0xff   : > { %v3229_v3 = vpop.eup %3228  ;;  %3248 = vrcp.f32 %v1254_v36  ;;  %v1256_v26 = vadd.f32 1.0, %v3227_v25  ;;  %v2652_v36 = vmul.f32 -1.442695, %v4748_v14  ;;  %v4766_v25 = vld [vmem:[%s4103_s30 + $0x398] sm:$0xff] }
 0x100   : > { %v3231_v29 = vpop.eup %3230  ;;  %3250 = vrcp.f32 %v1255_v24  ;;  %v1257_v45 = vadd.f32 1.0, %v3229_v3  ;;  %v2653_v3 = vmul.f32 -1.442695, %v4754_v57 }
 0x101   : > { %v3233_v38 = vpop.eup %3232  ;;  %3252 = vrcp.f32 %v1256_v26  ;;  %v1258_v32 = vadd.f32 1.0, %v3231_v29  ;;  %v4772_v26 = vld [vmem:[%s4103_s30 + $0x3a0] sm:$0xff] }
 0x102   : > { %v3235_v30 = vpop.eup %3234  ;;  %3254 = vrcp.f32 %v1257_v45  ;;  %v1259_v19 = vadd.f32 1.0, %v3233_v38  ;;  %v2654_v45 = vmul.f32 -1.442695, %v4760_v2 }
 0x103   : > { %v3237_v37 = vpop.eup %3236  ;;  %3256 = vrcp.f32 %v1258_v32  ;;  %v1260_v12 = vadd.f32 1.0, %v3235_v30 }
 0x104   : > { %v3239_v6 = vpop.eup %3238  ;;  %3258 = vrcp.f32 %v1259_v19  ;;  %v1261_v27 = vadd.f32 1.0, %v3237_v37 }
 0x105   : > { %v3241_v51 = vpop.eup %3240  ;;  %3260 = vrcp.f32 %v1260_v12  ;;  %v1262_v49 = vadd.f32 1.0, %v3239_v6 }
 0x106   : > { %v3243_v43 = vpop.eup %3242  ;;  %3262 = vrcp.f32 %v1261_v27  ;;  %v1263_v42 = vadd.f32 1.0, %v3241_v51 }
 0x107   : > { %v3245_v33 = vpop.eup %3244  ;;  %3264 = vrcp.f32 %v1262_v49  ;;  %v1264_v47 = vadd.f32 1.0, %v3243_v43 }
 0x108   : > { %v3247_v50 = vpop.eup %3246  ;;  %3266 = vrcp.f32 %v1263_v42  ;;  %v1265_v18 = vadd.f32 1.0, %v3245_v33 }
 0x109   : > { %v3249_v22 = vpop.eup %3248  ;;  %v2021_v9 = vmul.f32 %v3247_v50, %v4634_v60  ;;  %3268 = vrcp.f32 %v1264_v47 }
 0x10a   : > { %v3251_v44 = vpop.eup %3250  ;;  %v2022_v59 = vmul.f32 %v3249_v22, %v4637_v23  ;;  %3270 = vrcp.f32 %v1265_v18 }
 0x10b   : > { %v3253_v1 = vpop.eup %3252  ;;  %2277 = vst [vmem:[%s4190_s17 + $0x2d8] sm:$0xff] %v2021_v9  ;;  %v2023_v60 = vmul.f32 %v3251_v44, %v4640_v35  ;;  %3272 = vpow2.f32 %v2644_v4 }
 0x10c   : > { %v3255_v61 = vpop.eup %3254  ;;  %2278 = vst [vmem:[%s4190_s17 + $0x2e0] sm:$0xff] %v2022_v59  ;;  %v2024_v23 = vmul.f32 %v3253_v1, %v4644_v28  ;;  %3274 = vpow2.f32 %v2645_v40  ;;  %v4790_v59 = vld [vmem:[%s4103_s30 + $0x3a8] sm:$0xff] }
 0x10d   : > { %v3257_v10 = vpop.eup %3256  ;;  %2279 = vst [vmem:[%s4190_s17 + $0x2e8] sm:$0xff] %v2023_v60  ;;  %v2025_v35 = vmul.f32 %v3255_v61, %v4648_v34  ;;  %3276 = vpow2.f32 %v2646_v55  ;;  %v4793_v60 = vld [vmem:[%s4103_s30 + $0x3b0] sm:$0xff] }
 0x10e   : > { %v3259_v15 = vpop.eup %3258  ;;  %2280 = vst [vmem:[%s4190_s17 + $0x2f0] sm:$0xff] %v2024_v23  ;;  %v2026_v28 = vmul.f32 %v3257_v10, %v4653_v63  ;;  %3278 = vpow2.f32 %v2647_v16  ;;  %v4796_v23 = vld [vmem:[%s4103_s30 + $0x3b8] sm:$0xff] }
 0x10f   : > { %v3261_v31 = vpop.eup %3260  ;;  %2281 = vst [vmem:[%s4190_s17 + $0x2f8] sm:$0xff] %v2025_v35  ;;  %v2027_v34 = vmul.f32 %v3259_v15, %v4658_v48  ;;  %3280 = vpow2.f32 %v2648_v62  ;;  %v2657_v35 = vmul.f32 -1.442695, %v4790_v59 }
 0x110   : > { %v3263_v24 = vpop.eup %3262  ;;  %2282 = vst [vmem:[%s4190_s17 + $0x300] sm:$0xff] %v2026_v28  ;;  %v2028_v63 = vmul.f32 %v3261_v31, %v4664_v11  ;;  %3282 = vpow2.f32 %v2649_v52  ;;  %v2655_v11 = vmul.f32 -1.442695, %v4766_v25  ;;  %v4804_v31 = vld [vmem:[%s4103_s30 + $0x3c8] sm:$0xff] }
 0x111   : > { %v3265_v29 = vpop.eup %3264  ;;  %2283 = vst [vmem:[%s4190_s17 + $0x308] sm:$0xff] %v2027_v34  ;;  %v2029_v48 = vmul.f32 %v3263_v24, %v4670_v21  ;;  %3284 = vpow2.f32 %v2650_v5  ;;  %v2656_v21 = vmul.f32 -1.442695, %v4772_v26  ;;  %v4800_v5 = vld [vmem:[%s4103_s30 + $0x3c0] sm:$0xff]  ;;  %v2659_v24 = vmul.f32 -1.442695, %v4796_v23 }
 0x112   : > { %v3267_v38 = vpop.eup %3266  ;;  %2284 = vst [vmem:[%s4190_s17 + $0x310] sm:$0xff] %v2028_v63  ;;  %v2030_v32 = vmul.f32 %v3265_v29, %v4676_v39  ;;  %3286 = vpow2.f32 %v2651_v58  ;;  %v2658_v58 = vmul.f32 -1.442695, %v4793_v60  ;;  %v4809_v63 = vld [vmem:[%s4103_s30 + $0x3d0] sm:$0xff] }
 0x113   : > { %v3269_v30 = vpop.eup %3268  ;;  %2285 = vst [vmem:[%s4190_s17 + $0x318] sm:$0xff] %v2029_v48  ;;  %v2031_v19 = vmul.f32 %v3267_v38, %v4682_v54  ;;  %3288 = vpow2.f32 %v2652_v36  ;;  %v2660_v48 = vmul.f32 -1.442695, %v4800_v5 }
 0x114   : > { %v3271_v37 = vpop.eup %3270  ;;  %2286 = vst [vmem:[%s4190_s17 + $0x320] sm:$0xff] %v2030_v32  ;;  %v2032_v12 = vmul.f32 %v3269_v30, %v4688_v17  ;;  %3290 = vpow2.f32 %v2653_v3  ;;  %v2661_v32 = vmul.f32 -1.442695, %v4804_v31 }
 0x115   : > { %v3273_v6 = vpop.eup %3272  ;;  %2287 = vst [vmem:[%s4190_s17 + $0x328] sm:$0xff] %v2031_v19  ;;  %v2033_v39 = vmul.f32 %v3271_v37, %v4694_v56  ;;  %3292 = vpow2.f32 %v2654_v45  ;;  %v4814_v45 = vld [vmem:[%s4103_s30 + $0x3d8] sm:$0xff]  ;;  %v2662_v19 = vmul.f32 -1.442695, %v4809_v63 }
 0x116   : > { %v3275_v27 = vpop.eup %3274  ;;  %2288 = vst [vmem:[%s4190_s17 + $0x330] sm:$0xff] %v2032_v12  ;;  %v1266_v51 = vadd.f32 1.0, %v3273_v6  ;;  %3294 = vpow2.f32 %v2655_v11  ;;  %v4820_v11 = vld [vmem:[%s4103_s30 + $0x3e0] sm:$0xff]  ;;  %v2663_v12 = vmul.f32 -1.442695, %v4814_v45  ;;  %v4832_v6 = vld [vmem:[%s4103_s30 + $0x3f0] sm:$0xff] }
 0x117   : > { %v3277_v49 = vpop.eup %3276  ;;  %2289 = vst [vmem:[%s4190_s17 + $0x338] sm:$0xff] %v2033_v39  ;;  %v1267_v54 = vadd.f32 1.0, %v3275_v27  ;;  %3296 = vpow2.f32 %v2656_v21  ;;  %v4826_v21 = vld [vmem:[%s4103_s30 + $0x3e8] sm:$0xff]  ;;  %v2664_v27 = vmul.f32 -1.442695, %v4820_v11 }
 0x118   : > { %v3279_v43 = vpop.eup %3278  ;;  %3298 = vrcp.f32 %v1266_v51  ;;  %v1268_v42 = vadd.f32 1.0, %v3277_v49  ;;  %v4838_v51 = vld [vmem:[%s4103_s30 + $0x3f8] sm:$0xff] }
 0x119   : > { %v3281_v33 = vpop.eup %3280  ;;  %3300 = vrcp.f32 %v1267_v54  ;;  %v1269_v17 = vadd.f32 1.0, %v3279_v43  ;;  %v2665_v54 = vmul.f32 -1.442695, %v4826_v21  ;;  %v4844_v43 = vld [vmem:[%s4103_s30 + $0x400] sm:$0xff] }
 0x11a   : > { %v3283_v47 = vpop.eup %3282  ;;  %3302 = vrcp.f32 %v1268_v42  ;;  %v1270_v4 = vadd.f32 1.0, %v3281_v33  ;;  %v2666_v33 = vmul.f32 -1.442695, %v4832_v6 }
 0x11b   : > { %v3285_v56 = vpop.eup %3284  ;;  %3304 = vrcp.f32 %v1269_v17  ;;  %v1271_v50 = vadd.f32 1.0, %v3283_v47  ;;  %v4850_v17 = vld [vmem:[%s4103_s30 + $0x408] sm:$0xff] }
 0x11c   : > { %v3287_v18 = vpop.eup %3286  ;;  %3306 = vrcp.f32 %v1270_v4  ;;  %v1272_v40 = vadd.f32 1.0, %v3285_v56  ;;  %v2667_v4 = vmul.f32 -1.442695, %v4838_v51 }
 0x11d   : > { %v3289_v22 = vpop.eup %3288  ;;  %3308 = vrcp.f32 %v1271_v50  ;;  %v1273_v9 = vadd.f32 1.0, %v3287_v18 }
 0x11e   : > { %v3291_v55 = vpop.eup %3290  ;;  %3310 = vrcp.f32 %v1272_v40  ;;  %v1274_v44 = vadd.f32 1.0, %v3289_v22 }
 0x11f   : > { %v3293_v16 = vpop.eup %3292  ;;  %3312 = vrcp.f32 %v1273_v9  ;;  %v1275_v1 = vadd.f32 1.0, %v3291_v55 }
 0x120   : > { %v3295_v62 = vpop.eup %3294  ;;  %3314 = vrcp.f32 %v1274_v44  ;;  %v1276_v61 = vadd.f32 1.0, %v3293_v16 }
 0x121   : > { %v3297_v52 = vpop.eup %3296  ;;  %3316 = vrcp.f32 %v1275_v1  ;;  %v1277_v10 = vadd.f32 1.0, %v3295_v62 }
 0x122   : > { %v3299_v15 = vpop.eup %3298  ;;  %3318 = vrcp.f32 %v1276_v61  ;;  %v1278_v28 = vadd.f32 1.0, %v3297_v52 }
 0x123   : > { %v3301_v34 = vpop.eup %3300  ;;  %v2034_v36 = vmul.f32 %v3299_v15, %v4712_v7  ;;  %3320 = vrcp.f32 %v1277_v10 }
 0x124   : > { %v3303_v3 = vpop.eup %3302  ;;  %v2035_v29 = vmul.f32 %v3301_v34, %v4715_v41  ;;  %3322 = vrcp.f32 %v1278_v28 }
 0x125   : > { %v3305_v38 = vpop.eup %3304  ;;  %2290 = vst [vmem:[%s4190_s17 + $0x340] sm:$0xff] %v2034_v36  ;;  %v2036_v7 = vmul.f32 %v3303_v3, %v4718_v53  ;;  %3324 = vpow2.f32 %v2657_v35 }
 0x126   : > { %v3307_v30 = vpop.eup %3306  ;;  %2291 = vst [vmem:[%s4190_s17 + $0x348] sm:$0xff] %v2035_v29  ;;  %v2037_v41 = vmul.f32 %v3305_v38, %v4722_v46  ;;  %3326 = vpow2.f32 %v2658_v58  ;;  %v4868_v29 = vld [vmem:[%s4103_s30 + $0x410] sm:$0xff] }
 0x127   : > { %v3309_v37 = vpop.eup %3308  ;;  %2292 = vst [vmem:[%s4190_s17 + $0x350] sm:$0xff] %v2036_v7  ;;  %v2038_v53 = vmul.f32 %v3307_v30, %v4726_v20  ;;  %3328 = vpow2.f32 %v2659_v24  ;;  %v4871_v7 = vld [vmem:[%s4103_s30 + $0x418] sm:$0xff] }
 0x128   : > { %v3311_v39 = vpop.eup %3310  ;;  %2293 = vst [vmem:[%s4190_s17 + $0x358] sm:$0xff] %v2037_v41  ;;  %v2039_v46 = vmul.f32 %v3309_v37, %v4731_v8  ;;  %3330 = vpow2.f32 %v2660_v48  ;;  %v4874_v41 = vld [vmem:[%s4103_s30 + $0x420] sm:$0xff] }
 0x129   : > { %v3313_v49 = vpop.eup %3312  ;;  %2294 = vst [vmem:[%s4190_s17 + $0x360] sm:$0xff] %v2038_v53  ;;  %v2040_v20 = vmul.f32 %v3311_v39, %v4736_v0  ;;  %3332 = vpow2.f32 %v2661_v32  ;;  %v2670_v53 = vmul.f32 -1.442695, %v4868_v29 }
 0x12a   : > { %v3315_v42 = vpop.eup %3314  ;;  %2295 = vst [vmem:[%s4190_s17 + $0x368] sm:$0xff] %v2039_v46  ;;  %v2041_v8 = vmul.f32 %v3313_v49, %v4742_v13  ;;  %3334 = vpow2.f32 %v2662_v19  ;;  %v2668_v13 = vmul.f32 -1.442695, %v4844_v43  ;;  %v4882_v49 = vld [vmem:[%s4103_s30 + $0x430] sm:$0xff] }
 0x12b   : > { %v3317_v47 = vpop.eup %3316  ;;  %2296 = vst [vmem:[%s4190_s17 + $0x370] sm:$0xff] %v2040_v20  ;;  %v2042_v0 = vmul.f32 %v3315_v42, %v4748_v14  ;;  %3336 = vpow2.f32 %v2663_v12  ;;  %v2669_v14 = vmul.f32 -1.442695, %v4850_v17  ;;  %v4878_v12 = vld [vmem:[%s4103_s30 + $0x428] sm:$0xff]  ;;  %v2672_v42 = vmul.f32 -1.442695, %v4874_v41 }
 0x12c   : > { %v3319_v56 = vpop.eup %3318  ;;  %2297 = vst [vmem:[%s4190_s17 + $0x378] sm:$0xff] %v2041_v8  ;;  %v2043_v50 = vmul.f32 %v3317_v47, %v4754_v57  ;;  %3338 = vpow2.f32 %v2664_v27  ;;  %v2671_v27 = vmul.f32 -1.442695, %v4871_v7  ;;  %v4887_v8 = vld [vmem:[%s4103_s30 + $0x438] sm:$0xff] }
 0x12d   : > { %v3321_v18 = vpop.eup %3320  ;;  %2298 = vst [vmem:[%s4190_s17 + $0x380] sm:$0xff] %v2042_v0  ;;  %v2044_v40 = vmul.f32 %v3319_v56, %v4760_v2  ;;  %3340 = vpow2.f32 %v2665_v54  ;;  %v2673_v0 = vmul.f32 -1.442695, %v4878_v12 }
 0x12e   : > { %v3323_v22 = vpop.eup %3322  ;;  %2299 = vst [vmem:[%s4190_s17 + $0x388] sm:$0xff] %v2043_v50  ;;  %v2045_v9 = vmul.f32 %v3321_v18, %v4766_v25  ;;  %3342 = vpow2.f32 %v2666_v33  ;;  %v2674_v50 = vmul.f32 -1.442695, %v4882_v49 }
 0x12f   : > { %v3325_v55 = vpop.eup %3324  ;;  %2300 = vst [vmem:[%s4190_s17 + $0x390] sm:$0xff] %v2044_v40  ;;  %v2046_v57 = vmul.f32 %v3323_v22, %v4772_v26  ;;  %3344 = vpow2.f32 %v2667_v4  ;;  %v4892_v4 = vld [vmem:[%s4103_s30 + $0x440] sm:$0xff]  ;;  %v2675_v40 = vmul.f32 -1.442695, %v4887_v8 }
 0x130   : > { %v3327_v44 = vpop.eup %3326  ;;  %2301 = vst [vmem:[%s4190_s17 + $0x398] sm:$0xff] %v2045_v9  ;;  %v1279_v16 = vadd.f32 1.0, %v3325_v55  ;;  %3346 = vpow2.f32 %v2668_v13  ;;  %v4898_v13 = vld [vmem:[%s4103_s30 + $0x448] sm:$0xff]  ;;  %v2676_v9 = vmul.f32 -1.442695, %v4892_v4  ;;  %v4910_v55 = vld [vmem:[%s4103_s30 + $0x458] sm:$0xff] }
 0x131   : > { %v3329_v1 = vpop.eup %3328  ;;  %2302 = vst [vmem:[%s4190_s17 + $0x3a0] sm:$0xff] %v2046_v57  ;;  %v1280_v2 = vadd.f32 1.0, %v3327_v44  ;;  %3348 = vpow2.f32 %v2669_v14  ;;  %v4904_v14 = vld [vmem:[%s4103_s30 + $0x450] sm:$0xff]  ;;  %v2677_v44 = vmul.f32 -1.442695, %v4898_v13 }
 0x132   : > { %v3331_v62 = vpop.eup %3330  ;;  %3350 = vrcp.f32 %v1279_v16  ;;  %v1281_v61 = vadd.f32 1.0, %v3329_v1  ;;  %v4916_v16 = vld [vmem:[%s4103_s30 + $0x460] sm:$0xff] }
 0x133   : > { %v3333_v52 = vpop.eup %3332  ;;  %3352 = vrcp.f32 %v1280_v2  ;;  %v1282_v25 = vadd.f32 1.0, %v3331_v62  ;;  %v2678_v2 = vmul.f32 -1.442695, %v4904_v14  ;;  %v4922_v62 = vld [vmem:[%s4103_s30 + $0x468] sm:$0xff] }
 0x134   : > { %v3335_v10 = vpop.eup %3334  ;;  %3354 = vrcp.f32 %v1281_v61  ;;  %v1283_v35 = vadd.f32 1.0, %v3333_v52  ;;  %v2679_v52 = vmul.f32 -1.442695, %v4910_v55 }
 0x135   : > { %v3337_v26 = vpop.eup %3336  ;;  %3356 = vrcp.f32 %v1282_v25  ;;  %v1284_v15 = vadd.f32 1.0, %v3335_v10  ;;  %v4928_v25 = vld [vmem:[%s4103_s30 + $0x470] sm:$0xff] }
 0x136   : > { %v3339_v28 = vpop.eup %3338  ;;  %3358 = vrcp.f32 %v1283_v35  ;;  %v1285_v58 = vadd.f32 1.0, %v3337_v26  ;;  %v2680_v35 = vmul.f32 -1.442695, %v4916_v16 }
 0x137   : > { %v3341_v34 = vpop.eup %3340  ;;  %3360 = vrcp.f32 %v1284_v15  ;;  %v1286_v36 = vadd.f32 1.0, %v3339_v28 }
 0x138   : > { %v3343_v24 = vpop.eup %3342  ;;  %3362 = vrcp.f32 %v1285_v58  ;;  %v1287_v3 = vadd.f32 1.0, %v3341_v34 }
 0x139   : > { %v3345_v48 = vpop.eup %3344  ;;  %3364 = vrcp.f32 %v1286_v36  ;;  %v1288_v38 = vadd.f32 1.0, %v3343_v24 }
 0x13a   : > { %v3347_v32 = vpop.eup %3346  ;;  %3366 = vrcp.f32 %v1287_v3  ;;  %v1289_v30 = vadd.f32 1.0, %v3345_v48 }
 0x13b   : > { %v3349_v19 = vpop.eup %3348  ;;  %3368 = vrcp.f32 %v1288_v38  ;;  %v1290_v37 = vadd.f32 1.0, %v3347_v32 }
 0x13c   : > { %v3351_v39 = vpop.eup %3350  ;;  %3370 = vrcp.f32 %v1289_v30  ;;  %v1291_v46 = vadd.f32 1.0, %v3349_v19 }
 0x13d   : > { %v3353_v20 = vpop.eup %3352  ;;  %v2047_v54 = vmul.f32 %v3351_v39, %v4790_v59  ;;  %3372 = vrcp.f32 %v1290_v37 }
 0x13e   : > { %v3355_v33 = vpop.eup %3354  ;;  %v2048_v47 = vmul.f32 %v3353_v20, %v4793_v60  ;;  %3374 = vrcp.f32 %v1291_v46 }
 0x13f   : > { %v3357_v56 = vpop.eup %3356  ;;  %2303 = vst [vmem:[%s4190_s17 + $0x3a8] sm:$0xff] %v2047_v54  ;;  %v2049_v59 = vmul.f32 %v3355_v33, %v4796_v23  ;;  %3376 = vpow2.f32 %v2670_v53 }
 0x140   : > { %v3359_v18 = vpop.eup %3358  ;;  %2304 = vst [vmem:[%s4190_s17 + $0x3b0] sm:$0xff] %v2048_v47  ;;  %v2050_v60 = vmul.f32 %v3357_v56, %v4800_v5  ;;  %3378 = vpow2.f32 %v2671_v27  ;;  %v4946_v47 = vld [vmem:[%s4103_s30 + $0x478] sm:$0xff] }
 0x141   : > { %v3361_v22 = vpop.eup %3360  ;;  %2305 = vst [vmem:[%s4190_s17 + $0x3b8] sm:$0xff] %v2049_v59  ;;  %v2051_v23 = vmul.f32 %v3359_v18, %v4804_v31  ;;  %3380 = vpow2.f32 %v2672_v42  ;;  %v4949_v59 = vld [vmem:[%s4103_s30 + $0x480] sm:$0xff] }
 0x142   : > { %v3363_v57 = vpop.eup %3362  ;;  %2306 = vst [vmem:[%s4190_s17 + $0x3c0] sm:$0xff] %v2050_v60  ;;  %v2052_v5 = vmul.f32 %v3361_v22, %v4809_v63  ;;  %3382 = vpow2.f32 %v2673_v0  ;;  %v4952_v60 = vld [vmem:[%s4103_s30 + $0x488] sm:$0xff] }
 0x143   : > { %v3365_v1 = vpop.eup %3364  ;;  %2307 = vst [vmem:[%s4190_s17 + $0x3c8] sm:$0xff] %v2051_v23  ;;  %v2053_v31 = vmul.f32 %v3363_v57, %v4814_v45  ;;  %3384 = vpow2.f32 %v2674_v50  ;;  %v2683_v23 = vmul.f32 -1.442695, %v4946_v47 }
 0x144   : > { %v3367_v61 = vpop.eup %3366  ;;  %2308 = vst [vmem:[%s4190_s17 + $0x3d0] sm:$0xff] %v2052_v5  ;;  %v2054_v63 = vmul.f32 %v3365_v1, %v4820_v11  ;;  %3386 = vpow2.f32 %v2675_v40  ;;  %v2681_v11 = vmul.f32 -1.442695, %v4922_v62  ;;  %v4960_v1 = vld [vmem:[%s4103_s30 + $0x498] sm:$0xff] }
 0x145   : > { %v3369_v10 = vpop.eup %3368  ;;  %2309 = vst [vmem:[%s4190_s17 + $0x3d8] sm:$0xff] %v2053_v31  ;;  %v2055_v45 = vmul.f32 %v3367_v61, %v4826_v21  ;;  %3388 = vpow2.f32 %v2676_v9  ;;  %v2682_v21 = vmul.f32 -1.442695, %v4928_v25  ;;  %v4956_v9 = vld [vmem:[%s4103_s30 + $0x490] sm:$0xff]  ;;  %v2685_v61 = vmul.f32 -1.442695, %v4952_v60 }
 0x146   : > { %v3371_v26 = vpop.eup %3370  ;;  %2310 = vst [vmem:[%s4190_s17 + $0x3e0] sm:$0xff] %v2054_v63  ;;  %v2056_v15 = vmul.f32 %v3369_v10, %v4832_v6  ;;  %3390 = vpow2.f32 %v2677_v44  ;;  %v2684_v44 = vmul.f32 -1.442695, %v4949_v59  ;;  %v4965_v63 = vld [vmem:[%s4103_s30 + $0x4a0] sm:$0xff] }
 0x147   : > { %v3373_v28 = vpop.eup %3372  ;;  %2311 = vst [vmem:[%s4190_s17 + $0x3e8] sm:$0xff] %v2055_v45  ;;  %v2057_v58 = vmul.f32 %v3371_v26, %v4838_v51  ;;  %3392 = vpow2.f32 %v2678_v2  ;;  %v2686_v45 = vmul.f32 -1.442695, %v4956_v9 }
 0x148   : > { %v3375_v34 = vpop.eup %3374  ;;  %2312 = vst [vmem:[%s4190_s17 + $0x3f0] sm:$0xff] %v2056_v15  ;;  %v2058_v36 = vmul.f32 %v3373_v28, %v4844_v43  ;;  %3394 = vpow2.f32 %v2679_v52  ;;  %v2687_v15 = vmul.f32 -1.442695, %v4960_v1 }
 0x149   : > { %v3377_v24 = vpop.eup %3376  ;;  %2313 = vst [vmem:[%s4190_s17 + $0x3f8] sm:$0xff] %v2057_v58  ;;  %v2059_v6 = vmul.f32 %v3375_v34, %v4850_v17  ;;  %3396 = vpow2.f32 %v2680_v35  ;;  %v4970_v35 = vld [vmem:[%s4103_s30 + $0x4a8] sm:$0xff]  ;;  %v2688_v58 = vmul.f32 -1.442695, %v4965_v63 }
 0x14a   : > { %v3379_v3 = vpop.eup %3378  ;;  %2314 = vst [vmem:[%s4190_s17 + $0x400] sm:$0xff] %v2058_v36  ;;  %v1292_v48 = vadd.f32 1.0, %v3377_v24  ;;  %3398 = vpow2.f32 %v2681_v11  ;;  %v4976_v11 = vld [vmem:[%s4103_s30 + $0x4b0] sm:$0xff]  ;;  %v2689_v36 = vmul.f32 -1.442695, %v4970_v35  ;;  %v4988_v24 = vld [vmem:[%s4103_s30 + $0x4c0] sm:$0xff] }
 0x14b   : > { %v3381_v38 = vpop.eup %3380  ;;  %2315 = vst [vmem:[%s4190_s17 + $0x408] sm:$0xff] %v2059_v6  ;;  %v1293_v51 = vadd.f32 1.0, %v3379_v3  ;;  %3400 = vpow2.f32 %v2682_v21  ;;  %v4982_v21 = vld [vmem:[%s4103_s30 + $0x4b8] sm:$0xff]  ;;  %v2690_v3 = vmul.f32 -1.442695, %v4976_v11 }
 0x14c   : > { %v3383_v32 = vpop.eup %3382  ;;  %3402 = vrcp.f32 %v1292_v48  ;;  %v1294_v30 = vadd.f32 1.0, %v3381_v38  ;;  %v4994_v48 = vld [vmem:[%s4103_s30 + $0x4c8] sm:$0xff] }
 0x14d   : > { %v3385_v19 = vpop.eup %3384  ;;  %3404 = vrcp.f32 %v1293_v51  ;;  %v1295_v43 = vadd.f32 1.0, %v3383_v32  ;;  %v2691_v51 = vmul.f32 -1.442695, %v4982_v21  ;;  %v5000_v32 = vld [vmem:[%s4103_s30 + $0x4d0] sm:$0xff] }
 0x14e   : > { %v3387_v37 = vpop.eup %3386  ;;  %3406 = vrcp.f32 %v1294_v30  ;;  %v1296_v53 = vadd.f32 1.0, %v3385_v19  ;;  %v2692_v19 = vmul.f32 -1.442695, %v4988_v24 }
 0x14f   : > { %v3389_v17 = vpop.eup %3388  ;;  %3408 = vrcp.f32 %v1295_v43  ;;  %v1297_v39 = vadd.f32 1.0, %v3387_v37  ;;  %v5006_v43 = vld [vmem:[%s4103_s30 + $0x4d8] sm:$0xff] }
 0x150   : > { %v3391_v46 = vpop.eup %3390  ;;  %3410 = vrcp.f32 %v1296_v53  ;;  %v1298_v27 = vadd.f32 1.0, %v3389_v17  ;;  %v2693_v53 = vmul.f32 -1.442695, %v4994_v48 }
 0x151   : > { %v3393_v20 = vpop.eup %3392  ;;  %3412 = vrcp.f32 %v1297_v39  ;;  %v1299_v54 = vadd.f32 1.0, %v3391_v46 }
 0x152   : > { %v3395_v42 = vpop.eup %3394  ;;  %3414 = vrcp.f32 %v1298_v27  ;;  %v1300_v33 = vadd.f32 1.0, %v3393_v20 }
 0x153   : > { %v3397_v0 = vpop.eup %3396  ;;  %3416 = vrcp.f32 %v1299_v54  ;;  %v1301_v56 = vadd.f32 1.0, %v3395_v42 }
 0x154   : > { %v3399_v50 = vpop.eup %3398  ;;  %3418 = vrcp.f32 %v1300_v33  ;;  %v1302_v18 = vadd.f32 1.0, %v3397_v0 }
 0x155   : > { %v3401_v40 = vpop.eup %3400  ;;  %3420 = vrcp.f32 %v1301_v56  ;;  %v1303_v22 = vadd.f32 1.0, %v3399_v50 }
 0x156   : > { %v3403_v57 = vpop.eup %3402  ;;  %3422 = vrcp.f32 %v1302_v18  ;;  %v1304_v5 = vadd.f32 1.0, %v3401_v40 }
 0x157   : > { %v3405_v31 = vpop.eup %3404  ;;  %v2060_v2 = vmul.f32 %v3403_v57, %v4868_v29  ;;  %3424 = vrcp.f32 %v1303_v22 }
 0x158   : > { %v3407_v52 = vpop.eup %3406  ;;  %v2061_v10 = vmul.f32 %v3405_v31, %v4871_v7  ;;  %3426 = vrcp.f32 %v1304_v5 }
 0x159   : > { %v3409_v26 = vpop.eup %3408  ;;  %2316 = vst [vmem:[%s4190_s17 + $0x410] sm:$0xff] %v2060_v2  ;;  %v2062_v29 = vmul.f32 %v3407_v52, %v4874_v41  ;;  %3428 = vpow2.f32 %v2683_v23 }
 0x15a   : > { %v3411_v28 = vpop.eup %3410  ;;  %2317 = vst [vmem:[%s4190_s17 + $0x418] sm:$0xff] %v2061_v10  ;;  %v2063_v7 = vmul.f32 %v3409_v26, %v4878_v12  ;;  %3430 = vpow2.f32 %v2684_v44  ;;  %v5024_v10 = vld [vmem:[%s4103_s30 + $0x4e0] sm:$0xff] }
 0x15b   : > { %v3413_v34 = vpop.eup %3412  ;;  %2318 = vst [vmem:[%s4190_s17 + $0x420] sm:$0xff] %v2062_v29  ;;  %v2064_v41 = vmul.f32 %v3411_v28, %v4882_v49  ;;  %3432 = vpow2.f32 %v2685_v61  ;;  %v5027_v29 = vld [vmem:[%s4103_s30 + $0x4e8] sm:$0xff] }
 0x15c   : > { %v3415_v6 = vpop.eup %3414  ;;  %2319 = vst [vmem:[%s4190_s17 + $0x428] sm:$0xff] %v2063_v7  ;;  %v2065_v12 = vmul.f32 %v3413_v34, %v4887_v8  ;;  %3434 = vpow2.f32 %v2686_v45  ;;  %v5030_v7 = vld [vmem:[%s4103_s30 + $0x4f0] sm:$0xff] }
 0x15d   : > { %v3417_v38 = vpop.eup %3416  ;;  %2320 = vst [vmem:[%s4190_s17 + $0x430] sm:$0xff] %v2064_v41  ;;  %v2066_v49 = vmul.f32 %v3415_v6, %v4892_v4  ;;  %3436 = vpow2.f32 %v2687_v15  ;;  %v2696_v41 = vmul.f32 -1.442695, %v5024_v10 }
 0x15e   : > { %v3419_v30 = vpop.eup %3418  ;;  %2321 = vst [vmem:[%s4190_s17 + $0x438] sm:$0xff] %v2065_v12  ;;  %v2067_v8 = vmul.f32 %v3417_v38, %v4898_v13  ;;  %3438 = vpow2.f32 %v2688_v58  ;;  %v2694_v13 = vmul.f32 -1.442695, %v5000_v32  ;;  %v5038_v38 = vld [vmem:[%s4103_s30 + $0x500] sm:$0xff] }
 0x15f   : > { %v3421_v37 = vpop.eup %3420  ;;  %2322 = vst [vmem:[%s4190_s17 + $0x440] sm:$0xff] %v2066_v49  ;;  %v2068_v4 = vmul.f32 %v3419_v30, %v4904_v14  ;;  %3440 = vpow2.f32 %v2689_v36  ;;  %v2695_v14 = vmul.f32 -1.442695, %v5006_v43  ;;  %v5034_v36 = vld [vmem:[%s4103_s30 + $0x4f8] sm:$0xff]  ;;  %v2698_v30 = vmul.f32 -1.442695, %v5030_v7 }
 0x160   : > { %v3423_v17 = vpop.eup %3422  ;;  %2323 = vst [vmem:[%s4190_s17 + $0x448] sm:$0xff] %v2067_v8  ;;  %v2069_v39 = vmul.f32 %v3421_v37, %v4910_v55  ;;  %3442 = vpow2.f32 %v2690_v3  ;;  %v2697_v3 = vmul.f32 -1.442695, %v5027_v29  ;;  %v5043_v8 = vld [vmem:[%s4103_s30 + $0x508] sm:$0xff] }
 0x161   : > { %v3425_v46 = vpop.eup %3424  ;;  %2324 = vst [vmem:[%s4190_s17 + $0x450] sm:$0xff] %v2068_v4  ;;  %v2070_v27 = vmul.f32 %v3423_v17, %v4916_v16  ;;  %3444 = vpow2.f32 %v2691_v51  ;;  %v2699_v4 = vmul.f32 -1.442695, %v5034_v36 }
 0x162   : > { %v3427_v20 = vpop.eup %3426  ;;  %2325 = vst [vmem:[%s4190_s17 + $0x458] sm:$0xff] %v2069_v39  ;;  %v2071_v54 = vmul.f32 %v3425_v46, %v4922_v62  ;;  %3446 = vpow2.f32 %v2692_v19  ;;  %v2700_v39 = vmul.f32 -1.442695, %v5038_v38 }
 0x163   : > { %v3429_v42 = vpop.eup %3428  ;;  %2326 = vst [vmem:[%s4190_s17 + $0x460] sm:$0xff] %v2070_v27  ;;  %v2072_v55 = vmul.f32 %v3427_v20, %v4928_v25  ;;  %3448 = vpow2.f32 %v2693_v53  ;;  %v5048_v53 = vld [vmem:[%s4103_s30 + $0x510] sm:$0xff]  ;;  %v2701_v27 = vmul.f32 -1.442695, %v5043_v8 }
 0x164   : > { %v3431_v33 = vpop.eup %3430  ;;  %2327 = vst [vmem:[%s4190_s17 + $0x468] sm:$0xff] %v2071_v54  ;;  %v1305_v0 = vadd.f32 1.0, %v3429_v42  ;;  %3450 = vpow2.f32 %v2694_v13  ;;  %v5054_v13 = vld [vmem:[%s4103_s30 + $0x518] sm:$0xff]  ;;  %v2702_v54 = vmul.f32 -1.442695, %v5048_v53  ;;  %v5066_v42 = vld [vmem:[%s4103_s30 + $0x528] sm:$0xff] }
 0x165   : > { %v3433_v56 = vpop.eup %3432  ;;  %2328 = vst [vmem:[%s4190_s17 + $0x470] sm:$0xff] %v2072_v55  ;;  %v1306_v16 = vadd.f32 1.0, %v3431_v33  ;;  %3452 = vpow2.f32 %v2695_v14  ;;  %v5060_v14 = vld [vmem:[%s4103_s30 + $0x520] sm:$0xff]  ;;  %v2703_v33 = vmul.f32 -1.442695, %v5054_v13 }
 0x166   : > { %v3435_v50 = vpop.eup %3434  ;;  %3454 = vrcp.f32 %v1305_v0  ;;  %v1307_v18 = vadd.f32 1.0, %v3433_v56  ;;  %v5072_v0 = vld [vmem:[%s4103_s30 + $0x530] sm:$0xff] }
 0x167   : > { %v3437_v40 = vpop.eup %3436  ;;  %3456 = vrcp.f32 %v1306_v16  ;;  %v1308_v62 = vadd.f32 1.0, %v3435_v50  ;;  %v2704_v16 = vmul.f32 -1.442695, %v5060_v14  ;;  %v5078_v50 = vld [vmem:[%s4103_s30 + $0x538] sm:$0xff] }
 0x168   : > { %v3439_v22 = vpop.eup %3438  ;;  %3458 = vrcp.f32 %v1307_v18  ;;  %v1309_v23 = vadd.f32 1.0, %v3437_v40  ;;  %v2705_v40 = vmul.f32 -1.442695, %v5066_v42 }
 0x169   : > { %v3441_v25 = vpop.eup %3440  ;;  %3460 = vrcp.f32 %v1308_v62  ;;  %v1310_v57 = vadd.f32 1.0, %v3439_v22  ;;  %v5084_v62 = vld [vmem:[%s4103_s30 + $0x540] sm:$0xff] }
 0x16a   : > { %v3443_v5 = vpop.eup %3442  ;;  %3462 = vrcp.f32 %v1309_v23  ;;  %v1311_v44 = vadd.f32 1.0, %v3441_v25  ;;  %v2706_v23 = vmul.f32 -1.442695, %v5072_v0 }
 0x16b   : > { %v3445_v31 = vpop.eup %3444  ;;  %3464 = vrcp.f32 %v1310_v57  ;;  %v1312_v2 = vadd.f32 1.0, %v3443_v5 }
 0x16c   : > { %v3447_v61 = vpop.eup %3446  ;;  %3466 = vrcp.f32 %v1311_v44  ;;  %v1313_v52 = vadd.f32 1.0, %v3445_v31 }
 0x16d   : > { %v3449_v45 = vpop.eup %3448  ;;  %3468 = vrcp.f32 %v1312_v2  ;;  %v1314_v26 = vadd.f32 1.0, %v3447_v61 }
 0x16e   : > { %v3451_v15 = vpop.eup %3450  ;;  %3470 = vrcp.f32 %v1313_v52  ;;  %v1315_v28 = vadd.f32 1.0, %v3449_v45 }
 0x16f   : > { %v3453_v58 = vpop.eup %3452  ;;  %3472 = vrcp.f32 %v1314_v26  ;;  %v1316_v34 = vadd.f32 1.0, %v3451_v15 }
 0x170   : > { %v3455_v6 = vpop.eup %3454  ;;  %3474 = vrcp.f32 %v1315_v28  ;;  %v1317_v12 = vadd.f32 1.0, %v3453_v58 }
 0x171   : > { %v3457_v49 = vpop.eup %3456  ;;  %v2073_v51 = vmul.f32 %v3455_v6, %v4946_v47  ;;  %3476 = vrcp.f32 %v1316_v34 }
 0x172   : > { %v3459_v19 = vpop.eup %3458  ;;  %v2074_v37 = vmul.f32 %v3457_v49, %v4949_v59  ;;  %3478 = vrcp.f32 %v1317_v12 }
 0x173   : > { %v3461_v17 = vpop.eup %3460  ;;  %2329 = vst [vmem:[%s4190_s17 + $0x478] sm:$0xff] %v2073_v51  ;;  %v2075_v47 = vmul.f32 %v3459_v19, %v4952_v60  ;;  %3480 = vpow2.f32 %v2696_v41 }
 0x174   : > { %v3463_v46 = vpop.eup %3462  ;;  %2330 = vst [vmem:[%s4190_s17 + $0x480] sm:$0xff] %v2074_v37  ;;  %v2076_v59 = vmul.f32 %v3461_v17, %v4956_v9  ;;  %3482 = vpow2.f32 %v2697_v3  ;;  %v5102_v37 = vld [vmem:[%s4103_s30 + $0x548] sm:$0xff] }
 0x175   : > { %v3465_v20 = vpop.eup %3464  ;;  %2331 = vst [vmem:[%s4190_s17 + $0x488] sm:$0xff] %v2075_v47  ;;  %v2077_v60 = vmul.f32 %v3463_v46, %v4960_v1  ;;  %3484 = vpow2.f32 %v2698_v30  ;;  %v5105_v47 = vld [vmem:[%s4103_s30 + $0x550] sm:$0xff] }
 0x176   : > { %v3467_v55 = vpop.eup %3466  ;;  %2332 = vst [vmem:[%s4190_s17 + $0x490] sm:$0xff] %v2076_v59  ;;  %v2078_v9 = vmul.f32 %v3465_v20, %v4965_v63  ;;  %3486 = vpow2.f32 %v2699_v4  ;;  %v5108_v59 = vld [vmem:[%s4103_s30 + $0x558] sm:$0xff] }
 0x177   : > { %v3469_v56 = vpop.eup %3468  ;;  %2333 = vst [vmem:[%s4190_s17 + $0x498] sm:$0xff] %v2077_v60  ;;  %v2079_v1 = vmul.f32 %v3467_v55, %v4970_v35  ;;  %3488 = vpow2.f32 %v2700_v39  ;;  %v2709_v60 = vmul.f32 -1.442695, %v5102_v37 }
 0x178   : > { %v3471_v18 = vpop.eup %3470  ;;  %2334 = vst [vmem:[%s4190_s17 + $0x4a0] sm:$0xff] %v2078_v9  ;;  %v2080_v63 = vmul.f32 %v3469_v56, %v4976_v11  ;;  %3490 = vpow2.f32 %v2701_v27  ;;  %v2707_v11 = vmul.f32 -1.442695, %v5078_v50  ;;  %v5116_v56 = vld [vmem:[%s4103_s30 + $0x568] sm:$0xff] }
 0x179   : > { %v3473_v22 = vpop.eup %3472  ;;  %2335 = vst [vmem:[%s4190_s17 + $0x4a8] sm:$0xff] %v2079_v1  ;;  %v2081_v35 = vmul.f32 %v3471_v18, %v4982_v21  ;;  %3492 = vpow2.f32 %v2702_v54  ;;  %v2708_v21 = vmul.f32 -1.442695, %v5084_v62  ;;  %v5112_v54 = vld [vmem:[%s4103_s30 + $0x560] sm:$0xff]  ;;  %v2711_v18 = vmul.f32 -1.442695, %v5108_v59 }
 0x17a   : > { %v3475_v25 = vpop.eup %3474  ;;  %2336 = vst [vmem:[%s4190_s17 + $0x4b0] sm:$0xff] %v2080_v63  ;;  %v2082_v57 = vmul.f32 %v3473_v22, %v4988_v24  ;;  %3494 = vpow2.f32 %v2703_v33  ;;  %v2710_v33 = vmul.f32 -1.442695, %v5105_v47  ;;  %v5121_v63 = vld [vmem:[%s4103_s30 + $0x570] sm:$0xff] }
 0x17b   : > { %v3477_v5 = vpop.eup %3476  ;;  %2337 = vst [vmem:[%s4190_s17 + $0x4b8] sm:$0xff] %v2081_v35  ;;  %v2083_v44 = vmul.f32 %v3475_v25, %v4994_v48  ;;  %3496 = vpow2.f32 %v2704_v16  ;;  %v2712_v35 = vmul.f32 -1.442695, %v5112_v54 }
 0x17c   : > { %v3479_v31 = vpop.eup %3478  ;;  %2338 = vst [vmem:[%s4190_s17 + $0x4c0] sm:$0xff] %v2082_v57  ;;  %v2084_v2 = vmul.f32 %v3477_v5, %v5000_v32  ;;  %3498 = vpow2.f32 %v2705_v40  ;;  %v2713_v57 = vmul.f32 -1.442695, %v5116_v56 }
 0x17d   : > { %v3481_v61 = vpop.eup %3480  ;;  %2339 = vst [vmem:[%s4190_s17 + $0x4c8] sm:$0xff] %v2083_v44  ;;  %v2085_v24 = vmul.f32 %v3479_v31, %v5006_v43  ;;  %3500 = vpow2.f32 %v2706_v23  ;;  %v5126_v23 = vld [vmem:[%s4103_s30 + $0x578] sm:$0xff]  ;;  %v2714_v44 = vmul.f32 -1.442695, %v5121_v63 }
 0x17e   : > { %v3483_v52 = vpop.eup %3482  ;;  %2340 = vst [vmem:[%s4190_s17 + $0x4d0] sm:$0xff] %v2084_v2  ;;  %v1318_v45 = vadd.f32 1.0, %v3481_v61  ;;  %3502 = vpow2.f32 %v2707_v11  ;;  %v5132_v11 = vld [vmem:[%s4103_s30 + $0x580] sm:$0xff]  ;;  %v2715_v2 = vmul.f32 -1.442695, %v5126_v23  ;;  %v5144_v61 = vld [vmem:[%s4103_s30 + $0x590] sm:$0xff] }
 0x17f   : > { %v3485_v26 = vpop.eup %3484  ;;  %2341 = vst [vmem:[%s4190_s17 + $0x4d8] sm:$0xff] %v2085_v24  ;;  %v1319_v48 = vadd.f32 1.0, %v3483_v52  ;;  %3504 = vpow2.f32 %v2708_v21  ;;  %v5138_v21 = vld [vmem:[%s4103_s30 + $0x588] sm:$0xff]  ;;  %v2716_v52 = vmul.f32 -1.442695, %v5132_v11 }
 0x180   : > { %v3487_v15 = vpop.eup %3486  ;;  %3506 = vrcp.f32 %v1318_v45  ;;  %v1320_v28 = vadd.f32 1.0, %v3485_v26  ;;  %v5150_v45 = vld [vmem:[%s4103_s30 + $0x598] sm:$0xff] }
 0x181   : > { %v3489_v58 = vpop.eup %3488  ;;  %3508 = vrcp.f32 %v1319_v48  ;;  %v1321_v32 = vadd.f32 1.0, %v3487_v15  ;;  %v2717_v48 = vmul.f32 -1.442695, %v5138_v21  ;;  %v5156_v15 = vld [vmem:[%s4103_s30 + $0x5a0] sm:$0xff] }
 0x182   : > { %v3491_v34 = vpop.eup %3490  ;;  %3510 = vrcp.f32 %v1320_v28  ;;  %v1322_v41 = vadd.f32 1.0, %v3489_v58  ;;  %v2718_v58 = vmul.f32 -1.442695, %v5144_v61 }
 0x183   : > { %v3493_v43 = vpop.eup %3492  ;;  %3512 = vrcp.f32 %v1321_v32  ;;  %v1323_v6 = vadd.f32 1.0, %v3491_v34  ;;  %v5162_v32 = vld [vmem:[%s4103_s30 + $0x5a8] sm:$0xff] }
 0x184   : > { %v3495_v12 = vpop.eup %3494  ;;  %3514 = vrcp.f32 %v1322_v41  ;;  %v1324_v3 = vadd.f32 1.0, %v3493_v43  ;;  %v2719_v41 = vmul.f32 -1.442695, %v5150_v45 }
 0x185   : > { %v3497_v49 = vpop.eup %3496  ;;  %3516 = vrcp.f32 %v1323_v6  ;;  %v1325_v51 = vadd.f32 1.0, %v3495_v12 }
 0x186   : > { %v3499_v30 = vpop.eup %3498  ;;  %3518 = vrcp.f32 %v1324_v3  ;;  %v1326_v19 = vadd.f32 1.0, %v3497_v49 }
 0x187   : > { %v3501_v4 = vpop.eup %3500  ;;  %3520 = vrcp.f32 %v1325_v51  ;;  %v1327_v17 = vadd.f32 1.0, %v3499_v30 }
 0x188   : > { %v3503_v39 = vpop.eup %3502  ;;  %3522 = vrcp.f32 %v1326_v19  ;;  %v1328_v46 = vadd.f32 1.0, %v3501_v4 }
 0x189   : > { %v3505_v27 = vpop.eup %3504  ;;  %3524 = vrcp.f32 %v1327_v17  ;;  %v1329_v20 = vadd.f32 1.0, %v3503_v39 }
 0x18a   : > { %v3507_v55 = vpop.eup %3506  ;;  %3526 = vrcp.f32 %v1328_v46  ;;  %v1330_v9 = vadd.f32 1.0, %v3505_v27 }
 0x18b   : > { %v3509_v1 = vpop.eup %3508  ;;  %v2086_v16 = vmul.f32 %v3507_v55, %v5024_v10  ;;  %3528 = vrcp.f32 %v1329_v20 }
 0x18c   : > { %v3511_v40 = vpop.eup %3510  ;;  %v2087_v22 = vmul.f32 %v3509_v1, %v5027_v29  ;;  %3530 = vrcp.f32 %v1330_v9 }
 0x18d   : > { %v3513_v25 = vpop.eup %3512  ;;  %2342 = vst [vmem:[%s4190_s17 + $0x4e0] sm:$0xff] %v2086_v16  ;;  %v2088_v10 = vmul.f32 %v3511_v40, %v5030_v7  ;;  %3532 = vpow2.f32 %v2709_v60 }
 0x18e   : > { %v3515_v5 = vpop.eup %3514  ;;  %2343 = vst [vmem:[%s4190_s17 + $0x4e8] sm:$0xff] %v2087_v22  ;;  %v2089_v29 = vmul.f32 %v3513_v25, %v5034_v36  ;;  %3534 = vpow2.f32 %v2710_v33  ;;  %v5180_v22 = vld [vmem:[%s4103_s30 + $0x5b0] sm:$0xff] }
 0x18f   : > { %v3517_v31 = vpop.eup %3516  ;;  %2344 = vst [vmem:[%s4190_s17 + $0x4f0] sm:$0xff] %v2088_v10  ;;  %v2090_v7 = vmul.f32 %v3515_v5, %v5038_v38  ;;  %3536 = vpow2.f32 %v2711_v18  ;;  %v5183_v10 = vld [vmem:[%s4103_s30 + $0x5b8] sm:$0xff] }
 0x190   : > { %v3519_v24 = vpop.eup %3518  ;;  %2345 = vst [vmem:[%s4190_s17 + $0x4f8] sm:$0xff] %v2089_v29  ;;  %v2091_v36 = vmul.f32 %v3517_v31, %v5043_v8  ;;  %3538 = vpow2.f32 %v2712_v35  ;;  %v5186_v29 = vld [vmem:[%s4103_s30 + $0x5c0] sm:$0xff] }
 0x191   : > { %v3521_v26 = vpop.eup %3520  ;;  %2346 = vst [vmem:[%s4190_s17 + $0x500] sm:$0xff] %v2090_v7  ;;  %v2092_v38 = vmul.f32 %v3519_v24, %v5048_v53  ;;  %3540 = vpow2.f32 %v2713_v57  ;;  %v2722_v7 = vmul.f32 -1.442695, %v5180_v22 }
 0x192   : > { %v3523_v28 = vpop.eup %3522  ;;  %2347 = vst [vmem:[%s4190_s17 + $0x508] sm:$0xff] %v2091_v36  ;;  %v2093_v8 = vmul.f32 %v3521_v26, %v5054_v13  ;;  %3542 = vpow2.f32 %v2714_v44  ;;  %v2720_v13 = vmul.f32 -1.442695, %v5156_v15  ;;  %v5194_v26 = vld [vmem:[%s4103_s30 + $0x5d0] sm:$0xff] }
 0x193   : > { %v3525_v34 = vpop.eup %3524  ;;  %2348 = vst [vmem:[%s4190_s17 + $0x510] sm:$0xff] %v2092_v38  ;;  %v2094_v53 = vmul.f32 %v3523_v28, %v5060_v14  ;;  %3544 = vpow2.f32 %v2715_v2  ;;  %v2721_v14 = vmul.f32 -1.442695, %v5162_v32  ;;  %v5190_v2 = vld [vmem:[%s4103_s30 + $0x5c8] sm:$0xff]  ;;  %v2724_v28 = vmul.f32 -1.442695, %v5186_v29 }
 0x194   : > { %v3527_v43 = vpop.eup %3526  ;;  %2349 = vst [vmem:[%s4190_s17 + $0x518] sm:$0xff] %v2093_v8  ;;  %v2095_v6 = vmul.f32 %v3525_v34, %v5066_v42  ;;  %3546 = vpow2.f32 %v2716_v52  ;;  %v2723_v52 = vmul.f32 -1.442695, %v5183_v10  ;;  %v5199_v8 = vld [vmem:[%s4103_s30 + $0x5d8] sm:$0xff] }
 0x195   : > { %v3529_v12 = vpop.eup %3528  ;;  %2350 = vst [vmem:[%s4190_s17 + $0x520] sm:$0xff] %v2094_v53  ;;  %v2096_v3 = vmul.f32 %v3527_v43, %v5072_v0  ;;  %3548 = vpow2.f32 %v2717_v48  ;;  %v2725_v53 = vmul.f32 -1.442695, %v5190_v2 }
 0x196   : > { %v3531_v49 = vpop.eup %3530  ;;  %2351 = vst [vmem:[%s4190_s17 + $0x528] sm:$0xff] %v2095_v6  ;;  %v2097_v51 = vmul.f32 %v3529_v12, %v5078_v50  ;;  %3550 = vpow2.f32 %v2718_v58  ;;  %v2726_v6 = vmul.f32 -1.442695, %v5194_v26 }
 0x197   : > { %v3533_v30 = vpop.eup %3532  ;;  %2352 = vst [vmem:[%s4190_s17 + $0x530] sm:$0xff] %v2096_v3  ;;  %v2098_v42 = vmul.f32 %v3531_v49, %v5084_v62  ;;  %3552 = vpow2.f32 %v2719_v41  ;;  %v5204_v41 = vld [vmem:[%s4103_s30 + $0x5e0] sm:$0xff]  ;;  %v2727_v3 = vmul.f32 -1.442695, %v5199_v8 }
 0x198   : > { %v3535_v19 = vpop.eup %3534  ;;  %2353 = vst [vmem:[%s4190_s17 + $0x538] sm:$0xff] %v2097_v51  ;;  %v1331_v4 = vadd.f32 1.0, %v3533_v30  ;;  %3554 = vpow2.f32 %v2720_v13  ;;  %v5210_v13 = vld [vmem:[%s4103_s30 + $0x5e8] sm:$0xff]  ;;  %v2728_v51 = vmul.f32 -1.442695, %v5204_v41  ;;  %v5222_v30 = vld [vmem:[%s4103_s30 + $0x5f8] sm:$0xff] }
 0x199   : > { %v3537_v17 = vpop.eup %3536  ;;  %2354 = vst [vmem:[%s4190_s17 + $0x540] sm:$0xff] %v2098_v42  ;;  %v1332_v0 = vadd.f32 1.0, %v3535_v19  ;;  %3556 = vpow2.f32 %v2721_v14  ;;  %v5216_v14 = vld [vmem:[%s4103_s30 + $0x5f0] sm:$0xff]  ;;  %v2729_v19 = vmul.f32 -1.442695, %v5210_v13 }
 0x19a   : > { %v3539_v39 = vpop.eup %3538  ;;  %3558 = vrcp.f32 %v1331_v4  ;;  %v1333_v46 = vadd.f32 1.0, %v3537_v17  ;;  %v5228_v4 = vld [vmem:[%s4103_s30 + $0x600] sm:$0xff] }
 0x19b   : > { %v3541_v27 = vpop.eup %3540  ;;  %3560 = vrcp.f32 %v1332_v0  ;;  %v1334_v50 = vadd.f32 1.0, %v3539_v39  ;;  %v2730_v0 = vmul.f32 -1.442695, %v5216_v14  ;;  %v5234_v39 = vld [vmem:[%s4103_s30 + $0x608] sm:$0xff] }
 0x19c   : > { %v3543_v20 = vpop.eup %3542  ;;  %3562 = vrcp.f32 %v1333_v46  ;;  %v1335_v60 = vadd.f32 1.0, %v3541_v27  ;;  %v2731_v27 = vmul.f32 -1.442695, %v5222_v30 }
 0x19d   : > { %v3545_v62 = vpop.eup %3544  ;;  %3564 = vrcp.f32 %v1334_v50  ;;  %v1336_v55 = vadd.f32 1.0, %v3543_v20  ;;  %v5240_v50 = vld [vmem:[%s4103_s30 + $0x610] sm:$0xff] }
 0x19e   : > { %v3547_v9 = vpop.eup %3546  ;;  %3566 = vrcp.f32 %v1335_v60  ;;  %v1337_v33 = vadd.f32 1.0, %v3545_v62  ;;  %v2732_v60 = vmul.f32 -1.442695, %v5228_v4 }
 0x19f   : > { %v3549_v1 = vpop.eup %3548  ;;  %3568 = vrcp.f32 %v1336_v55  ;;  %v1338_v16 = vadd.f32 1.0, %v3547_v9 }
 0x1a0   : > { %v3551_v18 = vpop.eup %3550  ;;  %3570 = vrcp.f32 %v1337_v33  ;;  %v1339_v40 = vadd.f32 1.0, %v3549_v1 }
 0x1a1   : > { %v3553_v35 = vpop.eup %3552  ;;  %3572 = vrcp.f32 %v1338_v16  ;;  %v1340_v25 = vadd.f32 1.0, %v3551_v18 }
 0x1a2   : > { %v3555_v57 = vpop.eup %3554  ;;  %3574 = vrcp.f32 %v1339_v40  ;;  %v1341_v5 = vadd.f32 1.0, %v3553_v35 }
 0x1a3   : > { %v3557_v44 = vpop.eup %3556  ;;  %3576 = vrcp.f32 %v1340_v25  ;;  %v1342_v31 = vadd.f32 1.0, %v3555_v57 }
 0x1a4   : > { %v3559_v24 = vpop.eup %3558  ;;  %3578 = vrcp.f32 %v1341_v5  ;;  %v1343_v36 = vadd.f32 1.0, %v3557_v44 }
 0x1a5   : > { %v3561_v38 = vpop.eup %3560  ;;  %v2099_v48 = vmul.f32 %v3559_v24, %v5102_v37  ;;  %3580 = vrcp.f32 %v1342_v31 }
 0x1a6   : > { %v3563_v58 = vpop.eup %3562  ;;  %v2100_v34 = vmul.f32 %v3561_v38, %v5105_v47  ;;  %3582 = vrcp.f32 %v1343_v36 }
 0x1a7   : > { %v3565_v43 = vpop.eup %3564  ;;  %2355 = vst [vmem:[%s4190_s17 + $0x548] sm:$0xff] %v2099_v48  ;;  %v2101_v37 = vmul.f32 %v3563_v58, %v5108_v59  ;;  %3584 = vpow2.f32 %v2722_v7 }
 0x1a8   : > { %v3567_v12 = vpop.eup %3566  ;;  %2356 = vst [vmem:[%s4190_s17 + $0x550] sm:$0xff] %v2100_v34  ;;  %v2102_v47 = vmul.f32 %v3565_v43, %v5112_v54  ;;  %3586 = vpow2.f32 %v2723_v52  ;;  %v5258_v34 = vld [vmem:[%s4103_s30 + $0x618] sm:$0xff] }
 0x1a9   : > { %v3569_v49 = vpop.eup %3568  ;;  %2357 = vst [vmem:[%s4190_s17 + $0x558] sm:$0xff] %v2101_v37  ;;  %v2103_v59 = vmul.f32 %v3567_v12, %v5116_v56  ;;  %3588 = vpow2.f32 %v2724_v28  ;;  %v5261_v37 = vld [vmem:[%s4103_s30 + $0x620] sm:$0xff] }
 0x1aa   : > { %v3571_v42 = vpop.eup %3570  ;;  %2358 = vst [vmem:[%s4190_s17 + $0x560] sm:$0xff] %v2102_v47  ;;  %v2104_v54 = vmul.f32 %v3569_v49, %v5121_v63  ;;  %3590 = vpow2.f32 %v2725_v53  ;;  %v5264_v47 = vld [vmem:[%s4103_s30 + $0x628] sm:$0xff] }
 0x1ab   : > { %v3573_v17 = vpop.eup %3572  ;;  %2359 = vst [vmem:[%s4190_s17 + $0x568] sm:$0xff] %v2103_v59  ;;  %v2105_v56 = vmul.f32 %v3571_v42, %v5126_v23  ;;  %3592 = vpow2.f32 %v2726_v6  ;;  %v2735_v59 = vmul.f32 -1.442695, %v5258_v34 }
 0x1ac   : > { %v3575_v46 = vpop.eup %3574  ;;  %2360 = vst [vmem:[%s4190_s17 + $0x570] sm:$0xff] %v2104_v54  ;;  %v2106_v63 = vmul.f32 %v3573_v17, %v5132_v11  ;;  %3594 = vpow2.f32 %v2727_v3  ;;  %v2733_v11 = vmul.f32 -1.442695, %v5234_v39  ;;  %v5272_v17 = vld [vmem:[%s4103_s30 + $0x638] sm:$0xff] }
 0x1ad   : > { %v3577_v20 = vpop.eup %3576  ;;  %2361 = vst [vmem:[%s4190_s17 + $0x578] sm:$0xff] %v2105_v56  ;;  %v2107_v23 = vmul.f32 %v3575_v46, %v5138_v21  ;;  %3596 = vpow2.f32 %v2728_v51  ;;  %v2734_v21 = vmul.f32 -1.442695, %v5240_v50  ;;  %v5268_v51 = vld [vmem:[%s4103_s30 + $0x630] sm:$0xff]  ;;  %v2737_v46 = vmul.f32 -1.442695, %v5264_v47 }
 0x1ae   : > { %v3579_v62 = vpop.eup %3578  ;;  %2362 = vst [vmem:[%s4190_s17 + $0x580] sm:$0xff] %v2106_v63  ;;  %v2108_v55 = vmul.f32 %v3577_v20, %v5144_v61  ;;  %3598 = vpow2.f32 %v2729_v19  ;;  %v2736_v19 = vmul.f32 -1.442695, %v5261_v37  ;;  %v5277_v63 = vld [vmem:[%s4103_s30 + $0x640] sm:$0xff] }
 0x1af   : > { %v3581_v9 = vpop.eup %3580  ;;  %2363 = vst [vmem:[%s4190_s17 + $0x588] sm:$0xff] %v2107_v23  ;;  %v2109_v33 = vmul.f32 %v3579_v62, %v5150_v45  ;;  %3600 = vpow2.f32 %v2730_v0  ;;  %v2738_v23 = vmul.f32 -1.442695, %v5268_v51 }
 0x1b0   : > { %v3583_v1 = vpop.eup %3582  ;;  %2364 = vst [vmem:[%s4190_s17 + $0x590] sm:$0xff] %v2108_v55  ;;  %v2110_v16 = vmul.f32 %v3581_v9, %v5156_v15  ;;  %3602 = vpow2.f32 %v2731_v27  ;;  %v2739_v55 = vmul.f32 -1.442695, %v5272_v17 }
 0x1b1   : > { %v3585_v18 = vpop.eup %3584  ;;  %2365 = vst [vmem:[%s4190_s17 + $0x598] sm:$0xff] %v2109_v33  ;;  %v2111_v61 = vmul.f32 %v3583_v1, %v5162_v32  ;;  %3604 = vpow2.f32 %v2732_v60  ;;  %v5282_v60 = vld [vmem:[%s4103_s30 + $0x648] sm:$0xff]  ;;  %v2740_v33 = vmul.f32 -1.442695, %v5277_v63 }
 0x1b2   : > { %v3587_v40 = vpop.eup %3586  ;;  %2366 = vst [vmem:[%s4190_s17 + $0x5a0] sm:$0xff] %v2110_v16  ;;  %v1344_v35 = vadd.f32 1.0, %v3585_v18  ;;  %3606 = vpow2.f32 %v2733_v11  ;;  %v5288_v11 = vld [vmem:[%s4103_s30 + $0x650] sm:$0xff]  ;;  %v2741_v16 = vmul.f32 -1.442695, %v5282_v60  ;;  %v5300_v18 = vld [vmem:[%s4103_s30 + $0x660] sm:$0xff] }
 0x1b3   : > { %v3589_v25 = vpop.eup %3588  ;;  %2367 = vst [vmem:[%s4190_s17 + $0x5a8] sm:$0xff] %v2111_v61  ;;  %v1345_v45 = vadd.f32 1.0, %v3587_v40  ;;  %3608 = vpow2.f32 %v2734_v21  ;;  %v5294_v21 = vld [vmem:[%s4103_s30 + $0x658] sm:$0xff]  ;;  %v2742_v40 = vmul.f32 -1.442695, %v5288_v11 }
 0x1b4   : > { %v3591_v57 = vpop.eup %3590  ;;  %3610 = vrcp.f32 %v1344_v35  ;;  %v1346_v5 = vadd.f32 1.0, %v3589_v25  ;;  %v5306_v35 = vld [vmem:[%s4103_s30 + $0x668] sm:$0xff] }
 0x1b5   : > { %v3593_v44 = vpop.eup %3592  ;;  %3612 = vrcp.f32 %v1345_v45  ;;  %v1347_v15 = vadd.f32 1.0, %v3591_v57  ;;  %v2743_v45 = vmul.f32 -1.442695, %v5294_v21  ;;  %v5312_v57 = vld [vmem:[%s4103_s30 + $0x670] sm:$0xff] }
 0x1b6   : > { %v3595_v31 = vpop.eup %3594  ;;  %3614 = vrcp.f32 %v1346_v5  ;;  %v1348_v7 = vadd.f32 1.0, %v3593_v44  ;;  %v2744_v44 = vmul.f32 -1.442695, %v5300_v18 }
 0x1b7   : > { %v3597_v32 = vpop.eup %3596  ;;  %3616 = vrcp.f32 %v1347_v15  ;;  %v1349_v24 = vadd.f32 1.0, %v3595_v31  ;;  %v5318_v15 = vld [vmem:[%s4103_s30 + $0x678] sm:$0xff] }
 0x1b8   : > { %v3599_v36 = vpop.eup %3598  ;;  %3618 = vrcp.f32 %v1348_v7  ;;  %v1350_v52 = vadd.f32 1.0, %v3597_v32  ;;  %v2745_v7 = vmul.f32 -1.442695, %v5306_v35 }
 0x1b9   : > { %v3601_v38 = vpop.eup %3600  ;;  %3620 = vrcp.f32 %v1349_v24  ;;  %v1351_v48 = vadd.f32 1.0, %v3599_v36 }
 0x1ba   : > { %v3603_v28 = vpop.eup %3602  ;;  %3622 = vrcp.f32 %v1350_v52  ;;  %v1352_v58 = vadd.f32 1.0, %v3601_v38 }
 0x1bb   : > { %v3605_v53 = vpop.eup %3604  ;;  %3624 = vrcp.f32 %v1351_v48  ;;  %v1353_v43 = vadd.f32 1.0, %v3603_v28 }
 0x1bc   : > { %v3607_v6 = vpop.eup %3606  ;;  %3626 = vrcp.f32 %v1352_v58  ;;  %v1354_v12 = vadd.f32 1.0, %v3605_v53 }
 0x1bd   : > { %v3609_v3 = vpop.eup %3608  ;;  %3628 = vrcp.f32 %v1353_v43  ;;  %v1355_v49 = vadd.f32 1.0, %v3607_v6 }
 0x1be   : > { %v3611_v42 = vpop.eup %3610  ;;  %3630 = vrcp.f32 %v1354_v12  ;;  %v1356_v54 = vadd.f32 1.0, %v3609_v3 }
 0x1bf   : > { %v3613_v56 = vpop.eup %3612  ;;  %v2112_v0 = vmul.f32 %v3611_v42, %v5180_v22  ;;  %3632 = vrcp.f32 %v1355_v49 }
 0x1c0   : > { %v3615_v27 = vpop.eup %3614  ;;  %v2113_v20 = vmul.f32 %v3613_v56, %v5183_v10  ;;  %3634 = vrcp.f32 %v1356_v54 }
 0x1c1   : > { %v3617_v62 = vpop.eup %3616  ;;  %2368 = vst [vmem:[%s4190_s17 + $0x5b0] sm:$0xff] %v2112_v0  ;;  %v2114_v22 = vmul.f32 %v3615_v27, %v5186_v29  ;;  %3636 = vpow2.f32 %v2735_v59 }
 0x1c2   : > { %v3619_v9 = vpop.eup %3618  ;;  %2369 = vst [vmem:[%s4190_s17 + $0x5b8] sm:$0xff] %v2113_v20  ;;  %v2115_v10 = vmul.f32 %v3617_v62, %v5190_v2  ;;  %3638 = vpow2.f32 %v2736_v19  ;;  %v5336_v20 = vld [vmem:[%s4103_s30 + $0x680] sm:$0xff] }
 0x1c3   : > { %v3621_v1 = vpop.eup %3620  ;;  %2370 = vst [vmem:[%s4190_s17 + $0x5c0] sm:$0xff] %v2114_v22  ;;  %v2116_v29 = vmul.f32 %v3619_v9, %v5194_v26  ;;  %3640 = vpow2.f32 %v2737_v46  ;;  %v5339_v22 = vld [vmem:[%s4103_s30 + $0x688] sm:$0xff] }
 0x1c4   : > { %v3623_v61 = vpop.eup %3622  ;;  %2371 = vst [vmem:[%s4190_s17 + $0x5c8] sm:$0xff] %v2115_v10  ;;  %v2117_v2 = vmul.f32 %v3621_v1, %v5199_v8  ;;  %3642 = vpow2.f32 %v2738_v23  ;;  %v5342_v10 = vld [vmem:[%s4103_s30 + $0x690] sm:$0xff] }
 0x1c5   : > { %v3625_v25 = vpop.eup %3624  ;;  %2372 = vst [vmem:[%s4190_s17 + $0x5d0] sm:$0xff] %v2116_v29  ;;  %v2118_v26 = vmul.f32 %v3623_v61, %v5204_v41  ;;  %3644 = vpow2.f32 %v2739_v55  ;;  %v2748_v29 = vmul.f32 -1.442695, %v5336_v20 }
 0x1c6   : > { %v3627_v5 = vpop.eup %3626  ;;  %2373 = vst [vmem:[%s4190_s17 + $0x5d8] sm:$0xff] %v2117_v2  ;;  %v2119_v8 = vmul.f32 %v3625_v25, %v5210_v13  ;;  %3646 = vpow2.f32 %v2740_v33  ;;  %v2746_v13 = vmul.f32 -1.442695, %v5312_v57  ;;  %v5350_v25 = vld [vmem:[%s4103_s30 + $0x6a0] sm:$0xff] }
 0x1c7   : > { %v3629_v31 = vpop.eup %3628  ;;  %2374 = vst [vmem:[%s4190_s17 + $0x5e0] sm:$0xff] %v2118_v26  ;;  %v2120_v41 = vmul.f32 %v3627_v5, %v5216_v14  ;;  %3648 = vpow2.f32 %v2741_v16  ;;  %v2747_v14 = vmul.f32 -1.442695, %v5318_v15  ;;  %v5346_v16 = vld [vmem:[%s4103_s30 + $0x698] sm:$0xff]  ;;  %v2750_v5 = vmul.f32 -1.442695, %v5342_v10 }
 0x1c8   : > { %v3631_v32 = vpop.eup %3630  ;;  %2375 = vst [vmem:[%s4190_s17 + $0x5e8] sm:$0xff] %v2119_v8  ;;  %v2121_v24 = vmul.f32 %v3629_v31, %v5222_v30  ;;  %3650 = vpow2.f32 %v2742_v40  ;;  %v2749_v40 = vmul.f32 -1.442695, %v5339_v22  ;;  %v5355_v8 = vld [vmem:[%s4103_s30 + $0x6a8] sm:$0xff] }
 0x1c9   : > { %v3633_v36 = vpop.eup %3632  ;;  %2376 = vst [vmem:[%s4190_s17 + $0x5f0] sm:$0xff] %v2120_v41  ;;  %v2122_v52 = vmul.f32 %v3631_v32, %v5228_v4  ;;  %3652 = vpow2.f32 %v2743_v45  ;;  %v2751_v41 = vmul.f32 -1.442695, %v5346_v16 }
 0x1ca   : > { %v3635_v38 = vpop.eup %3634  ;;  %2377 = vst [vmem:[%s4190_s17 + $0x5f8] sm:$0xff] %v2121_v24  ;;  %v2123_v48 = vmul.f32 %v3633_v36, %v5234_v39  ;;  %3654 = vpow2.f32 %v2744_v44  ;;  %v2752_v24 = vmul.f32 -1.442695, %v5350_v25 }
 0x1cb   : > { %v3637_v28 = vpop.eup %3636  ;;  %2378 = vst [vmem:[%s4190_s17 + $0x600] sm:$0xff] %v2122_v52  ;;  %v2124_v30 = vmul.f32 %v3635_v38, %v5240_v50  ;;  %3656 = vpow2.f32 %v2745_v7  ;;  %v5360_v7 = vld [vmem:[%s4103_s30 + $0x6b0] sm:$0xff]  ;;  %v2753_v52 = vmul.f32 -1.442695, %v5355_v8 }
 0x1cc   : > { %v3639_v58 = vpop.eup %3638  ;;  %2379 = vst [vmem:[%s4190_s17 + $0x608] sm:$0xff] %v2123_v48  ;;  %v1357_v53 = vadd.f32 1.0, %v3637_v28  ;;  %3658 = vpow2.f32 %v2746_v13  ;;  %v5366_v13 = vld [vmem:[%s4103_s30 + $0x6b8] sm:$0xff]  ;;  %v2754_v48 = vmul.f32 -1.442695, %v5360_v7  ;;  %v5378_v28 = vld [vmem:[%s4103_s30 + $0x6c8] sm:$0xff] }
 0x1cd   : > { %v3641_v43 = vpop.eup %3640  ;;  %2380 = vst [vmem:[%s4190_s17 + $0x610] sm:$0xff] %v2124_v30  ;;  %v1358_v4 = vadd.f32 1.0, %v3639_v58  ;;  %3660 = vpow2.f32 %v2747_v14  ;;  %v5372_v14 = vld [vmem:[%s4103_s30 + $0x6c0] sm:$0xff]  ;;  %v2755_v58 = vmul.f32 -1.442695, %v5366_v13 }
 0x1ce   : > { %v3643_v6 = vpop.eup %3642  ;;  %3662 = vrcp.f32 %v1357_v53  ;;  %v1359_v12 = vadd.f32 1.0, %v3641_v43  ;;  %v5384_v53 = vld [vmem:[%s4103_s30 + $0x6d0] sm:$0xff] }
 0x1cf   : > { %v3645_v3 = vpop.eup %3644  ;;  %3664 = vrcp.f32 %v1358_v4  ;;  %v1360_v39 = vadd.f32 1.0, %v3643_v6  ;;  %v2756_v4 = vmul.f32 -1.442695, %v5372_v14  ;;  %v5390_v6 = vld [vmem:[%s4103_s30 + $0x6d8] sm:$0xff] }
 0x1d0   : > { %v3647_v49 = vpop.eup %3646  ;;  %3666 = vrcp.f32 %v1359_v12  ;;  %v1361_v59 = vadd.f32 1.0, %v3645_v3  ;;  %v2757_v3 = vmul.f32 -1.442695, %v5378_v28 }
 0x1d1   : > { %v3649_v50 = vpop.eup %3648  ;;  %3668 = vrcp.f32 %v1360_v39  ;;  %v1362_v42 = vadd.f32 1.0, %v3647_v49  ;;  %v5396_v39 = vld [vmem:[%s4103_s30 + $0x6e0] sm:$0xff] }
 0x1d2   : > { %v3651_v54 = vpop.eup %3650  ;;  %3670 = vrcp.f32 %v1361_v59  ;;  %v1363_v19 = vadd.f32 1.0, %v3649_v50  ;;  %v2758_v59 = vmul.f32 -1.442695, %v5384_v53 }
 0x1d3   : > { %v3653_v56 = vpop.eup %3652  ;;  %3672 = vrcp.f32 %v1362_v42  ;;  %v1364_v0 = vadd.f32 1.0, %v3651_v54 }
 0x1d4   : > { %v3655_v46 = vpop.eup %3654  ;;  %3674 = vrcp.f32 %v1363_v19  ;;  %v1365_v27 = vadd.f32 1.0, %v3653_v56 }
 0x1d5   : > { %v3657_v23 = vpop.eup %3656  ;;  %3676 = vrcp.f32 %v1364_v0  ;;  %v1366_v62 = vadd.f32 1.0, %v3655_v46 }
 0x1d6   : > { %v3659_v55 = vpop.eup %3658  ;;  %3678 = vrcp.f32 %v1365_v27  ;;  %v1367_v9 = vadd.f32 1.0, %v3657_v23 }
 0x1d7   : > { %v3661_v33 = vpop.eup %3660  ;;  %3680 = vrcp.f32 %v1366_v62  ;;  %v1368_v1 = vadd.f32 1.0, %v3659_v55 }
 0x1d8   : > { %v3663_v61 = vpop.eup %3662  ;;  %3682 = vrcp.f32 %v1367_v9  ;;  %v1369_v2 = vadd.f32 1.0, %v3661_v33 }
 0x1d9   : > { %v3665_v26 = vpop.eup %3664  ;;  %v2125_v45 = vmul.f32 %v3663_v61, %v5258_v34  ;;  %3684 = vrcp.f32 %v1368_v1 }
 0x1da   : > { %v3667_v44 = vpop.eup %3666  ;;  %v2126_v31 = vmul.f32 %v3665_v26, %v5261_v37  ;;  %3686 = vrcp.f32 %v1369_v2 }
 0x1db   : > { %v3669_v32 = vpop.eup %3668  ;;  %2381 = vst [vmem:[%s4190_s17 + $0x618] sm:$0xff] %v2125_v45  ;;  %v2127_v34 = vmul.f32 %v3667_v44, %v5264_v47  ;;  %3688 = vpow2.f32 %v2748_v29 }
 0x1dc   : > { %v3671_v36 = vpop.eup %3670  ;;  %2382 = vst [vmem:[%s4190_s17 + $0x620] sm:$0xff] %v2126_v31  ;;  %v2128_v37 = vmul.f32 %v3669_v32, %v5268_v51  ;;  %3690 = vpow2.f32 %v2749_v40  ;;  %v5414_v31 = vld [vmem:[%s4103_s30 + $0x6e8] sm:$0xff] }
 0x1dd   : > { %v3673_v38 = vpop.eup %3672  ;;  %2383 = vst [vmem:[%s4190_s17 + $0x628] sm:$0xff] %v2127_v34  ;;  %v2129_v47 = vmul.f32 %v3671_v36, %v5272_v17  ;;  %3692 = vpow2.f32 %v2750_v5  ;;  %v5417_v34 = vld [vmem:[%s4103_s30 + $0x6f0] sm:$0xff] }
 0x1de   : > { %v3675_v30 = vpop.eup %3674  ;;  %2384 = vst [vmem:[%s4190_s17 + $0x630] sm:$0xff] %v2128_v37  ;;  %v2130_v51 = vmul.f32 %v3673_v38, %v5277_v63  ;;  %3694 = vpow2.f32 %v2751_v41  ;;  %v5420_v37 = vld [vmem:[%s4103_s30 + $0x6f8] sm:$0xff] }
 0x1df   : > { %v3677_v43 = vpop.eup %3676  ;;  %2385 = vst [vmem:[%s4190_s17 + $0x638] sm:$0xff] %v2129_v47  ;;  %v2131_v17 = vmul.f32 %v3675_v30, %v5282_v60  ;;  %3696 = vpow2.f32 %v2752_v24  ;;  %v2761_v47 = vmul.f32 -1.442695, %v5414_v31 }
 0x1e0   : > { %v3679_v12 = vpop.eup %3678  ;;  %2386 = vst [vmem:[%s4190_s17 + $0x640] sm:$0xff] %v2130_v51  ;;  %v2132_v63 = vmul.f32 %v3677_v43, %v5288_v11  ;;  %3698 = vpow2.f32 %v2753_v52  ;;  %v2759_v11 = vmul.f32 -1.442695, %v5390_v6  ;;  %v5428_v43 = vld [vmem:[%s4103_s30 + $0x708] sm:$0xff] }
 0x1e1   : > { %v3681_v49 = vpop.eup %3680  ;;  %2387 = vst [vmem:[%s4190_s17 + $0x648] sm:$0xff] %v2131_v17  ;;  %v2133_v60 = vmul.f32 %v3679_v12, %v5294_v21  ;;  %3700 = vpow2.f32 %v2754_v48  ;;  %v2760_v21 = vmul.f32 -1.442695, %v5396_v39  ;;  %v5424_v48 = vld [vmem:[%s4103_s30 + $0x700] sm:$0xff]  ;;  %v2763_v12 = vmul.f32 -1.442695, %v5420_v37 }
 0x1e2   : > { %v3683_v50 = vpop.eup %3682  ;;  %2388 = vst [vmem:[%s4190_s17 + $0x650] sm:$0xff] %v2132_v63  ;;  %v2134_v42 = vmul.f32 %v3681_v49, %v5300_v18  ;;  %3702 = vpow2.f32 %v2755_v58  ;;  %v2762_v58 = vmul.f32 -1.442695, %v5417_v34  ;;  %v5433_v63 = vld [vmem:[%s4103_s30 + $0x710] sm:$0xff] }
 0x1e3   : > { %v3685_v54 = vpop.eup %3684  ;;  %2389 = vst [vmem:[%s4190_s17 + $0x658] sm:$0xff] %v2133_v60  ;;  %v2135_v19 = vmul.f32 %v3683_v50, %v5306_v35  ;;  %3704 = vpow2.f32 %v2756_v4  ;;  %v2764_v60 = vmul.f32 -1.442695, %v5424_v48 }
 0x1e4   : > { %v3687_v56 = vpop.eup %3686  ;;  %2390 = vst [vmem:[%s4190_s17 + $0x660] sm:$0xff] %v2134_v42  ;;  %v2136_v0 = vmul.f32 %v3685_v54, %v5312_v57  ;;  %3706 = vpow2.f32 %v2757_v3  ;;  %v2765_v42 = vmul.f32 -1.442695, %v5428_v43 }
 0x1e5   : > { %v3689_v46 = vpop.eup %3688  ;;  %2391 = vst [vmem:[%s4190_s17 + $0x668] sm:$0xff] %v2135_v19  ;;  %v2137_v18 = vmul.f32 %v3687_v56, %v5318_v15  ;;  %3708 = vpow2.f32 %v2758_v59  ;;  %v5438_v59 = vld [vmem:[%s4103_s30 + $0x718] sm:$0xff]  ;;  %v2766_v19 = vmul.f32 -1.442695, %v5433_v63 }
 0x1e6   : > { %v3691_v27 = vpop.eup %3690  ;;  %2392 = vst [vmem:[%s4190_s17 + $0x670] sm:$0xff] %v2136_v0  ;;  %v1370_v23 = vadd.f32 1.0, %v3689_v46  ;;  %3710 = vpow2.f32 %v2759_v11  ;;  %v5444_v11 = vld [vmem:[%s4103_s30 + $0x720] sm:$0xff]  ;;  %v2767_v0 = vmul.f32 -1.442695, %v5438_v59  ;;  %v5456_v46 = vld [vmem:[%s4103_s30 + $0x730] sm:$0xff] }
 0x1e7   : > { %v3693_v62 = vpop.eup %3692  ;;  %2393 = vst [vmem:[%s4190_s17 + $0x678] sm:$0xff] %v2137_v18  ;;  %v1371_v35 = vadd.f32 1.0, %v3691_v27  ;;  %3712 = vpow2.f32 %v2760_v21  ;;  %v5450_v21 = vld [vmem:[%s4103_s30 + $0x728] sm:$0xff]  ;;  %v2768_v27 = vmul.f32 -1.442695, %v5444_v11 }
 0x1e8   : > { %v3695_v55 = vpop.eup %3694  ;;  %3714 = vrcp.f32 %v1370_v23  ;;  %v1372_v9 = vadd.f32 1.0, %v3693_v62  ;;  %v5462_v23 = vld [vmem:[%s4103_s30 + $0x738] sm:$0xff] }
 0x1e9   : > { %v3697_v33 = vpop.eup %3696  ;;  %3716 = vrcp.f32 %v1371_v35  ;;  %v1373_v57 = vadd.f32 1.0, %v3695_v55  ;;  %v2769_v35 = vmul.f32 -1.442695, %v5450_v21  ;;  %v5468_v55 = vld [vmem:[%s4103_s30 + $0x740] sm:$0xff] }
 0x1ea   : > { %v3699_v1 = vpop.eup %3698  ;;  %3718 = vrcp.f32 %v1372_v9  ;;  %v1374_v29 = vadd.f32 1.0, %v3697_v33  ;;  %v2770_v33 = vmul.f32 -1.442695, %v5456_v46 }
 0x1eb   : > { %v3701_v15 = vpop.eup %3700  ;;  %3720 = vrcp.f32 %v1373_v57  ;;  %v1375_v61 = vadd.f32 1.0, %v3699_v1  ;;  %v5474_v57 = vld [vmem:[%s4103_s30 + $0x748] sm:$0xff] }
 0x1ec   : > { %v3703_v2 = vpop.eup %3702  ;;  %3722 = vrcp.f32 %v1374_v29  ;;  %v1376_v40 = vadd.f32 1.0, %v3701_v15  ;;  %v2771_v29 = vmul.f32 -1.442695, %v5462_v23 }
 0x1ed   : > { %v3705_v26 = vpop.eup %3704  ;;  %3724 = vrcp.f32 %v1375_v61  ;;  %v1377_v45 = vadd.f32 1.0, %v3703_v2 }
 0x1ee   : > { %v3707_v5 = vpop.eup %3706  ;;  %3726 = vrcp.f32 %v1376_v40  ;;  %v1378_v44 = vadd.f32 1.0, %v3705_v26 }
 0x1ef   : > { %v3709_v41 = vpop.eup %3708  ;;  %3728 = vrcp.f32 %v1377_v45  ;;  %v1379_v32 = vadd.f32 1.0, %v3707_v5 }
 0x1f0   : > { %v3711_v24 = vpop.eup %3710  ;;  %3730 = vrcp.f32 %v1378_v44  ;;  %v1380_v36 = vadd.f32 1.0, %v3709_v41 }
 0x1f1   : > { %v3713_v52 = vpop.eup %3712  ;;  %3732 = vrcp.f32 %v1379_v32  ;;  %v1381_v38 = vadd.f32 1.0, %v3711_v24 }
 0x1f2   : > { %v3715_v30 = vpop.eup %3714  ;;  %3734 = vrcp.f32 %v1380_v36  ;;  %v1382_v51 = vadd.f32 1.0, %v3713_v52 }
 0x1f3   : > { %v3717_v17 = vpop.eup %3716  ;;  %v2138_v4 = vmul.f32 %v3715_v30, %v5336_v20  ;;  %3736 = vrcp.f32 %v1381_v38 }
 0x1f4   : > { %v3719_v3 = vpop.eup %3718  ;;  %v2139_v49 = vmul.f32 %v3717_v17, %v5339_v22  ;;  %3738 = vrcp.f32 %v1382_v51 }
 0x1f5   : > { %v3721_v50 = vpop.eup %3720  ;;  %2394 = vst [vmem:[%s4190_s17 + $0x680] sm:$0xff] %v2138_v4  ;;  %v2140_v20 = vmul.f32 %v3719_v3, %v5342_v10  ;;  %3740 = vpow2.f32 %v2761_v47 }
 0x1f6   : > { %v3723_v54 = vpop.eup %3722  ;;  %2395 = vst [vmem:[%s4190_s17 + $0x688] sm:$0xff] %v2139_v49  ;;  %v2141_v22 = vmul.f32 %v3721_v50, %v5346_v16  ;;  %3742 = vpow2.f32 %v2762_v58  ;;  %v5492_v49 = vld [vmem:[%s4103_s30 + $0x750] sm:$0xff] }
 0x1f7   : > { %v3725_v56 = vpop.eup %3724  ;;  %2396 = vst [vmem:[%s4190_s17 + $0x690] sm:$0xff] %v2140_v20  ;;  %v2142_v10 = vmul.f32 %v3723_v54, %v5350_v25  ;;  %3744 = vpow2.f32 %v2763_v12  ;;  %v5495_v20 = vld [vmem:[%s4103_s30 + $0x758] sm:$0xff] }
 0x1f8   : > { %v3727_v18 = vpop.eup %3726  ;;  %2397 = vst [vmem:[%s4190_s17 + $0x698] sm:$0xff] %v2141_v22  ;;  %v2143_v16 = vmul.f32 %v3725_v56, %v5355_v8  ;;  %3746 = vpow2.f32 %v2764_v60  ;;  %v5498_v22 = vld [vmem:[%s4103_s30 + $0x760] sm:$0xff] }
 0x1f9   : > { %v3729_v62 = vpop.eup %3728  ;;  %2398 = vst [vmem:[%s4190_s17 + $0x6a0] sm:$0xff] %v2142_v10  ;;  %v2144_v25 = vmul.f32 %v3727_v18, %v5360_v7  ;;  %3748 = vpow2.f32 %v2765_v42  ;;  %v2774_v10 = vmul.f32 -1.442695, %v5492_v49 }
 0x1fa   : > { %v3731_v9 = vpop.eup %3730  ;;  %2399 = vst [vmem:[%s4190_s17 + $0x6a8] sm:$0xff] %v2143_v16  ;;  %v2145_v8 = vmul.f32 %v3729_v62, %v5366_v13  ;;  %3750 = vpow2.f32 %v2766_v19  ;;  %v2772_v13 = vmul.f32 -1.442695, %v5468_v55  ;;  %v5506_v62 = vld [vmem:[%s4103_s30 + $0x770] sm:$0xff] }
 0x1fb   : > { %v3733_v1 = vpop.eup %3732  ;;  %2400 = vst [vmem:[%s4190_s17 + $0x6b0] sm:$0xff] %v2144_v25  ;;  %v2146_v7 = vmul.f32 %v3731_v9, %v5372_v14  ;;  %3752 = vpow2.f32 %v2767_v0  ;;  %v2773_v14 = vmul.f32 -1.442695, %v5474_v57  ;;  %v5502_v0 = vld [vmem:[%s4103_s30 + $0x768] sm:$0xff]  ;;  %v2776_v9 = vmul.f32 -1.442695, %v5498_v22 }
 0x1fc   : > { %v3735_v15 = vpop.eup %3734  ;;  %2401 = vst [vmem:[%s4190_s17 + $0x6b8] sm:$0xff] %v2145_v8  ;;  %v2147_v61 = vmul.f32 %v3733_v1, %v5378_v28  ;;  %3754 = vpow2.f32 %v2768_v27  ;;  %v2775_v27 = vmul.f32 -1.442695, %v5495_v20  ;;  %v5511_v8 = vld [vmem:[%s4103_s30 + $0x778] sm:$0xff] }
 0x1fd   : > { %v3737_v2 = vpop.eup %3736  ;;  %2402 = vst [vmem:[%s4190_s17 + $0x6c0] sm:$0xff] %v2146_v7  ;;  %v2148_v40 = vmul.f32 %v3735_v15, %v5384_v53  ;;  %3756 = vpow2.f32 %v2769_v35  ;;  %v2777_v7 = vmul.f32 -1.442695, %v5502_v0 }
 0x1fe   : > { %v3739_v26 = vpop.eup %3738  ;;  %2403 = vst [vmem:[%s4190_s17 + $0x6c8] sm:$0xff] %v2147_v61  ;;  %v2149_v45 = vmul.f32 %v3737_v2, %v5390_v6  ;;  %3758 = vpow2.f32 %v2770_v33  ;;  %v2778_v61 = vmul.f32 -1.442695, %v5506_v62 }
 0x1ff   : > { %v3741_v5 = vpop.eup %3740  ;;  %2404 = vst [vmem:[%s4190_s17 + $0x6d0] sm:$0xff] %v2148_v40  ;;  %v2150_v28 = vmul.f32 %v3739_v26, %v5396_v39  ;;  %3760 = vpow2.f32 %v2771_v29  ;;  %v5516_v29 = vld [vmem:[%s4103_s30 + $0x780] sm:$0xff]  ;;  %v2779_v40 = vmul.f32 -1.442695, %v5511_v8 }
 0x200   : > { %v3743_v44 = vpop.eup %3742  ;;  %2405 = vst [vmem:[%s4190_s17 + $0x6d8] sm:$0xff] %v2149_v45  ;;  %v1383_v41 = vadd.f32 1.0, %v3741_v5  ;;  %3762 = vpow2.f32 %v2772_v13  ;;  %v5522_v13 = vld [vmem:[%s4103_s30 + $0x788] sm:$0xff]  ;;  %v2780_v45 = vmul.f32 -1.442695, %v5516_v29  ;;  %v5534_v5 = vld [vmem:[%s4103_s30 + $0x798] sm:$0xff] }
 0x201   : > { %v3745_v32 = vpop.eup %3744  ;;  %2406 = vst [vmem:[%s4190_s17 + $0x6e0] sm:$0xff] %v2150_v28  ;;  %v1384_v53 = vadd.f32 1.0, %v3743_v44  ;;  %3764 = vpow2.f32 %v2773_v14  ;;  %v5528_v14 = vld [vmem:[%s4103_s30 + $0x790] sm:$0xff]  ;;  %v2781_v44 = vmul.f32 -1.442695, %v5522_v13 }
 0x202   : > { %v3747_v24 = vpop.eup %3746  ;;  %3766 = vrcp.f32 %v1383_v41  ;;  %v1385_v36 = vadd.f32 1.0, %v3745_v32  ;;  %v5540_v41 = vld [vmem:[%s4103_s30 + $0x7a0] sm:$0xff] }
 0x203   : > { %v3749_v52 = vpop.eup %3748  ;;  %3768 = vrcp.f32 %v1384_v53  ;;  %v1386_v6 = vadd.f32 1.0, %v3747_v24  ;;  %v2782_v53 = vmul.f32 -1.442695, %v5528_v14  ;;  %v5546_v24 = vld [vmem:[%s4103_s30 + $0x7a8] sm:$0xff] }
 0x204   : > { %v3751_v38 = vpop.eup %3750  ;;  %3770 = vrcp.f32 %v1385_v36  ;;  %v1387_v47 = vadd.f32 1.0, %v3749_v52  ;;  %v2783_v52 = vmul.f32 -1.442695, %v5534_v5 }
 0x205   : > { %v3753_v39 = vpop.eup %3752  ;;  %3772 = vrcp.f32 %v1386_v6  ;;  %v1388_v30 = vadd.f32 1.0, %v3751_v38  ;;  %v5552_v6 = vld [vmem:[%s4103_s30 + $0x7b0] sm:$0xff] }
 0x206   : > { %v3755_v51 = vpop.eup %3754  ;;  %3774 = vrcp.f32 %v1387_v47  ;;  %v1389_v58 = vadd.f32 1.0, %v3753_v39  ;;  %v2784_v47 = vmul.f32 -1.442695, %v5540_v41 }
 0x207   : > { %v3757_v17 = vpop.eup %3756  ;;  %3776 = vrcp.f32 %v1388_v30  ;;  %v1390_v4 = vadd.f32 1.0, %v3755_v51 }
 0x208   : > { %v3759_v12 = vpop.eup %3758  ;;  %3778 = vrcp.f32 %v1389_v58  ;;  %v1391_v3 = vadd.f32 1.0, %v3757_v17 }
 0x209   : > { %v3761_v60 = vpop.eup %3760  ;;  %3780 = vrcp.f32 %v1390_v4  ;;  %v1392_v50 = vadd.f32 1.0, %v3759_v12 }
 0x20a   : > { %v3763_v42 = vpop.eup %3762  ;;  %3782 = vrcp.f32 %v1391_v3  ;;  %v1393_v54 = vadd.f32 1.0, %v3761_v60 }
 0x20b   : > { %v3765_v19 = vpop.eup %3764  ;;  %3784 = vrcp.f32 %v1392_v50  ;;  %v1394_v56 = vadd.f32 1.0, %v3763_v42 }
 0x20c   : > { %v3767_v18 = vpop.eup %3766  ;;  %3786 = vrcp.f32 %v1393_v54  ;;  %v1395_v16 = vadd.f32 1.0, %v3765_v19 }
 0x20d   : > { %v3769_v25 = vpop.eup %3768  ;;  %v2151_v35 = vmul.f32 %v3767_v18, %v5414_v31  ;;  %3788 = vrcp.f32 %v1394_v56 }
 0x20e   : > { %v3771_v33 = vpop.eup %3770  ;;  %v2152_v1 = vmul.f32 %v3769_v25, %v5417_v34  ;;  %3790 = vrcp.f32 %v1395_v16 }
 0x20f   : > { %v3773_v15 = vpop.eup %3772  ;;  %2407 = vst [vmem:[%s4190_s17 + $0x6e8] sm:$0xff] %v2151_v35  ;;  %v2153_v31 = vmul.f32 %v3771_v33, %v5420_v37  ;;  %3792 = vpow2.f32 %v2774_v10 }
 0x210   : > { %v3775_v2 = vpop.eup %3774  ;;  %2408 = vst [vmem:[%s4190_s17 + $0x6f0] sm:$0xff] %v2152_v1  ;;  %v2154_v34 = vmul.f32 %v3773_v15, %v5424_v48  ;;  %3794 = vpow2.f32 %v2775_v27  ;;  %v5570_v1 = vld [vmem:[%s4103_s30 + $0x7b8] sm:$0xff] }
 0x211   : > { %v3777_v26 = vpop.eup %3776  ;;  %2409 = vst [vmem:[%s4190_s17 + $0x6f8] sm:$0xff] %v2153_v31  ;;  %v2155_v37 = vmul.f32 %v3775_v2, %v5428_v43  ;;  %3796 = vpow2.f32 %v2776_v9  ;;  %v5573_v31 = vld [vmem:[%s4103_s30 + $0x7c0] sm:$0xff] }
 0x212   : > { %v3779_v28 = vpop.eup %3778  ;;  %2410 = vst [vmem:[%s4190_s17 + $0x700] sm:$0xff] %v2154_v34  ;;  %v2156_v48 = vmul.f32 %v3777_v26, %v5433_v63  ;;  %3798 = vpow2.f32 %v2777_v7  ;;  %v5576_v34 = vld [vmem:[%s4103_s30 + $0x7c8] sm:$0xff] }
 0x213   : > { %v3781_v32 = vpop.eup %3780  ;;  %2411 = vst [vmem:[%s4190_s17 + $0x708] sm:$0xff] %v2155_v37  ;;  %v2157_v43 = vmul.f32 %v3779_v28, %v5438_v59  ;;  %3800 = vpow2.f32 %v2778_v61  ;;  %v2787_v37 = vmul.f32 -1.442695, %v5570_v1 }
 0x214   : > { %v3783_v36 = vpop.eup %3782  ;;  %2412 = vst [vmem:[%s4190_s17 + $0x710] sm:$0xff] %v2156_v48  ;;  %v2158_v63 = vmul.f32 %v3781_v32, %v5444_v11  ;;  %3802 = vpow2.f32 %v2779_v40  ;;  %v2785_v11 = vmul.f32 -1.442695, %v5546_v24  ;;  %v5584_v32 = vld [vmem:[%s4103_s30 + $0x7d8] sm:$0xff] }
 0x215   : > { %v3785_v38 = vpop.eup %3784  ;;  %2413 = vst [vmem:[%s4190_s17 + $0x718] sm:$0xff] %v2157_v43  ;;  %v2159_v59 = vmul.f32 %v3783_v36, %v5450_v21  ;;  %3804 = vpow2.f32 %v2780_v45  ;;  %v2786_v21 = vmul.f32 -1.442695, %v5552_v6  ;;  %v5580_v45 = vld [vmem:[%s4103_s30 + $0x7d0] sm:$0xff]  ;;  %v2789_v36 = vmul.f32 -1.442695, %v5576_v34 }
 0x216   : > { %v3787_v39 = vpop.eup %3786  ;;  %2414 = vst [vmem:[%s4190_s17 + $0x720] sm:$0xff] %v2158_v63  ;;  %v2160_v30 = vmul.f32 %v3785_v38, %v5456_v46  ;;  %3806 = vpow2.f32 %v2781_v44  ;;  %v2788_v44 = vmul.f32 -1.442695, %v5573_v31  ;;  %v5589_v63 = vld [vmem:[%s4103_s30 + $0x7e0] sm:$0xff] }
 0x217   : > { %v3789_v51 = vpop.eup %3788  ;;  %2415 = vst [vmem:[%s4190_s17 + $0x728] sm:$0xff] %v2159_v59  ;;  %v2161_v58 = vmul.f32 %v3787_v39, %v5462_v23  ;;  %3808 = vpow2.f32 %v2782_v53  ;;  %v2790_v59 = vmul.f32 -1.442695, %v5580_v45 }
 0x218   : > { %v3791_v17 = vpop.eup %3790  ;;  %2416 = vst [vmem:[%s4190_s17 + $0x730] sm:$0xff] %v2160_v30  ;;  %v2162_v4 = vmul.f32 %v3789_v51, %v5468_v55  ;;  %3810 = vpow2.f32 %v2783_v52  ;;  %v2791_v30 = vmul.f32 -1.442695, %v5584_v32 }
 0x219   : > { %v3793_v12 = vpop.eup %3792  ;;  %2417 = vst [vmem:[%s4190_s17 + $0x738] sm:$0xff] %v2161_v58  ;;  %v2163_v46 = vmul.f32 %v3791_v17, %v5474_v57  ;;  %3812 = vpow2.f32 %v2784_v47  ;;  %v5594_v47 = vld [vmem:[%s4103_s30 + $0x7e8] sm:$0xff]  ;;  %v2792_v58 = vmul.f32 -1.442695, %v5589_v63 }
 0x21a   : > { %v3795_v3 = vpop.eup %3794  ;;  %2418 = vst [vmem:[%s4190_s17 + $0x740] sm:$0xff] %v2162_v4  ;;  %v1396_v60 = vadd.f32 1.0, %v3793_v12  ;;  %3814 = vpow2.f32 %v2785_v11  ;;  %v5600_v11 = vld [vmem:[%s4103_s30 + $0x7f0] sm:$0xff]  ;;  %v2793_v4 = vmul.f32 -1.442695, %v5594_v47 }
 0x21b   : > { %v3797_v50 = vpop.eup %3796  ;;  %2419 = vst [vmem:[%s4190_s17 + $0x748] sm:$0xff] %v2163_v46  ;;  %v1397_v23 = vadd.f32 1.0, %v3795_v3  ;;  %3816 = vpow2.f32 %v2786_v21  ;;  %v5606_v21 = vld [vmem:[%s4103_s30 + $0x7f8] sm:$0xff] }
 0x21c   : > { %v3799_v42 = vpop.eup %3798  ;;  %3818 = vrcp.f32 %v1396_v60  ;;  %v1398_v54 = vadd.f32 1.0, %v3797_v50 }
 0x21d   : > { %v3801_v19 = vpop.eup %3800  ;;  %3820 = vrcp.f32 %v1397_v23  ;;  %v1399_v55 = vadd.f32 1.0, %v3799_v42 }
 0x21e   : > { %v3803_v56 = vpop.eup %3802  ;;  %3822 = vrcp.f32 %v1398_v54  ;;  %v1400_v10 = vadd.f32 1.0, %v3801_v19 }
 0x21f   : > { %v3805_v57 = vpop.eup %3804  ;;  %3824 = vrcp.f32 %v1399_v55  ;;  %v1401_v18 = vadd.f32 1.0, %v3803_v56 }
 0x220   : > { %v3807_v16 = vpop.eup %3806  ;;  %3826 = vrcp.f32 %v1400_v10  ;;  %v1402_v27 = vadd.f32 1.0, %v3805_v57 }
 0x221   : > { %v3809_v25 = vpop.eup %3808  ;;  %3828 = vrcp.f32 %v1401_v18  ;;  %v1403_v35 = vadd.f32 1.0, %v3807_v16 }
 0x222   : > { %v3811_v9 = vpop.eup %3810  ;;  %3830 = vrcp.f32 %v1402_v27  ;;  %v1404_v33 = vadd.f32 1.0, %v3809_v25 }
 0x223   : > { %v3813_v7 = vpop.eup %3812  ;;  %3832 = vrcp.f32 %v1403_v35  ;;  %v1405_v15 = vadd.f32 1.0, %v3811_v9 }
 0x224   : > { %v3815_v61 = vpop.eup %3814  ;;  %3834 = vrcp.f32 %v1404_v33  ;;  %v1406_v2 = vadd.f32 1.0, %v3813_v7 }
 0x225   : > { %v3817_v40 = vpop.eup %3816  ;;  %3836 = vrcp.f32 %v1405_v15  ;;  %v1407_v26 = vadd.f32 1.0, %v3815_v61 }
 0x226   : > { %v3819_v28 = vpop.eup %3818  ;;  %3838 = vrcp.f32 %v1406_v2  ;;  %v1408_v48 = vadd.f32 1.0, %v3817_v40 }
 0x227   : > { %v3821_v43 = vpop.eup %3820  ;;  %v2164_v53 = vmul.f32 %v3819_v28, %v5492_v49  ;;  %3840 = vrcp.f32 %v1407_v26 }
 0x228   : > { %v3823_v52 = vpop.eup %3822  ;;  %v2165_v38 = vmul.f32 %v3821_v43, %v5495_v20  ;;  %3842 = vrcp.f32 %v1408_v48 }
 0x229   : > { %v3825_v39 = vpop.eup %3824  ;;  %2420 = vst [vmem:[%s4190_s17 + $0x750] sm:$0xff] %v2164_v53  ;;  %v2166_v49 = vmul.f32 %v3823_v52, %v5498_v22  ;;  %3844 = vpow2.f32 %v2787_v37 }
 0x22a   : > { %v3827_v51 = vpop.eup %3826  ;;  %2421 = vst [vmem:[%s4190_s17 + $0x758] sm:$0xff] %v2165_v38  ;;  %v2167_v20 = vmul.f32 %v3825_v39, %v5502_v0  ;;  %3846 = vpow2.f32 %v2788_v44  ;;  %v2794_v0 = vmul.f32 -1.442695, %v5600_v11 }
 0x22b   : > { %v3829_v17 = vpop.eup %3828  ;;  %2422 = vst [vmem:[%s4190_s17 + $0x760] sm:$0xff] %v2166_v49  ;;  %v2168_v22 = vmul.f32 %v3827_v51, %v5506_v62  ;;  %3848 = vpow2.f32 %v2789_v36  ;;  %v2795_v62 = vmul.f32 -1.442695, %v5606_v21 }
 0x22c   : > { %v3831_v12 = vpop.eup %3830  ;;  %2423 = vst [vmem:[%s4190_s17 + $0x768] sm:$0xff] %v2167_v20  ;;  %v2169_v46 = vmul.f32 %v3829_v17, %v5511_v8  ;;  %3850 = vpow2.f32 %v2790_v59 }
 0x22d   : > { %v3833_v3 = vpop.eup %3832  ;;  %2424 = vst [vmem:[%s4190_s17 + $0x770] sm:$0xff] %v2168_v22  ;;  %v2170_v60 = vmul.f32 %v3831_v12, %v5516_v29  ;;  %3852 = vpow2.f32 %v2791_v30 }
 0x22e   : > { %v3835_v50 = vpop.eup %3834  ;;  %2425 = vst [vmem:[%s4190_s17 + $0x778] sm:$0xff] %v2169_v46  ;;  %v2171_v23 = vmul.f32 %v3833_v3, %v5522_v13  ;;  %3854 = vpow2.f32 %v2792_v58 }
 0x22f   : > { %v3837_v42 = vpop.eup %3836  ;;  %2426 = vst [vmem:[%s4190_s17 + $0x780] sm:$0xff] %v2170_v60  ;;  %v2172_v8 = vmul.f32 %v3835_v50, %v5528_v14  ;;  %3856 = vpow2.f32 %v2793_v4 }
 0x230   : > { %v3839_v54 = vpop.eup %3838  ;;  %2427 = vst [vmem:[%s4190_s17 + $0x788] sm:$0xff] %v2171_v23  ;;  %v2173_v29 = vmul.f32 %v3837_v42, %v5534_v5  ;;  %3858 = vpow2.f32 %v2794_v0 }
 0x231   : > { %v3841_v19 = vpop.eup %3840  ;;  %2428 = vst [vmem:[%s4190_s17 + $0x790] sm:$0xff] %v2172_v8  ;;  %v2174_v55 = vmul.f32 %v3839_v54, %v5540_v41  ;;  %3860 = vpow2.f32 %v2795_v62 }
 0x232   : > { %v3843_v13 = vpop.eup %3842  ;;  %2429 = vst [vmem:[%s4190_s17 + $0x798] sm:$0xff] %v2173_v29  ;;  %v2175_v56 = vmul.f32 %v3841_v19, %v5546_v24 }
 0x233   : > { %v3845_v10 = vpop.eup %3844  ;;  %2430 = vst [vmem:[%s4190_s17 + $0x7a0] sm:$0xff] %v2174_v55  ;;  %v2176_v14 = vmul.f32 %v3843_v13, %v5552_v6 }
 0x234   : > { %v3847_v57 = vpop.eup %3846  ;;  %2431 = vst [vmem:[%s4190_s17 + $0x7a8] sm:$0xff] %v2175_v56  ;;  %v1409_v18 = vadd.f32 1.0, %v3845_v10 }
 0x235   : > { %v3849_v16 = vpop.eup %3848  ;;  %2432 = vst [vmem:[%s4190_s17 + $0x7b0] sm:$0xff] %v2176_v14  ;;  %v1410_v5 = vadd.f32 1.0, %v3847_v57 }
 0x236   : > { %v3851_v27 = vpop.eup %3850  ;;  %3862 = vrcp.f32 %v1409_v18  ;;  %v1411_v25 = vadd.f32 1.0, %v3849_v16 }
 0x237   : > { %v3853_v35 = vpop.eup %3852  ;;  %3864 = vrcp.f32 %v1410_v5  ;;  %v1412_v41 = vadd.f32 1.0, %v3851_v27 }
 0x238   : > { %v3855_v9 = vpop.eup %3854  ;;  %3866 = vrcp.f32 %v1411_v25  ;;  %v1413_v33 = vadd.f32 1.0, %v3853_v35 }
 0x239   : > { %v3857_v24 = vpop.eup %3856  ;;  %3868 = vrcp.f32 %v1412_v41  ;;  %v1414_v7 = vadd.f32 1.0, %v3855_v9 }
 0x23a   : > { %v3859_v15 = vpop.eup %3858  ;;  %3870 = vrcp.f32 %v1413_v33  ;;  %v1415_v6 = vadd.f32 1.0, %v3857_v24 }
 0x23b   : > { %v3861_v61 = vpop.eup %3860  ;;  %3872 = vrcp.f32 %v1414_v7  ;;  %v1416_v2 = vadd.f32 1.0, %v3859_v15 }
 0x23c   : > { %3874 = vrcp.f32 %v1415_v6  ;;  %v1417_v40 = vadd.f32 1.0, %v3861_v61 }
 0x23d   : > { %3876 = vrcp.f32 %v1416_v2 }
 0x23e   : > { %3878 = vrcp.f32 %v1417_v40 }
 0x240   : > { %v3863_v26 = vpop.eup %3862 }
 0x241   : > { %v3865_v37 = vpop.eup %3864  ;;  %v2177_v28 = vmul.f32 %v3863_v26, %v5570_v1 }
 0x242   : > { %v3867_v48 = vpop.eup %3866  ;;  %v2178_v44 = vmul.f32 %v3865_v37, %v5573_v31 }
 0x243   : > { %v3869_v43 = vpop.eup %3868  ;;  %2433 = vst [vmem:[%s4190_s17 + $0x7b8] sm:$0xff] %v2177_v28  ;;  %v2179_v53 = vmul.f32 %v3867_v48, %v5576_v34 }
 0x244   : > { %v3871_v36 = vpop.eup %3870  ;;  %2434 = vst [vmem:[%s4190_s17 + $0x7c0] sm:$0xff] %v2178_v44  ;;  %v2180_v52 = vmul.f32 %v3869_v43, %v5580_v45 }
 0x245   : > { %v3873_v38 = vpop.eup %3872  ;;  %2435 = vst [vmem:[%s4190_s17 + $0x7c8] sm:$0xff] %v2179_v53  ;;  %v2181_v59 = vmul.f32 %v3871_v36, %v5584_v32 }
 0x246   : > { %v3875_v1 = vpop.eup %3874  ;;  %2436 = vst [vmem:[%s4190_s17 + $0x7d0] sm:$0xff] %v2180_v52  ;;  %v2182_v31 = vmul.f32 %v3873_v38, %v5589_v63 }
 0x247   : > { %v3877_v34 = vpop.eup %3876  ;;  %2437 = vst [vmem:[%s4190_s17 + $0x7d8] sm:$0xff] %v2181_v59  ;;  %v2183_v39 = vmul.f32 %v3875_v1, %v5594_v47 }
 0x248   : > { %v3879_v45 = vpop.eup %3878  ;;  %2438 = vst [vmem:[%s4190_s17 + $0x7e0] sm:$0xff] %v2182_v31  ;;  %v2184_v49 = vmul.f32 %v3877_v34, %v5600_v11 }
 0x249   : > { %2439 = vst [vmem:[%s4190_s17 + $0x7e8] sm:$0xff] %v2183_v39  ;;  %v2185_v32 = vmul.f32 %v3879_v45, %v5606_v21 }
 0x24a   : > { %2440 = vst [vmem:[%s4190_s17 + $0x7f0] sm:$0xff] %v2184_v49 }
 0x24b   : > { %2441 = vst [vmem:[%s4190_s17 + $0x7f8] sm:$0xff] %v2185_v32 }
 0x24c   : > { %3923 = shalt.err (!%p3920_p1)
}
 0x24d   : > { %s3924_s13 = scalar_lea.hbm %s5650_s10, 32768  ;;  %s3928_s20 = scalar_lea.hbm %s5700_s1, 131072 }
 0x24e   : > { %p3925_p3 = scmp.ne.s32.totalorder %s5650_s10, %s3924_s13  ;;  %p3929_p0 = scmp.lt.u32.totalorder %s5650_s10, %s5700_s1 }
 0x24f   : > { %p3930_p2 = scmp.lt.u32.totalorder %s3928_s20, %s3924_s13  ;;  %p3932_p6 = scmp.lt.u32.totalorder %s3924_s13, %s5650_s10 }
 0x250   : > { %p3926_p4 = pnand %p3925_p3, %p5707_p10 }
 0x251   : > { %p3931_p7 = por %p3930_p2, %p3929_p0 }
 0x252   : > { %p3927_p5 = pneg %p3926_p4 }
 0x253   : > { %p3933_p11 = por %p3932_p6, %p3931_p7 }
 0x255   : > { %p3934_p12 = pnand %p3933_p11, %p3927_p5 }
 0x257   : > { %3937 = shalt.err (!%p3934_p12)
}
 0x258   : > { %s3982_s24 = smov 1024   ;;  %s3983_s26 = smov 64  }
 0x259   : > { %2808 = dma.vmem_to_hbm [thread:$0]  (%p5707_p10), %s5652_s27, 32768, %s5650_s10, %s2443_s2, %s3982_s24, %s3982_s24, %s3983_s26  }
 0x25a PF: > { %p2819_p8 = scmp.ge.s32.totalorder %s3976_s9, 2  ;;  %s2472_s30 = sand.u32 1, %s3964_s6  }
 0x25b   : > { %p5708_p9 = scmp.ne.s32.totalorder %s5705_s19, 0  ;;  %s2473_s17 = scalar_lea.sflag [#allocation4], %s2472_s30 }
 0x25d   : > { %p2815_p13 = pnand %p2819_p8, %p5708_p9 }
 0x25f   : > { %3959 = dma.done.wait (!%p2815_p13), %s2473_s17, 32768  }
 0x260   : > { %3961 = vsyncadd (!%p2815_p13), %s2473_s17, 4294934528  ;;  %p14_p1 = scmp.ge.s32.totalorder %s4019_s12, 6   ;;  %s5709_s6 = smov %s3968_s7 }
 0x261   : > { %s5710_s7 = smov %s3972_s8  ;;  %s5711_s8 = smov %s4031_s15 }
 0x262   : > { %s5712_s9 = smov %s4019_s12  ;;  %16 = sbr.rel (!%p14_p1) target bundleno = 5 (0x5), region = 69 }
 0x269   :  { %2478 = vsyncpa [#allocation3], 1 }
 0x26a   :  { %2480 = vsyncpa [#allocation3 + $0x1], 1 }
 0x26b   :  { %2481 = vsyncpa [#allocation4], 1 }
 0x26c   :  { %2483 = vsyncpa [#allocation4 + $0x1], 1 }

</bundles_post_ra>
